<compile_context>
chip_gen: v7x
topology: tpu7x:2x2x1
jax: 0.10.0
libtpu: 0.0.40
codegen_flags: <defaults>
</compile_context>

<pallas_src>
import functools
import math

import jax
import jax.numpy as jnp
import numpy as np
from jax.experimental import pallas as pl
from jax.experimental.pallas import tpu as pltpu


def _resident_spec(shape):
    """Constant-index (grid-resident) block; single-buffered when supported."""
    nd = len(shape)
    idx = lambda *_: (0,) * nd
    try:
        return pl.BlockSpec(shape, idx, pipeline_mode=pl.Buffered(1))
    except (TypeError, AttributeError):
        return pl.BlockSpec(shape, idx)


def _vmem_limit_bytes(L, D, dh, attnw_itemsize):
    """Rough per-step VMEM footprint (double-buffered blocks + resident weights +
    in-kernel temporaries) with 2x headroom; clamped to be safe on every generation
    (v7x physical VMEM is 64 MiB)."""
    blocks = 4 * (2 * L * D            # x block
                  + 2 * L * D          # out block (accumulator)
                  + 2 * D * 3 * dh     # per-head Wqkv
                  + 2 * 3 * dh         # per-head bqkv
                  + 2 * dh * D)        # per-head Wfc rows
    blocks += 2 * attnw_itemsize * L * L
    resident = 4 * (dh * L + D * (D // 2) + (D // 2) * D + 8 * D)
    temps = 4 * (5 * L * L + 6 * L * D)
    est = 2 * (blocks + resident + temps)
    return int(min(max(est, 32 * 1024 * 1024), 56 * 1024 * 1024))


def _make_encoder_kernel(h, dh, mxu_bf16, return_attn_weights):
    f32 = jnp.float32
    mm_dt = jnp.bfloat16 if mxu_bf16 else jnp.float32
    scale = 1.0 / math.sqrt(dh)

    def mx(a):  # MXU operand cast (accumulation stays f32 via preferred_element_type)
        return a.astype(mm_dt) if mxu_bf16 else a

    def kernel(x_ref, et_ref, wqkv_ref, bqkv_ref, wfc_ref, bfc_ref,
               w1_ref, b1_ref, w2_ref, b2_ref,
               g1_ref, be1_ref, g2_ref, be2_ref, *out_refs):
        if return_attn_weights:
            out_ref, attnw_ref = out_refs
        else:
            (out_ref,) = out_refs

        hd = pl.program_id(1)

        @pl.when(hd == 0)
        def _init():
            out_ref[0] = jnp.zeros(out_ref.shape[1:], out_ref.dtype)

        x = x_ref[0]                                              # (L, D)
        L, D = x.shape

        # ---- this head's fused QKV projection: (L, D) @ (D, 3*dh) on the MXU ----
        qkv = jnp.dot(mx(x), mx(wqkv_ref[0]),
                      preferred_element_type=f32) + bqkv_ref[0]
        q = qkv[:, 0 * dh:1 * dh] * scale    # fold 1/sqrt(dh) into q (scales QKt & Srel)
        k = qkv[:, 1 * dh:2 * dh]
        v = qkv[:, 2 * dh:3 * dh]

        # ---- scores: content term + relative-position term (both MXU matmuls) ----
        qkt = jnp.dot(mx(q), mx(k).T, preferred_element_type=f32)          # (L, L)
        qe = jnp.dot(mx(q), mx(et_ref[...]), preferred_element_type=f32)   # (L, L)

        # Skew: Srel[i, j] = QE[i, L-1-i+j] for j <= i, else 0.  Row i circular-rolled
        # right by (1 + i) == one strided lane-rotate; mask + add fused into logits.
        row = jax.lax.broadcasted_iota(jnp.int32, (L, L), 0)
        col = jax.lax.broadcasted_iota(jnp.int32, (L, L), 1)
        logits = qkt + jnp.where(
            col <= row,
            pltpu.roll(qe, shift=1, axis=1, stride=1, stride_axis=0),
            0.0)

        logits = logits - jnp.max(logits, axis=-1, keepdims=True)
        p = jnp.exp(logits.astype(mm_dt) if mxu_bf16 else logits)
        s = jnp.sum(p, axis=-1, keepdims=True, dtype=f32)
        inv = pl.reciprocal(s, approx=True)          # EUP slot
        inv = inv * (2.0 - s * inv)                  # one Newton step -> f32 accuracy

        if return_attn_weights:
            w = p.astype(f32) * inv                  # true softmax (returned)
            attnw_ref[0, 0] = w.astype(attnw_ref.dtype)
            wo = jnp.dot(mx(w), mx(v), preferred_element_type=f32)         # (L, dh)
        else:
            # Defer normalization to the (L, dh) result: ~L/dh x less VPU work.
            wo = jnp.dot(p, mx(v), preferred_element_type=f32) * inv       # (L, dh)

        # Per-head slice of the output projection, accumulated into the resident output
        # block (acts as the (L, D) attention accumulator across head grid steps).
        out_ref[0] = out_ref[0] + jnp.dot(mx(wo), mx(wfc_ref[0]),
                                          preferred_element_type=f32)

        # ---- epilogue on the last head: +bfc, residual, LN1, FFN, residual, LN2 ----
        @pl.when(hd == h - 1)
        def _epilogue():
            attn_out = out_ref[0] + bfc_ref[...]          # dropout1 == identity (eval)
            y1 = attn_out + x
            mu1 = jnp.mean(y1, axis=-1, keepdims=True)
            var1 = jnp.mean((y1 - mu1) ** 2, axis=-1, keepdims=True)
            out1 = (y1 - mu1) * jax.lax.rsqrt(var1 + 1e-6) * g1_ref[...] + be1_ref[...]

            hid = jnp.maximum(
                jnp.dot(mx(out1), mx(w1_ref[...]), preferred_element_type=f32)
                + b1_ref[...], 0.0)
            ffn = jnp.dot(mx(hid), mx(w2_ref[...]),
                          preferred_element_type=f32) + b2_ref[...]   # dropout2 == id

            y2 = out1 + ffn
            mu2 = jnp.mean(y2, axis=-1, keepdims=True)
            var2 = jnp.mean((y2 - mu2) ** 2, axis=-1, keepdims=True)
            out_ref[0] = (y2 - mu2) * jax.lax.rsqrt(var2 + 1e-6) * g2_ref[...] \
                         + be2_ref[...]

    return kernel


def pack_encoder_params(params, *, h, L):
    """One-time weight packing (hoisted off the per-forward-call critical path)."""
    D = params["Wq"].shape[0]
    dh = D // h
    E = params["E"]
    Et = jnp.asarray(E[E.shape[0] - L:, :].T)                # (dh, L) == _get_left_embedding^T

    def heads(W):                                            # (D, D) -> (h, D, dh)
        return W.reshape(D, h, dh).transpose(1, 0, 2)

    def heads_b(b):                                          # (1, D) -> (h, 1, dh)
        return b.reshape(1, h, dh).transpose(1, 0, 2)

    Wqkv = jnp.concatenate([heads(params["Wq"]), heads(params["Wk"]),
                            heads(params["Wv"])], axis=-1)   # (h, D, 3*dh), head-interleaved
    bqkv = jnp.concatenate([heads_b(params["bq"]), heads_b(params["bk"]),
                            heads_b(params["bv"])], axis=-1)  # (h, 1, 3*dh)
    Wfc = params["Wfc"].reshape(h, dh, D)                     # row-sliced per head

    return dict(Et=Et, Wqkv=Wqkv, bqkv=bqkv, Wfc=Wfc, bfc=params["bfc"],
                W1=params["W1"], b1=params["b1"], W2=params["W2"], b2=params["b2"],
                g1=params["g1"], be1=params["be1"], g2=params["g2"], be2=params["be2"])


def encoder_layer_forward(x, packed, *, h, return_attn_weights=True,
                          mxu_bf16=False, attnw_dtype=jnp.float32):
    B, L, D = x.shape
    dh = D // h
    Dh = D // 2

    kernel = _make_encoder_kernel(h, dh, mxu_bf16, return_attn_weights)

    in_specs = [
        pl.BlockSpec((1, L, D), lambda b, hd: (b, 0, 0)),          # x (resident per batch)
        _resident_spec((dh, L)),                                    # E_sl^T (shared by heads)
        pl.BlockSpec((1, D, 3 * dh), lambda b, hd: (hd, 0, 0)),     # this head's fused Wqkv
        pl.BlockSpec((1, 1, 3 * dh), lambda b, hd: (hd, 0, 0)),     # this head's bqkv
        pl.BlockSpec((1, dh, D), lambda b, hd: (hd, 0, 0)),         # this head's Wfc rows
        _resident_spec((1, D)),                                     # bfc
        _resident_spec((D, Dh)), _resident_spec((1, Dh)),           # FFN_pre
        _resident_spec((Dh, D)), _resident_spec((1, D)),            # FFN_suf
        _resident_spec((1, D)), _resident_spec((1, D)),             # LayerNorm1 gamma/beta
        _resident_spec((1, D)), _resident_spec((1, D)),             # LayerNorm2 gamma/beta
    ]

    out_shapes = [jax.ShapeDtypeStruct((B, L, D), jnp.float32)]
    out_specs = [pl.BlockSpec((1, L, D), lambda b, hd: (b, 0, 0))]
    attnw_itemsize = 0
    if return_attn_weights:
        out_shapes.append(jax.ShapeDtypeStruct((B, h, L, L), attnw_dtype))
        out_specs.append(pl.BlockSpec((1, 1, L, L), lambda b, hd: (b, hd, 0, 0)))
        attnw_itemsize = jnp.dtype(attnw_dtype).itemsize

    outs = pl.pallas_call(
        kernel,
        out_shape=tuple(out_shapes),
        grid_spec=pltpu.PrefetchScalarGridSpec(
            num_scalar_prefetch=0,
            grid=(B, h),                                     # heads innermost (accumulate)
            in_specs=in_specs,
            out_specs=tuple(out_specs),
        ),
        compiler_params=pltpu.CompilerParams(
            dimension_semantics=("parallel", "arbitrary"),   # batch parallel (v7x 2 TCs)
            vmem_limit_bytes=_vmem_limit_bytes(L, D, dh, attnw_itemsize)),
    )(
        x, packed["Et"], packed["Wqkv"], packed["bqkv"],
        packed["Wfc"], packed["bfc"],
        packed["W1"], packed["b1"], packed["W2"], packed["b2"],
        packed["g1"], packed["be1"], packed["g2"], packed["be2"],
    )
    if return_attn_weights:
        return outs
    return outs[0]


def ref_forward(x, params, *, h):
    """Pure-JAX reference mirroring the PyTorch module exactly (incl. pad/reshape skew)."""
    B, L, D = x.shape
    dh = D // h

    def lin(z, W, b):
        return z @ W + b[0]

    q = lin(x, params["Wq"], params["bq"]).reshape(B, L, h, dh).transpose(0, 2, 1, 3)
    k = lin(x, params["Wk"], params["bk"]).reshape(B, L, h, dh).transpose(0, 2, 1, 3)
    v = lin(x, params["Wv"], params["bv"]).reshape(B, L, h, dh).transpose(0, 2, 1, 3)

    E = params["E"]
    E_sl = E[E.shape[0] - L:, :]
    QE = jnp.einsum("bhld,md->bhlm", q, E_sl)
    M = QE.shape[-1]
    lengths = jnp.arange(M - 1, M - L - 1, -1)
    seq_mask = jnp.arange(M)[None, :] < lengths[:, None]
    QE = QE * (~seq_mask).astype(QE.dtype)
    padded = jnp.pad(QE, ((0, 0), (0, 0), (0, 0), (1, 0)))
    Srel = padded.reshape(B, h, M + 1, L)[:, :, 1:, :]

    QKt = jnp.einsum("bhld,bhmd->bhlm", q, k)
    logits = (QKt + Srel) / math.sqrt(dh)
    w = jax.nn.softmax(logits, axis=-1)
    attn = jnp.einsum("bhlm,bhmd->bhld", w, v)
    attn = attn.transpose(0, 2, 1, 3).reshape(B, L, D)
    attn_out = lin(attn, params["Wfc"], params["bfc"])

    def ln(z, g, be):
        mu = z.mean(-1, keepdims=True)
        var = ((z - mu) ** 2).mean(-1, keepdims=True)
        return (z - mu) / jnp.sqrt(var + 1e-6) * g[0] + be[0]

    out1 = ln(attn_out + x, params["g1"], params["be1"])
    ffn = jax.nn.relu(lin(out1, params["W1"], params["b1"]))
    ffn = lin(ffn, params["W2"], params["b2"])
    out2 = ln(out1 + ffn, params["g2"], params["be2"])
    return out2, w


if __name__ == "__main__":
    # Small but lane-aligned shapes (L and D multiples of 128 keep the skew-rotate and
    # the matmul tiles on natural (8, 128) boundaries).
    B, L, D, H, MAX_SEQ = 2, 128, 128, 4, 256
    dh = D // H
    Dh = D // 2

    key = jax.random.PRNGKey(0)
    ks = jax.random.split(key, 16)

    def init(shape, k, scale=0.1):
        return scale * jax.random.normal(k, shape, jnp.float32)

    params = {
        "Wq": init((D, D), ks[0]), "bq": init((1, D), ks[1]),
        "Wk": init((D, D), ks[2]), "bk": init((1, D), ks[3]),
        "Wv": init((D, D), ks[4]), "bv": init((1, D), ks[5]),
        "Wfc": init((D, D), ks[6]), "bfc": init((1, D), ks[7]),
        "W1": init((D, Dh), ks[8]), "b1": init((1, Dh), ks[9]),
        "W2": init((Dh, D), ks[10]), "b2": init((1, D), ks[11]),
        "g1": jnp.ones((1, D), jnp.float32), "be1": jnp.zeros((1, D), jnp.float32),
        "g2": jnp.ones((1, D), jnp.float32), "be2": jnp.zeros((1, D), jnp.float32),
        "E": jax.random.normal(ks[12], (MAX_SEQ, dh), jnp.float32),
    }
    x = jax.random.normal(ks[13], (B, L, D), jnp.float32)

    packed = pack_encoder_params(params, h=H, L=L)      # one-time packing

    # Exact path (f32 MXU, attention weights returned) -- matches the module bit-closely.
    out2, attn_w = encoder_layer_forward(x, packed, h=H,
                                         return_attn_weights=True, mxu_bf16=False)
    jax.block_until_ready(out2)
    jax.block_until_ready(attn_w)

    ref_out2, ref_w = ref_forward(x, params, h=H)
    np.testing.assert_allclose(np.asarray(out2), np.asarray(ref_out2), rtol=2e-4, atol=2e-4)
    np.testing.assert_allclose(np.asarray(attn_w), np.asarray(ref_w), rtol=2e-4, atol=2e-4)

    # Fast path (bf16 MXU operands, no attention-weights writeback, deferred softmax
    # normalization).  Looser tolerance by design -- bf16 operands, f32 accumulation.
    out_fast = encoder_layer_forward(x, packed, h=H,
                                     return_attn_weights=False, mxu_bf16=True)
    jax.block_until_ready(out_fast)
    np.testing.assert_allclose(np.asarray(out_fast), np.asarray(ref_out2),
                               rtol=1e-1, atol=1e-1)

    print("KERNEL_OK")
</pallas_src>

<mosaic_0001>
module attributes {stable_mosaic.version = 11 : i64} {
  func.func @kernel(%arg0: i32, %arg1: i32, %arg2: memref<1x128x128xf32, #tpu.memory_space<vmem>>, %arg3: memref<32x128xf32, #tpu.memory_space<vmem>>, %arg4: memref<1x128x96xf32, #tpu.memory_space<vmem>>, %arg5: memref<1x1x96xf32, #tpu.memory_space<vmem>>, %arg6: memref<1x32x128xf32, #tpu.memory_space<vmem>>, %arg7: memref<1x128xf32, #tpu.memory_space<vmem>>, %arg8: memref<128x64xf32, #tpu.memory_space<vmem>>, %arg9: memref<1x64xf32, #tpu.memory_space<vmem>>, %arg10: memref<64x128xf32, #tpu.memory_space<vmem>>, %arg11: memref<1x128xf32, #tpu.memory_space<vmem>>, %arg12: memref<1x128xf32, #tpu.memory_space<vmem>>, %arg13: memref<1x128xf32, #tpu.memory_space<vmem>>, %arg14: memref<1x128xf32, #tpu.memory_space<vmem>>, %arg15: memref<1x128xf32, #tpu.memory_space<vmem>>, %arg16: memref<1x128x128xf32, #tpu.memory_space<vmem>>, %arg17: memref<1x1x128x128xf32, #tpu.memory_space<vmem>>) attributes {dimension_semantics = [#tpu.dimension_semantics<parallel>, #tpu.dimension_semantics<arbitrary>], iteration_bounds = array<i64: 2, 4>, scalar_prefetch = 0 : i64, scratch_operands = 0 : i64, tpu.core_type = #tpu.core_type<tc>, window_params = [{transform_indices = @transform_0, window_bounds = array<i64: 1, 128, 128>}, {pipeline_mode = #tpu.pipeline_mode<synchronous>, transform_indices = @transform_1, window_bounds = array<i64: 32, 128>}, {transform_indices = @transform_2, window_bounds = array<i64: 1, 128, 96>}, {transform_indices = @transform_3, window_bounds = array<i64: 1, 1, 96>}, {transform_indices = @transform_4, window_bounds = array<i64: 1, 32, 128>}, {pipeline_mode = #tpu.pipeline_mode<synchronous>, transform_indices = @transform_5, window_bounds = array<i64: 1, 128>}, {pipeline_mode = #tpu.pipeline_mode<synchronous>, transform_indices = @transform_6, window_bounds = array<i64: 128, 64>}, {pipeline_mode = #tpu.pipeline_mode<synchronous>, transform_indices = @transform_7, window_bounds = array<i64: 1, 64>}, {pipeline_mode = #tpu.pipeline_mode<synchronous>, transform_indices = @transform_8, window_bounds = array<i64: 64, 128>}, {pipeline_mode = #tpu.pipeline_mode<synchronous>, transform_indices = @transform_9, window_bounds = array<i64: 1, 128>}, {pipeline_mode = #tpu.pipeline_mode<synchronous>, transform_indices = @transform_10, window_bounds = array<i64: 1, 128>}, {pipeline_mode = #tpu.pipeline_mode<synchronous>, transform_indices = @transform_11, window_bounds = array<i64: 1, 128>}, {pipeline_mode = #tpu.pipeline_mode<synchronous>, transform_indices = @transform_12, window_bounds = array<i64: 1, 128>}, {pipeline_mode = #tpu.pipeline_mode<synchronous>, transform_indices = @transform_13, window_bounds = array<i64: 1, 128>}, {transform_indices = @transform_14, window_bounds = array<i64: 1, 128, 128>}, {transform_indices = @transform_15, window_bounds = array<i64: 1, 1, 128, 128>}]} {
    %c0_i32 = arith.constant 0 : i32
    %0 = arith.cmpi eq, %arg1, %c0_i32 : i32
    %1 = arith.extui %0 : i1 to i32
    %c0_i32_0 = arith.constant 0 : i32
    %2 = arith.cmpi ne, %1, %c0_i32_0 : i32
    scf.if %2 {
      %cst_34 = arith.constant 0.000000e+00 : f32
      %58 = vector.broadcast %cst_34 : f32 to vector<128x128xf32>
      %c0_35 = arith.constant 0 : index
      %c0_36 = arith.constant 0 : index
      %c0_37 = arith.constant 0 : index
      %59 = vector.load %arg16[%c0_35, %c0_36, %c0_37] : memref<1x128x128xf32, #tpu.memory_space<vmem>>, vector<1x128x128xf32>
      %60 = vector.shape_cast %59 : vector<1x128x128xf32> to vector<128x128xf32>
      %61 = vector.shape_cast %58 : vector<128x128xf32> to vector<1x128x128xf32>
      tpu.vector_store %arg16[%c0_35, %c0_36, %c0_37], %61 {strides = array<i32>} : memref<1x128x128xf32, #tpu.memory_space<vmem>>, vector<1x128x128xf32>,
    } else {
    }
    %c0 = arith.constant 0 : index
    %c0_1 = arith.constant 0 : index
    %c0_2 = arith.constant 0 : index
    %3 = vector.load %arg2[%c0, %c0_1, %c0_2] : memref<1x128x128xf32, #tpu.memory_space<vmem>>, vector<1x128x128xf32>
    %4 = vector.shape_cast %3 : vector<1x128x128xf32> to vector<128x128xf32>
    %c0_3 = arith.constant 0 : index
    %c0_4 = arith.constant 0 : index
    %c0_5 = arith.constant 0 : index
    %5 = vector.load %arg4[%c0_3, %c0_4, %c0_5] : memref<1x128x96xf32, #tpu.memory_space<vmem>>, vector<1x128x96xf32>
    %6 = vector.shape_cast %5 : vector<1x128x96xf32> to vector<128x96xf32>
    %cst = arith.constant dense<0.000000e+00> : vector<128x96xf32>
    %7 = tpu.matmul %4, %6, %cst {dimension_numbers = #tpu.dot_dimension_numbers<[1], [0], [0], [1], [0, 0, 1, 1], [], []>} : vector<128x128xf32>, vector<128x96xf32>, vector<128x96xf32> -> vector<128x96xf32>
    %c0_6 = arith.constant 0 : index
    %c0_7 = arith.constant 0 : index
    %c0_8 = arith.constant 0 : index
    %8 = vector.load %arg5[%c0_6, %c0_7, %c0_8] : memref<1x1x96xf32, #tpu.memory_space<vmem>>, vector<1x1x96xf32>
    %9 = vector.shape_cast %8 : vector<1x1x96xf32> to vector<1x96xf32>
    %10 = vector.broadcast %9 : vector<1x96xf32> to vector<128x96xf32>
    %11 = arith.addf %7, %10 : vector<128x96xf32>
    %12 = vector.extract_strided_slice %11 {offsets = [0, 0], sizes = [128, 32], strides = [1, 1]} : vector<128x96xf32> to vector<128x32xf32>
    %cst_9 = arith.constant 0.176776692 : f32
    %13 = vector.broadcast %cst_9 : f32 to vector<128x32xf32>
    %14 = arith.mulf %12, %13 : vector<128x32xf32>
    %15 = vector.extract_strided_slice %11 {offsets = [0, 32], sizes = [128, 32], strides = [1, 1]} : vector<128x96xf32> to vector<128x32xf32>
    %16 = vector.extract_strided_slice %11 {offsets = [0, 64], sizes = [128, 32], strides = [1, 1]} : vector<128x96xf32> to vector<128x32xf32>
    %17 = tpu.transpose %15, [1, 0] : vector<128x32xf32> -> vector<32x128xf32>
    %cst_10 = arith.constant dense<0.000000e+00> : vector<128x128xf32>
    %18 = tpu.matmul %14, %17, %cst_10 {dimension_numbers = #tpu.dot_dimension_numbers<[1], [0], [0], [1], [0, 0, 1, 1], [], []>} : vector<128x32xf32>, vector<32x128xf32>, vector<128x128xf32> -> vector<128x128xf32>
    %c0_11 = arith.constant 0 : index
    %c0_12 = arith.constant 0 : index
    %19 = vector.load %arg3[%c0_11, %c0_12] : memref<32x128xf32, #tpu.memory_space<vmem>>, vector<32x128xf32>
    %cst_13 = arith.constant dense<0.000000e+00> : vector<128x128xf32>
    %20 = tpu.matmul %14, %19, %cst_13 {dimension_numbers = #tpu.dot_dimension_numbers<[1], [0], [0], [1], [0, 0, 1, 1], [], []>} : vector<128x32xf32>, vector<32x128xf32>, vector<128x128xf32> -> vector<128x128xf32>
    %21 = tpu.iota {dimensions = array<i32: 0>} : vector<128x128xi32>
    %22 = tpu.iota {dimensions = array<i32: 1>} : vector<128x128xi32>
    %23 = arith.cmpi sle, %22, %21 : vector<128x128xi32>
    %c1_i32 = arith.constant 1 : i32
    %24 = tpu.dynamic_rotate %20 by %c1_i32 dim 1 {stride = 1 : si32, stride_dimension = 0 : si32} : vector<128x128xf32>, i32 -> vector<128x128xf32>
    %cst_14 = arith.constant 0.000000e+00 : f32
    %25 = vector.broadcast %cst_14 : f32 to vector<128x128xf32>
    %26 = arith.select %23, %24, %25 : vector<128x128xi1>, vector<128x128xf32>
    %27 = arith.addf %18, %26 : vector<128x128xf32>
    %cst_15 = arith.constant dense<0xFF800000> : vector<128xf32>
    %28 = vector.multi_reduction <maximumf>, %27, %cst_15 [1] : vector<128x128xf32> to vector<128xf32>
    %29 = vector.shape_cast %28 : vector<128xf32> to vector<128x1xf32>
    %30 = vector.broadcast %29 : vector<128x1xf32> to vector<128x128xf32>
    %31 = arith.subf %27, %30 : vector<128x128xf32>
    %32 = math.exp %31 : vector<128x128xf32>
    %cst_16 = arith.constant dense<0.000000e+00> : vector<128xf32>
    %33 = vector.multi_reduction <add>, %32, %cst_16 [1] : vector<128x128xf32> to vector<128xf32>
    %34 = vector.shape_cast %33 : vector<128xf32> to vector<128x1xf32>
    %35 = tpu.reciprocal %34 {approx = true} : vector<128x1xf32> -> vector<128x1xf32>
    %36 = arith.mulf %34, %35 : vector<128x1xf32>
    %cst_17 = arith.constant 2.000000e+00 : f32
    %37 = vector.broadcast %cst_17 : f32 to vector<128x1xf32>
    %38 = arith.subf %37, %36 : vector<128x1xf32>
    %39 = arith.mulf %35, %38 : vector<128x1xf32>
    %40 = vector.broadcast %39 : vector<128x1xf32> to vector<128x128xf32>
    %41 = arith.mulf %32, %40 : vector<128x128xf32>
    %c0_18 = arith.constant 0 : index
    %c0_19 = arith.constant 0 : index
    %c0_20 = arith.constant 0 : index
    %c0_21 = arith.constant 0 : index
    %42 = vector.load %arg17[%c0_18, %c0_19, %c0_20, %c0_21] : memref<1x1x128x128xf32, #tpu.memory_space<vmem>>, vector<1x1x128x128xf32>
    %43 = vector.shape_cast %42 : vector<1x1x128x128xf32> to vector<128x128xf32>
    %44 = vector.shape_cast %41 : vector<128x128xf32> to vector<1x1x128x128xf32>
    tpu.vector_store %arg17[%c0_18, %c0_19, %c0_20, %c0_21], %44 {strides = array<i32>} : memref<1x1x128x128xf32, #tpu.memory_space<vmem>>, vector<1x1x128x128xf32>,
    %cst_22 = arith.constant dense<0.000000e+00> : vector<128x32xf32>
    %45 = tpu.matmul %41, %16, %cst_22 {dimension_numbers = #tpu.dot_dimension_numbers<[1], [0], [0], [1], [0, 0, 1, 1], [], []>} : vector<128x128xf32>, vector<128x32xf32>, vector<128x32xf32> -> vector<128x32xf32>
    %c0_23 = arith.constant 0 : index
    %c0_24 = arith.constant 0 : index
    %c0_25 = arith.constant 0 : index
    %46 = vector.load %arg16[%c0_23, %c0_24, %c0_25] : memref<1x128x128xf32, #tpu.memory_space<vmem>>, vector<1x128x128xf32>
    %47 = vector.shape_cast %46 : vector<1x128x128xf32> to vector<128x128xf32>
    %c0_26 = arith.constant 0 : index
    %c0_27 = arith.constant 0 : index
    %c0_28 = arith.constant 0 : index
    %48 = vector.load %arg6[%c0_26, %c0_27, %c0_28] : memref<1x32x128xf32, #tpu.memory_space<vmem>>, vector<1x32x128xf32>
    %49 = vector.shape_cast %48 : vector<1x32x128xf32> to vector<32x128xf32>
    %cst_29 = arith.constant dense<0.000000e+00> : vector<128x128xf32>
    %50 = tpu.matmul %45, %49, %cst_29 {dimension_numbers = #tpu.dot_dimension_numbers<[1], [0], [0], [1], [0, 0, 1, 1], [], []>} : vector<128x32xf32>, vector<32x128xf32>, vector<128x128xf32> -> vector<128x128xf32>
    %51 = arith.addf %47, %50 : vector<128x128xf32>
    %c0_30 = arith.constant 0 : index
    %c0_31 = arith.constant 0 : index
    %c0_32 = arith.constant 0 : index
    %52 = vector.load %arg16[%c0_30, %c0_31, %c0_32] : memref<1x128x128xf32, #tpu.memory_space<vmem>>, vector<1x128x128xf32>
    %53 = vector.shape_cast %52 : vector<1x128x128xf32> to vector<128x128xf32>
    %54 = vector.shape_cast %51 : vector<128x128xf32> to vector<1x128x128xf32>
    tpu.vector_store %arg16[%c0_30, %c0_31, %c0_32], %54 {strides = array<i32>} : memref<1x128x128xf32, #tpu.memory_space<vmem>>, vector<1x128x128xf32>,
    %c3_i32 = arith.constant 3 : i32
    %55 = arith.cmpi eq, %arg1, %c3_i32 : i32
    %56 = arith.extui %55 : i1 to i32
    %c0_i32_33 = arith.constant 0 : i32
    %57 = arith.cmpi ne, %56, %c0_i32_33 : i32
    scf.if %57 {
      %c0_34 = arith.constant 0 : index
      %c0_35 = arith.constant 0 : index
      %c0_36 = arith.constant 0 : index
      %58 = vector.load %arg16[%c0_34, %c0_35, %c0_36] : memref<1x128x128xf32, #tpu.memory_space<vmem>>, vector<1x128x128xf32>
      %59 = vector.shape_cast %58 : vector<1x128x128xf32> to vector<128x128xf32>
      %c0_37 = arith.constant 0 : index
      %c0_38 = arith.constant 0 : index
      %60 = vector.load %arg7[%c0_37, %c0_38] : memref<1x128xf32, #tpu.memory_space<vmem>>, vector<1x128xf32>
      %61 = vector.broadcast %60 : vector<1x128xf32> to vector<128x128xf32>
      %62 = arith.addf %59, %61 : vector<128x128xf32>
      %63 = arith.addf %62, %4 : vector<128x128xf32>
      %cst_39 = arith.constant dense<0.000000e+00> : vector<128xf32>
      %64 = vector.multi_reduction <add>, %63, %cst_39 [1] : vector<128x128xf32> to vector<128xf32>
      %65 = vector.shape_cast %64 : vector<128xf32> to vector<128x1xf32>
      %cst_40 = arith.constant 1.280000e+02 : f32
      %66 = vector.broadcast %cst_40 : f32 to vector<128x1xf32>
      %67 = arith.divf %65, %66 : vector<128x1xf32>
      %68 = vector.broadcast %67 : vector<128x1xf32> to vector<128x128xf32>
      %69 = arith.subf %63, %68 : vector<128x128xf32>
      %70 = arith.mulf %69, %69 : vector<128x128xf32>
      %cst_41 = arith.constant dense<0.000000e+00> : vector<128xf32>
      %71 = vector.multi_reduction <add>, %70, %cst_41 [1] : vector<128x128xf32> to vector<128xf32>
      %72 = vector.shape_cast %71 : vector<128xf32> to vector<128x1xf32>
      %cst_42 = arith.constant 1.280000e+02 : f32
      %73 = vector.broadcast %cst_42 : f32 to vector<128x1xf32>
      %74 = arith.divf %72, %73 : vector<128x1xf32>
      %75 = vector.broadcast %67 : vector<128x1xf32> to vector<128x128xf32>
      %76 = arith.subf %63, %75 : vector<128x128xf32>
      %cst_43 = arith.constant 9.99999997E-7 : f32
      %77 = vector.broadcast %cst_43 : f32 to vector<128x1xf32>
      %78 = arith.addf %74, %77 : vector<128x1xf32>
      %79 = math.rsqrt %78 : vector<128x1xf32>
      %80 = vector.broadcast %79 : vector<128x1xf32> to vector<128x128xf32>
      %81 = arith.mulf %76, %80 : vector<128x128xf32>
      %c0_44 = arith.constant 0 : index
      %c0_45 = arith.constant 0 : index
      %82 = vector.load %arg12[%c0_44, %c0_45] : memref<1x128xf32, #tpu.memory_space<vmem>>, vector<1x128xf32>
      %83 = vector.broadcast %82 : vector<1x128xf32> to vector<128x128xf32>
      %84 = arith.mulf %81, %83 : vector<128x128xf32>
      %c0_46 = arith.constant 0 : index
      %c0_47 = arith.constant 0 : index
      %85 = vector.load %arg13[%c0_46, %c0_47] : memref<1x128xf32, #tpu.memory_space<vmem>>, vector<1x128xf32>
      %86 = vector.broadcast %85 : vector<1x128xf32> to vector<128x128xf32>
      %87 = arith.addf %84, %86 : vector<128x128xf32>
      %c0_48 = arith.constant 0 : index
      %c0_49 = arith.constant 0 : index
      %88 = vector.load %arg8[%c0_48, %c0_49] : memref<128x64xf32, #tpu.memory_space<vmem>>, vector<128x64xf32>
      %cst_50 = arith.constant dense<0.000000e+00> : vector<128x64xf32>
      %89 = tpu.matmul %87, %88, %cst_50 {dimension_numbers = #tpu.dot_dimension_numbers<[1], [0], [0], [1], [0, 0, 1, 1], [], []>} : vector<128x128xf32>, vector<128x64xf32>, vector<128x64xf32> -> vector<128x64xf32>
      %c0_51 = arith.constant 0 : index
      %c0_52 = arith.constant 0 : index
      %90 = vector.load %arg9[%c0_51, %c0_52] : memref<1x64xf32, #tpu.memory_space<vmem>>, vector<1x64xf32>
      %91 = vector.broadcast %90 : vector<1x64xf32> to vector<128x64xf32>
      %92 = arith.addf %89, %91 : vector<128x64xf32>
      %cst_53 = arith.constant 0.000000e+00 : f32
      %93 = vector.broadcast %cst_53 : f32 to vector<128x64xf32>
      %94 = arith.maximumf %92, %93 : vector<128x64xf32>
      %c0_54 = arith.constant 0 : index
      %c0_55 = arith.constant 0 : index
      %95 = vector.load %arg10[%c0_54, %c0_55] : memref<64x128xf32, #tpu.memory_space<vmem>>, vector<64x128xf32>
      %cst_56 = arith.constant dense<0.000000e+00> : vector<128x128xf32>
      %96 = tpu.matmul %94, %95, %cst_56 {dimension_numbers = #tpu.dot_dimension_numbers<[1], [0], [0], [1], [0, 0, 1, 1], [], []>} : vector<128x64xf32>, vector<64x128xf32>, vector<128x128xf32> -> vector<128x128xf32>
      %c0_57 = arith.constant 0 : index
      %c0_58 = arith.constant 0 : index
      %97 = vector.load %arg11[%c0_57, %c0_58] : memref<1x128xf32, #tpu.memory_space<vmem>>, vector<1x128xf32>
      %98 = vector.broadcast %97 : vector<1x128xf32> to vector<128x128xf32>
      %99 = arith.addf %96, %98 : vector<128x128xf32>
      %100 = arith.addf %87, %99 : vector<128x128xf32>
      %cst_59 = arith.constant dense<0.000000e+00> : vector<128xf32>
      %101 = vector.multi_reduction <add>, %100, %cst_59 [1] : vector<128x128xf32> to vector<128xf32>
      %102 = vector.shape_cast %101 : vector<128xf32> to vector<128x1xf32>
      %cst_60 = arith.constant 1.280000e+02 : f32
      %103 = vector.broadcast %cst_60 : f32 to vector<128x1xf32>
      %104 = arith.divf %102, %103 : vector<128x1xf32>
      %105 = vector.broadcast %104 : vector<128x1xf32> to vector<128x128xf32>
      %106 = arith.subf %100, %105 : vector<128x128xf32>
      %107 = arith.mulf %106, %106 : vector<128x128xf32>
      %cst_61 = arith.constant dense<0.000000e+00> : vector<128xf32>
      %108 = vector.multi_reduction <add>, %107, %cst_61 [1] : vector<128x128xf32> to vector<128xf32>
      %109 = vector.shape_cast %108 : vector<128xf32> to vector<128x1xf32>
      %cst_62 = arith.constant 1.280000e+02 : f32
      %110 = vector.broadcast %cst_62 : f32 to vector<128x1xf32>
      %111 = arith.divf %109, %110 : vector<128x1xf32>
      %112 = vector.broadcast %104 : vector<128x1xf32> to vector<128x128xf32>
      %113 = arith.subf %100, %112 : vector<128x128xf32>
      %cst_63 = arith.constant 9.99999997E-7 : f32
      %114 = vector.broadcast %cst_63 : f32 to vector<128x1xf32>
      %115 = arith.addf %111, %114 : vector<128x1xf32>
      %116 = math.rsqrt %115 : vector<128x1xf32>
      %117 = vector.broadcast %116 : vector<128x1xf32> to vector<128x128xf32>
      %118 = arith.mulf %113, %117 : vector<128x128xf32>
      %c0_64 = arith.constant 0 : index
      %c0_65 = arith.constant 0 : index
      %119 = vector.load %arg14[%c0_64, %c0_65] : memref<1x128xf32, #tpu.memory_space<vmem>>, vector<1x128xf32>
      %120 = vector.broadcast %119 : vector<1x128xf32> to vector<128x128xf32>
      %121 = arith.mulf %118, %120 : vector<128x128xf32>
      %c0_66 = arith.constant 0 : index
      %c0_67 = arith.constant 0 : index
      %122 = vector.load %arg15[%c0_66, %c0_67] : memref<1x128xf32, #tpu.memory_space<vmem>>, vector<1x128xf32>
      %123 = vector.broadcast %122 : vector<1x128xf32> to vector<128x128xf32>
      %124 = arith.addf %121, %123 : vector<128x128xf32>
      %c0_68 = arith.constant 0 : index
      %c0_69 = arith.constant 0 : index
      %c0_70 = arith.constant 0 : index
      %125 = vector.load %arg16[%c0_68, %c0_69, %c0_70] : memref<1x128x128xf32, #tpu.memory_space<vmem>>, vector<1x128x128xf32>
      %126 = vector.shape_cast %125 : vector<1x128x128xf32> to vector<128x128xf32>
      %127 = vector.shape_cast %124 : vector<128x128xf32> to vector<1x128x128xf32>
      tpu.vector_store %arg16[%c0_68, %c0_69, %c0_70], %127 {strides = array<i32>} : memref<1x128x128xf32, #tpu.memory_space<vmem>>, vector<1x128x128xf32>,
    } else {
    }
    return
  }
  func.func @transform_0(%arg0: i32, %arg1: i32) -> (i32, i32, i32) {
    %c0_i32 = arith.constant 0 : i32
    %c0_i32_0 = arith.constant 0 : i32
    %c0_i32_1 = arith.constant 0 : i32
    return %arg0, %c0_i32, %c0_i32_0 : i32, i32, i32
  }
  func.func @transform_1(%arg0: i32, %arg1: i32) -> (i32, i32) {
    %c0_i32 = arith.constant 0 : i32
    %c0_i32_0 = arith.constant 0 : i32
    %c0_i32_1 = arith.constant 0 : i32
    return %c0_i32, %c0_i32_0 : i32, i32
  }
  func.func @transform_2(%arg0: i32, %arg1: i32) -> (i32, i32, i32) {
    %c0_i32 = arith.constant 0 : i32
    %c0_i32_0 = arith.constant 0 : i32
    %c0_i32_1 = arith.constant 0 : i32
    return %arg1, %c0_i32, %c0_i32_0 : i32, i32, i32
  }
  func.func @transform_3(%arg0: i32, %arg1: i32) -> (i32, i32, i32) {
    %c0_i32 = arith.constant 0 : i32
    %c0_i32_0 = arith.constant 0 : i32
    %c0_i32_1 = arith.constant 0 : i32
    return %arg1, %c0_i32, %c0_i32_0 : i32, i32, i32
  }
  func.func @transform_4(%arg0: i32, %arg1: i32) -> (i32, i32, i32) {
    %c0_i32 = arith.constant 0 : i32
    %c0_i32_0 = arith.constant 0 : i32
    %c0_i32_1 = arith.constant 0 : i32
    return %arg1, %c0_i32, %c0_i32_0 : i32, i32, i32
  }
  func.func @transform_5(%arg0: i32, %arg1: i32) -> (i32, i32) {
    %c0_i32 = arith.constant 0 : i32
    %c0_i32_0 = arith.constant 0 : i32
    %c0_i32_1 = arith.constant 0 : i32
    return %c0_i32, %c0_i32_0 : i32, i32
  }
  func.func @transform_6(%arg0: i32, %arg1: i32) -> (i32, i32) {
    %c0_i32 = arith.constant 0 : i32
    %c0_i32_0 = arith.constant 0 : i32
    %c0_i32_1 = arith.constant 0 : i32
    return %c0_i32, %c0_i32_0 : i32, i32
  }
  func.func @transform_7(%arg0: i32, %arg1: i32) -> (i32, i32) {
    %c0_i32 = arith.constant 0 : i32
    %c0_i32_0 = arith.constant 0 : i32
    %c0_i32_1 = arith.constant 0 : i32
    return %c0_i32, %c0_i32_0 : i32, i32
  }
  func.func @transform_8(%arg0: i32, %arg1: i32) -> (i32, i32) {
    %c0_i32 = arith.constant 0 : i32
    %c0_i32_0 = arith.constant 0 : i32
    %c0_i32_1 = arith.constant 0 : i32
    return %c0_i32, %c0_i32_0 : i32, i32
  }
  func.func @transform_9(%arg0: i32, %arg1: i32) -> (i32, i32) {
    %c0_i32 = arith.constant 0 : i32
    %c0_i32_0 = arith.constant 0 : i32
    %c0_i32_1 = arith.constant 0 : i32
    return %c0_i32, %c0_i32_0 : i32, i32
  }
  func.func @transform_10(%arg0: i32, %arg1: i32) -> (i32, i32) {
    %c0_i32 = arith.constant 0 : i32
    %c0_i32_0 = arith.constant 0 : i32
    %c0_i32_1 = arith.constant 0 : i32
    return %c0_i32, %c0_i32_0 : i32, i32
  }
  func.func @transform_11(%arg0: i32, %arg1: i32) -> (i32, i32) {
    %c0_i32 = arith.constant 0 : i32
    %c0_i32_0 = arith.constant 0 : i32
    %c0_i32_1 = arith.constant 0 : i32
    return %c0_i32, %c0_i32_0 : i32, i32
  }
  func.func @transform_12(%arg0: i32, %arg1: i32) -> (i32, i32) {
    %c0_i32 = arith.constant 0 : i32
    %c0_i32_0 = arith.constant 0 : i32
    %c0_i32_1 = arith.constant 0 : i32
    return %c0_i32, %c0_i32_0 : i32, i32
  }
  func.func @transform_13(%arg0: i32, %arg1: i32) -> (i32, i32) {
    %c0_i32 = arith.constant 0 : i32
    %c0_i32_0 = arith.constant 0 : i32
    %c0_i32_1 = arith.constant 0 : i32
    return %c0_i32, %c0_i32_0 : i32, i32
  }
  func.func @transform_14(%arg0: i32, %arg1: i32) -> (i32, i32, i32) {
    %c0_i32 = arith.constant 0 : i32
    %c0_i32_0 = arith.constant 0 : i32
    %c0_i32_1 = arith.constant 0 : i32
    return %arg0, %c0_i32, %c0_i32_0 : i32, i32, i32
  }
  func.func @transform_15(%arg0: i32, %arg1: i32) -> (i32, i32, i32, i32) {
    %c0_i32 = arith.constant 0 : i32
    %c0_i32_0 = arith.constant 0 : i32
    %c0_i32_1 = arith.constant 0 : i32
    return %arg0, %arg1, %c0_i32, %c0_i32_0 : i32, i32, i32, i32
  }
}

</mosaic_0001>

<bundles_post_ra>
// kernel: tpu_custom_call.1
= control target key start
LH: loop header
LB: loop body
LE: loop exit
PB: predicated region body
PF: predicated region fallthrough
CT: control target
= control target key end

     0   :  { %s5964_s0 = inlined_call_operand.vmem [shape: f32[2,128,128], index: 0, kind: input, shape index: {}]   ;;  %s5965_s1 = inlined_call_operand.vmem [shape: f32[32,128], index: 1, kind: input, shape index: {}]   ;;  %s5966_s2 = inlined_call_operand.vmem [shape: f32[4,128,96], index: 2, kind: input, shape index: {}]   ;;  %s5967_s3 = inlined_call_operand.vmem [shape: f32[4,1,96], index: 3, kind: input, shape index: {}]   ;;  %s5968_s4 = inlined_call_operand.vmem [shape: f32[4,32,128], index: 4, kind: input, shape index: {}]   ;;  %s5969_s5 = inlined_call_operand.vmem [shape: f32[1,128], index: 5, kind: input, shape index: {}]   ;;  %s5970_s6 = inlined_call_operand.vmem [shape: f32[128,64], index: 6, kind: input, shape index: {}]   ;;  %s5971_s7 = inlined_call_operand.vmem [shape: f32[1,64], index: 7, kind: input, shape index: {}]   ;;  %s5972_s8 = inlined_call_operand.vmem [shape: f32[64,128], index: 8, kind: input, shape index: {}]   ;;  %s5973_s9 = inlined_call_operand.vmem [shape: f32[1,128], index: 9, kind: input, shape index: {}]   ;;  %s5974_s10 = inlined_call_operand.vmem [shape: f32[1,128], index: 10, kind: input, shape index: {}]   ;;  %s5975_s11 = inlined_call_operand.vmem [shape: f32[1,128], index: 11, kind: input, shape index: {}]   ;;  %s5976_s12 = inlined_call_operand.vmem [shape: f32[1,128], index: 12, kind: input, shape index: {}]   ;;  %s5977_s13 = inlined_call_operand.vmem [shape: f32[1,128], index: 13, kind: input, shape index: {}]   ;;  %s5978_s14 = inlined_call_operand.hbm [shape: f32[2,128,128], index: 14, kind: output, shape index: {0}]   ;;  %s5979_s15 = inlined_call_operand.hbm [shape: f32[2,4,128,128], index: 15, kind: output, shape index: {1}]  }
   0x1   :  { %6001 = sst [smem:[#allocation24_spill]] %s5964_s0 }
   0x2   :  { %6002 = sst [smem:[#allocation25_spill]] %s5965_s1 }
   0x3   :  { %6003 = sst [smem:[#allocation26_spill]] %s5966_s2 }
   0x4   :  { %6004 = sst [smem:[#allocation27_spill]] %s5971_s7 }
   0x5   :  { %6005 = sst [smem:[#allocation28_spill]] %s5973_s9 }
   0x6   :  { %6006 = sst [smem:[#allocation29_spill]] %s5975_s11 }
   0x7   :  { %6007 = sst [smem:[#allocation30_spill]] %s5976_s12 }
   0x8   :  { %6008 = sst [smem:[#allocation31_spill]] %s5977_s13 }
   0x9   :  { %6009 = sst [smem:[#allocation32_spill]] %s5978_s14 }
   0xa   :  { %6010 = sst [smem:[#allocation33_spill]] %s5979_s15 }
   0xb   :  { %21 = vsyncpa [#allocation3], 0 }
   0xc   :  { %23 = vsyncpa [#allocation3 + $0x1], 0 }
   0xd   :  { %24 = vsyncpa [#allocation5], 0 }
   0xe   :  { %26 = vsyncpa [#allocation5 + $0x1], 0  ;;  %s4495_s18 = smov 0   ;;  %s4497_s19 = smov 0  }
   0xf   :  { %s4499_s20 = smov 0   ;;  %s4501_s21 = smov 0  }
  0x10   :  { %s4503_s22 = smov 0   ;;  %s4505_s23 = smov 0  }
  0x11   :  { %s4507_s24 = smov 0   ;;  %s4509_s25 = smov 0  }
  0x12   :  { %s4511_s26 = smov 0   ;;  %s4513_s27 = smov 0  }
  0x13   :  { %s4515_s28 = smov 0  }
  0x14 LB: > { %6011 = sst [smem:[#allocation8_spill]] %s4350_s18  ;;  %s3083_s29 = sadd.s32 4294967295, %s4390_s28   ;;  %s4390_s28 = sphi %s4515_s28, %s32_s28   ;;  %s4386_s27 = sphi %s4513_s27, %s6064_s27   ;;  %s4382_s26 = sphi %s4511_s26, %s6063_s26   ;;  %s4378_s25 = sphi %s4509_s25, %s6062_s25   ;;  %s4374_s24 = sphi %s4507_s24, %s6061_s24   ;;  %s4370_s23 = sphi %s4505_s23, %s6060_s23   ;;  %s4366_s22 = sphi %s4503_s22, %s6066_s22   ;;  %s4362_s21 = sphi %s4501_s21, %s6065_s21   ;;  %s4358_s20 = sphi %s4499_s20, %s6058_s20   ;;  %s4354_s19 = sphi %s4497_s19, %s6057_s19   ;;  %s4350_s18 = sphi %s4495_s18, %s6056_s18  }
  0x15   : > { %6012 = sst [smem:[#allocation9_spill]] %s4354_s19  ;;  %s3084_s30 = sadd.s32 4294967294, %s4390_s28  }
  0x16   : > { %6013 = sst [smem:[#allocation10_spill]] %s4358_s20  ;;  %s41_s16 = sadd.s32 1, %s4382_s26 }
  0x17   : > { %6014 = sst [smem:[#allocation11_spill]] %s4362_s21  ;;  %s44_s17 = sadd.s32 1, %s4386_s27 }
  0x18   : > { %6015 = sst [smem:[#allocation12_spill]] %s4370_s23  ;;  %p42_p0 = scmp.ge.s32.totalorder %s41_s16, 4 }
  0x19   : > { %6016 = sst [smem:[#allocation13_spill]] %s4382_s26  ;;  %s365_s15 = sadd.s32 1, %s4370_s23 }
  0x1a   : > { %6017 = sst [smem:[#allocation14_spill]] %s4386_s27  ;;  %p375_p1 = scmp.ne.s32.totalorder %s4370_s23, %s4366_s22 }
  0x1b   : > { %6018 = sst [smem:[#allocation15_spill]] %s4390_s28  ;;  %p4557_p2 = scmp.eq.s32.totalorder %s3083_s29, 7 }
  0x1c   : > { %s6068_s16 = smov (%p42_p0, %s41_s16), 0  ;;  %s6070_s17 = smov (!%p42_p0, %s44_s17), %s4386_s27 }
  0x1d   : > { %6020 = sst [smem:[#allocation16_spill]] %s6068_s16  ;;  %p4566_p3 = por %p4557_p2, %p375_p1 }
  0x1e   : > { %p381_p4 = scmp.ne.s32.totalorder %s4366_s22, %s4362_s21  ;;  %p46_p5 = scmp.ge.s32.totalorder %s6070_s17, 2 }
  0x1f   : > { %s6021_s13 = scalar_select %p4566_p3, 1, 0 }
  0x20   : > { %p4572_p6 = scmp.eq.s32.totalorder %s3084_s30, 7  ;;  %s389_s12 = ssub.s32 %s4382_s26, %s6068_s16 }
  0x21   : > { %6022 = sst [smem:[#allocation17_spill]] %s6021_s13  ;;  %s393_s9 = sadd.s32 1, %s4358_s20 }
  0x22   : > { %s6072_s17 = smov (%p46_p5, %s6070_s17), 0  ;;  %p4583_p7 = por %p4572_p6, %p381_p4 }
  0x23   : > { %6024 = sst [smem:[#allocation18_spill]] %s6072_s17  ;;  %p403_p8 = scmp.ne.s32.totalorder %s4358_s20, %s4354_s19 }
  0x24   : > { %s6025_s7 = scalar_select %p4583_p7, 1, 0 }
  0x25   : > { %s362_s21 = ssub.s32 %s4386_s27, %s6072_s17  ;;  %p409_p9 = scmp.ne.s32.totalorder %s4354_s19, %s4350_s18 }
  0x26   : > { %6026 = sst [smem:[#allocation19_spill]] %s6025_s7  ;;  %p363_p10 = scmp.eq.s32.totalorder %s362_s21, 0 }
  0x27   : > { %s390_s30 = sor.u32 %s389_s12, %s362_s21  ;;  %p4595_p12 = por %p403_p8, %p4557_p2 }
  0x28   : > { %p391_p11 = scmp.eq.s32.totalorder %s390_s30, 0  ;;  %p4607_p13 = por %p409_p9, %p4572_p6 }
  0x29   : > { %s6027_s13 = scalar_select %p4595_p12, 1, 0 }
  0x2a   : > { %s4600_s16 = scalar_select %p363_p10, %s4370_s23, %s365_s15  }
  0x2b   : > { %6028 = sst [smem:[#allocation20_spill]] %s6027_s13  ;;  %p3087_p0 = scmp.ge.s32.totalorder %s4390_s28, 1 }
  0x2c   : > { %6029 = sst [smem:[#allocation21_spill]] %s4600_s16  ;;  %p488_p1 = scmp.lt.s32.totalorder %s4390_s28, 9 }
  0x2d   : > { %s4603_s26 = scalar_select %p391_p11, %s4358_s20, %s393_s9  }
  0x2e   : > { %s6031_s11 = scalar_select %p4607_p13, 1, 0 }
  0x2f   : > { %6030 = sst [smem:[#allocation22_spill]] %s4603_s26  ;;  %p489_p4 = pnand %p3087_p0, %p488_p1 }
  0x30   : > { %6032 = sst [smem:[#allocation23_spill]] %s6031_s11  ;;  %s5991_s12 = sand.u32 (!%p489_p4), 1, %s4366_s22  }
  0x31   : > { %492 = sbr.rel (%p489_p4) target bundleno = 2684 (0xa7c), region = 76  ;;  %s5992_s9 = sand.u32 (!%p489_p4), 1, %s4354_s19  }
  0x32   : > { %s3088_s14 = sshll.u32 (!%p489_p4), %s5991_s12, 7  ;;  %s3089_s15 = sshll.u32 (!%p489_p4), %s5992_s9, 7 }
  0x33   : > { %p554_p2 = scmp.lt.s32.totalorder (!%p489_p4), %s4378_s25, 1  ;;  %p559_p5 = scmp.lt.s32.totalorder (!%p489_p4), %s4374_s24, 3 }
  0x34   : > { %s6033_s0 = sld [smem:[#allocation24_spill]] (!%p489_p4)  ;;  %s6034_s2 = sld [smem:[#allocation26_spill]] (!%p489_p4) }
  0x35   : > { %s4646_s19 = scalar_lea.vmem (!%p489_p4), [#allocation2], %s3088_s14  ;;  %s4648_s27 = scalar_lea.vmem (!%p489_p4), [#allocation4], %s3089_s15 }
  0x36   : > { %p3096_p6 = scmp.ne.s32.totalorder (!%p489_p4), %s4374_s24, 0 }
  0x38   : > { %s555_s21 = scalar_select %p554_p2, %s4378_s25, 1 }
  0x39   : > { %s4623_s29 = scalar_select %p559_p5, %s4374_s24, 3 }
  0x3a   : > { %s3195_s30 = sshll.u32 %s555_s21, 7  ;;  %575 = sbr.rel (%p3096_p6) target bundleno = 67 (0x43), region = 80  ;;  %v4392_v0 = vmov (!%p3096_p6), 0.0  }
  0x3b   : > { %s4628_s16 = scalar_lea.vmem %s6033_s0, %s3195_s30  ;;  %s3196_s23 = sshll.u32 %s4623_s29, 7  ;;  %576 = vst [vmem:[%s4646_s19] sm:$0xff] (!%p3096_p6), %v4392_v0  ;;  %577 = vst [vmem:[%s4646_s19 + $0x8] sm:$0xff] (!%p3096_p6), %v4392_v0 }
  0x3c   : > { %s4634_s12 = scalar_lea.vmem %s6034_s2, %s3196_s23  ;;  %s566_s18 = scalar_lea.vmem %s5967_s3, %s4623_s29  ;;  %578 = vst [vmem:[%s4646_s19 + $0x10] sm:$0xff] (!%p3096_p6), %v4392_v0  ;;  %579 = vst [vmem:[%s4646_s19 + $0x18] sm:$0xff] (!%p3096_p6), %v4392_v0 }
  0x3d   : > { %s3197_s7 = sshll.u32 %s4623_s29, 5  ;;  %580 = vst [vmem:[%s4646_s19 + $0x20] sm:$0xff] (!%p3096_p6), %v4392_v0  ;;  %581 = vst [vmem:[%s4646_s19 + $0x28] sm:$0xff] (!%p3096_p6), %v4392_v0 }
  0x3e   : > { %s4644_s21 = scalar_lea.vmem %s5968_s4, %s3197_s7  ;;  %582 = vst [vmem:[%s4646_s19 + $0x30] sm:$0xff] (!%p3096_p6), %v4392_v0  ;;  %583 = vst [vmem:[%s4646_s19 + $0x38] sm:$0xff] (!%p3096_p6), %v4392_v0 }
  0x3f   : > { %584 = vst [vmem:[%s4646_s19 + $0x40] sm:$0xff] (!%p3096_p6), %v4392_v0  ;;  %585 = vst [vmem:[%s4646_s19 + $0x48] sm:$0xff] (!%p3096_p6), %v4392_v0 }
  0x40   : > { %586 = vst [vmem:[%s4646_s19 + $0x50] sm:$0xff] (!%p3096_p6), %v4392_v0  ;;  %587 = vst [vmem:[%s4646_s19 + $0x58] sm:$0xff] (!%p3096_p6), %v4392_v0 }
  0x41   : > { %588 = vst [vmem:[%s4646_s19 + $0x60] sm:$0xff] %v4392_v0  ;;  %589 = vst [vmem:[%s4646_s19 + $0x68] sm:$0xff] %v4392_v0 }
  0x42   : > { %590 = vst [vmem:[%s4646_s19 + $0x70] sm:$0xff] %v4392_v0  ;;  %591 = vst [vmem:[%s4646_s19 + $0x78] sm:$0xff] %v4392_v0 }
  0x43 PF: > { %v608_v1 = vld [vmem:[%s4634_s12] sm:$0xff]  ;;  %v609_v2 = vld [vmem:[%s4634_s12 + $0x8] sm:$0xff]  ;;  %v610_v3 = vld [vmem:[%s4634_s12 + $0x10] sm:$0xff]  ;;  %s6035_s1 = sld [smem:[#allocation25_spill]]  ;;  %vm796_vm0 = vcmask 261120   ;;  %s4395_s14 = smov 257  }
  0x44   : > { %v3719_v4 = vpack.c.bf16 %v609_v2, %v608_v1  ;;  %v611_v5 = vld [vmem:[%s4634_s12 + $0x18] sm:$0xff]  ;;  %v612_v7 = vld [vmem:[%s4634_s12 + $0x20] sm:$0xff]  ;;  %v613_v8 = vld [vmem:[%s4634_s12 + $0x28] sm:$0xff]  ;;  %s4396_s15 = smov 281   ;;  %s4397_s29 = smov 273  }
  0x45   : > { %v3723_v6 = vpack.c.bf16 %v611_v5, %v610_v3  ;;  %v3727_v9 = vpack.c.bf16 %v613_v8, %v612_v7  ;;  %v4674_v10 = vld [vmem:[%s4628_s16] sm:$0xff]  ;;  %v614_v11 = vld [vmem:[%s4634_s12 + $0x30] sm:$0xff]  ;;  %v615_v12 = vld [vmem:[%s4634_s12 + $0x38] sm:$0xff]  ;;  %s4398_s30 = smov 297   ;;  %s4399_s7 = smov 289  }
  0x46   : > { %3720 = vmatprep.subr.bf16.mxu0 %v3719_v4  ;;  %3423 = vmatprep.mubr.f32.mxu0 %v4674_v10  ;;  %v3731_v13 = vpack.c.bf16 %v615_v12, %v614_v11  ;;  %v616_v14 = vld [vmem:[%s4634_s12 + $0x40] sm:$0xff]  ;;  %v617_v15 = vld [vmem:[%s4634_s12 + $0x48] sm:$0xff]  ;;  %v618_v20 = vld [vmem:[%s4634_s12 + $0x50] sm:$0xff]  ;;  %s4400_s11 = smov 313   ;;  %s4401_s13 = smov 305  }
  0x47   : > { %3722 = vmatpush3.bf16.msra.mxu0 %v3719_v4  ;;  %v3735_v19 = vpack.c.bf16 %v617_v15, %v616_v14  ;;  %v619_v21 = vld [vmem:[%s4634_s12 + $0x58] sm:$0xff]  ;;  %v620_v23 = vld [vmem:[%s4634_s12 + $0x60] sm:$0xff]  ;;  %v621_v24 = vld [vmem:[%s4634_s12 + $0x68] sm:$0xff]  ;;  %s4402_s20 = smov 329   ;;  %s4403_s23 = smov 321  }
  0x48   : > { %3724 = vmatprep.subr.bf16.mxu0 %v3723_v6  ;;  %v3739_v22 = vpack.c.bf16 %v619_v21, %v618_v20  ;;  %v3743_v25 = vpack.c.bf16 %v621_v24, %v620_v23  ;;  %v622_v26 = vld [vmem:[%s4634_s12 + $0x70] sm:$0xff]  ;;  %v623_v27 = vld [vmem:[%s4634_s12 + $0x78] sm:$0xff]  ;;  %v4694_v29 = vld [vmem:[%s4628_s16 + $0x8] sm:$0xff]  ;;  %s4404_s26 = smov 345   ;;  %s4405_s28 = smov 337  }
  0x49   : > { %v792_v16 = vld [vmem:[%s6035_s1] sm:$0xff]  ;;  %v793_v17 = vld [vmem:[%s6035_s1 + $0x8] sm:$0xff]  ;;  %v3747_v28 = vpack.c.bf16 %v623_v27, %v622_v26  ;;  %v4697_v30 = vld [vmem:[%s4628_s16 + $0x10] sm:$0xff]  ;;  %s4406_s17 = smov 361   ;;  %s4407_s12 = smov 353  }
  0x4a   : > { %v3751_v18 = vpack.c.bf16 %v793_v17, %v792_v16  ;;  %v4702_v31 = vld [vmem:[%s4628_s16 + $0x18] sm:$0xff]  ;;  %v4705_v32 = vld [vmem:[%s4628_s16 + $0x20] sm:$0xff]  ;;  %v4710_v33 = vld [vmem:[%s4628_s16 + $0x28] sm:$0xff]  ;;  %s4408_s9 = smov 377   ;;  %p3162_p8 = scmp.ne.s32.totalorder %s4374_s24, 3 }
  0x4b   : > { %3726 = vmatpush3.bf16.msra.mxu0 %v3723_v6  ;;  %v4713_v34 = vld [vmem:[%s4628_s16 + $0x30] sm:$0xff]  ;;  %v4718_v35 = vld [vmem:[%s4628_s16 + $0x38] sm:$0xff]  ;;  %v4721_v36 = vld [vmem:[%s4628_s16 + $0x40] sm:$0xff] }
  0x4c   : > { %3728 = vmatprep.subr.bf16.mxu0 %v3727_v9  ;;  %3752 = vmatprep.subr.bf16.mxu1 %v3751_v18  ;;  %v4726_v37 = vld [vmem:[%s4628_s16 + $0x48] sm:$0xff]  ;;  %v4729_v38 = vld [vmem:[%s4628_s16 + $0x50] sm:$0xff]  ;;  %v4734_v39 = vld [vmem:[%s4628_s16 + $0x58] sm:$0xff] }
  0x4d   : > { %3754 = vmatpush3.bf16.msra.mxu1 %v3751_v18  ;;  %v4737_v40 = vld [vmem:[%s4628_s16 + $0x60] sm:$0xff]  ;;  %v4742_v41 = vld [vmem:[%s4628_s16 + $0x68] sm:$0xff]  ;;  %v4745_v42 = vld [vmem:[%s4628_s16 + $0x70] sm:$0xff] }
  0x4e   : > { %v4750_v43 = vld [vmem:[%s4628_s16 + $0x78] sm:$0xff]  ;;  %v794_v44 = vld [vmem:[%s6035_s1 + $0x10] sm:$0xff]  ;;  %v4764_v47 = vld [vmem:[%s566_s18] ss:$0 sm:$0xff]  ;;  %s4393_s18 = smov 96   ;;  %s4394_s16 = smov 265  }
  0x4f   : > { %3730 = vmatpush3.bf16.msra.mxu0 %v3727_v9  ;;  %v795_v45 = vld [vmem:[%s6035_s1 + $0x18] sm:$0xff]  ;;  %vm4882_vm1 = vmpackc.low %vm796_vm0, %vm796_vm0 }
  0x50   : > { %3732 = vmatprep.subr.bf16.mxu0 %v3731_v13  ;;  %v3755_v46 = vpack.c.bf16 %v795_v45, %v794_v44 }
  0x52   : > { %3756 = vmatprep.subr.bf16.mxu1 %v3755_v46 }
  0x53   : > { %3734 = vmatpush3.bf16.msra.mxu0 %v3731_v13  ;;  %3758 = vmatpush3.bf16.msra.mxu1 %v3755_v46 }
  0x54   : > { %3736 = vmatprep.subr.bf16.mxu0 %v3735_v19 }
  0x57   : > { %3738 = vmatpush3.bf16.msra.mxu0 %v3735_v19 }
  0x58   : > { %3740 = vmatprep.subr.bf16.mxu0 %v3739_v22 }
  0x5b   : > { %3742 = vmatpush3.bf16.msra.mxu0 %v3739_v22 }
  0x5c   : > { %3744 = vmatprep.subr.bf16.mxu0 %v3743_v25 }
  0x5f   : > { %3746 = vmatpush3.bf16.msra.mxu0 %v3743_v25 }
  0x60   : > { %3748 = vmatprep.subr.bf16.mxu0 %v3747_v28 }
  0x63   : > { %3750 = vmatpush3.bf16.msra.mxu0 %v3747_v28 }
  0x66   : > { %3424 = vmatmul.mubr.f32.vlgmr.msra.gmra.mrb[0].mxu0 %v4694_v29 }
  0x67   : > { %3426 = vmatprep.mubr.f32.mxu0 %v4697_v30 }
  0x6a   : > { %3427 = vmatmul.mubr.f32.gmra.mrb[2].mxu0 %v4702_v31 }
  0x6b   : > { %3429 = vmatprep.mubr.f32.mxu0 %v4705_v32 }
  0x6e   : > { %3430 = vmatmul.mubr.f32.gmra.mrb[4].mxu0 %v4710_v33 }
  0x6f   : > { %3432 = vmatprep.mubr.f32.mxu0 %v4713_v34 }
  0x72   : > { %3433 = vmatmul.mubr.f32.gmra.mrb[6].mxu0 %v4718_v35 }
  0x73   : > { %3435 = vmatprep.mubr.f32.mxu0 %v4721_v36 }
  0x76   : > { %3436 = vmatmul.mubr.f32.gmra.mrb[8].mxu0 %v4726_v37 }
  0x77   : > { %3438 = vmatprep.mubr.f32.mxu0 %v4729_v38 }
  0x7a   : > { %3439 = vmatmul.mubr.f32.gmra.mrb[10].mxu0 %v4734_v39 }
  0x7b   : > { %3441 = vmatprep.mubr.f32.mxu0 %v4737_v40 }
  0x7e   : > { %3442 = vmatmul.mubr.f32.gmra.mrb[12].mxu0 %v4742_v41 }
  0x7f   : > { %3444 = vmatprep.mubr.f32.mxu0 %v4745_v42 }
  0x82   : > { %3445 = vmatmul.mubr.f32.gmra.mrb[14].mxu0 %v4750_v43 }
 0x139   : > { %v3425_v48 = vpop.f32.mrb[0].mxu0 }
 0x13a   : > { %v703_v49 = vadd.f32 %v3425_v48, %v4764_v47  ;;  %v697_v50 = vpop.f32.mrb[1].mxu0 }
 0x13b   : > { %v698_v51 = vadd.f32 %v4764_v47, %v697_v50 }
 0x13c   : > { %v4772_v55 = vmul.f32 0.17677669, %v703_v49 }
 0x13d   : > { %v3428_v52 = vpop.f32.mrb[2].mxu0  ;;  %v4768_v53 = vpack.i.bf16 %v703_v49, %v698_v51  ;;  %v4770_v54 = vmul.f32 0.17677669, %v698_v51 }
 0x13e   : > { %v713_v56 = vadd.f32 %v3428_v52, %v4764_v47  ;;  %v707_v57 = vpop.f32.mrb[3].mxu0 }
 0x13f   : > { %v708_v58 = vadd.f32 %v4764_v47, %v707_v57  ;;  %4033 = vrot.lane.b32.xlu0 %v4768_v53, %s4393_s18  ;;  %3455 = vmatprep.mubr.msk.f32.mxu1 %vm796_vm0, %v4770_v54 }
 0x140   : > { %v4780_v59 = vmul.f32 0.17677669, %v713_v56  ;;  %3456 = vmatmul.mubr.msk.f32.vlgmr.msra.gmra.mrb[0].mxu1 %vm796_vm0, %v4772_v55 }
 0x141   : > { %v4784_v60 = vmul.f32 0.17677669, %v708_v58  ;;  %v3431_v61 = vpop.f32.mrb[4].mxu0  ;;  %v4786_v62 = vpack.i.bf16 %v713_v56, %v708_v58 }
 0x142   : > { %v723_v63 = vadd.f32 %v3431_v61, %v4764_v47  ;;  %v717_v0 = vpop.f32.mrb[5].mxu0 }
 0x143   : > { %v718_v1 = vadd.f32 %v4764_v47, %v717_v0  ;;  %3458 = vmatprep.mubr.msk.f32.mxu1 %vm796_vm0, %v4784_v60  ;;  %4038 = vrot.lane.b32.xlu0 %v4786_v62, %s4393_s18 }
 0x144   : > { %v4794_v2 = vmul.f32 0.17677669, %v723_v63  ;;  %3459 = vmatmul.mubr.msk.f32.gmra.mrb[2].mxu1 %vm796_vm0, %v4780_v59 }
 0x145   : > { %v4798_v3 = vmul.f32 0.17677669, %v718_v1  ;;  %v3434_v4 = vpop.f32.mrb[6].mxu0  ;;  %v4800_v5 = vpack.i.bf16 %v723_v63, %v718_v1 }
 0x146   : > { %v733_v6 = vadd.f32 %v3434_v4, %v4764_v47  ;;  %v727_v7 = vpop.f32.mrb[7].mxu0 }
 0x147   : > { %v728_v8 = vadd.f32 %v4764_v47, %v727_v7  ;;  %3461 = vmatprep.mubr.msk.f32.mxu1 %vm796_vm0, %v4798_v3  ;;  %4043 = vrot.lane.b32.xlu1 %v4800_v5, %s4393_s18 }
 0x148   : > { %v4808_v9 = vmul.f32 0.17677669, %v733_v6  ;;  %3462 = vmatmul.mubr.msk.f32.gmra.mrb[4].mxu1 %vm796_vm0, %v4794_v2 }
 0x149   : > { %v4812_v11 = vmul.f32 0.17677669, %v728_v8  ;;  %v3437_v12 = vpop.f32.mrb[8].mxu0  ;;  %v4814_v13 = vpack.i.bf16 %v733_v6, %v728_v8 }
 0x14a   : > { %v743_v14 = vadd.f32 %v3437_v12, %v4764_v47  ;;  %v737_v15 = vpop.f32.mrb[9].mxu0 }
 0x14b   : > { %v738_v16 = vadd.f32 %v4764_v47, %v737_v15  ;;  %3464 = vmatprep.mubr.msk.f32.mxu1 %vm796_vm0, %v4812_v11  ;;  %4048 = vrot.lane.b32.xlu1 %v4814_v13, %s4393_s18 }
 0x14c   : > { %v4822_v17 = vmul.f32 0.17677669, %v743_v14  ;;  %3465 = vmatmul.mubr.msk.f32.gmra.mrb[6].mxu1 %vm796_vm0, %v4808_v9 }
 0x14d   : > { %v4826_v18 = vmul.f32 0.17677669, %v738_v16  ;;  %v3440_v19 = vpop.f32.mrb[10].mxu0  ;;  %v4828_v20 = vpack.i.bf16 %v743_v14, %v738_v16 }
 0x14e   : > { %v753_v21 = vadd.f32 %v3440_v19, %v4764_v47  ;;  %v747_v22 = vpop.f32.mrb[11].mxu0 }
 0x14f   : > { %v748_v23 = vadd.f32 %v4764_v47, %v747_v22  ;;  %3467 = vmatprep.mubr.msk.f32.mxu1 %vm796_vm0, %v4826_v18  ;;  %4053 = vrot.lane.b32.xlu0 %v4828_v20, %s4393_s18 }
 0x150   : > { %v4836_v24 = vmul.f32 0.17677669, %v753_v21  ;;  %3468 = vmatmul.mubr.msk.f32.gmra.mrb[8].mxu1 %vm796_vm0, %v4822_v17 }
 0x151   : > { %v4840_v25 = vmul.f32 0.17677669, %v748_v23  ;;  %v3443_v26 = vpop.f32.mrb[12].mxu0  ;;  %v4842_v27 = vpack.i.bf16 %v753_v21, %v748_v23 }
 0x152   : > { %v763_v28 = vadd.f32 %v3443_v26, %v4764_v47  ;;  %v757_v44 = vpop.f32.mrb[13].mxu0 }
 0x153   : > { %v758_v45 = vadd.f32 %v4764_v47, %v757_v44  ;;  %3470 = vmatprep.mubr.msk.f32.mxu1 %vm796_vm0, %v4840_v25  ;;  %4058 = vrot.lane.b32.xlu1 %v4842_v27, %s4393_s18 }
 0x154   : > { %v4850_v46 = vmul.f32 0.17677669, %v763_v28  ;;  %3471 = vmatmul.mubr.msk.f32.gmra.mrb[10].mxu1 %vm796_vm0, %v4836_v24 }
 0x155   : > { %v4854_v48 = vmul.f32 0.17677669, %v758_v45  ;;  %v3446_v49 = vpop.f32.mrb[14].mxu0  ;;  %v4856_v50 = vpack.i.bf16 %v763_v28, %v758_v45 }
 0x156   : > { %v773_v51 = vadd.f32 %v3446_v49, %v4764_v47  ;;  %v767_v52 = vpop.f32.mrb[15].mxu0 }
 0x157   : > { %v768_v56 = vadd.f32 %v4764_v47, %v767_v52  ;;  %3473 = vmatprep.mubr.msk.f32.mxu1 %vm796_vm0, %v4854_v48  ;;  %4063 = vrot.lane.b32.xlu0 %v4856_v50, %s4393_s18 }
 0x158   : > { %v4864_v57 = vmul.f32 0.17677669, %v773_v51  ;;  %3474 = vmatmul.mubr.msk.f32.gmra.mrb[12].mxu1 %vm796_vm0, %v4850_v46 }
 0x159   : > { %v4868_v58 = vmul.f32 0.17677669, %v768_v56  ;;  %v4870_v61 = vpack.i.bf16 %v773_v51, %v768_v56 }
 0x15b   : > { %3476 = vmatprep.mubr.msk.f32.mxu1 %vm796_vm0, %v4868_v58  ;;  %4068 = vrot.lane.b32.xlu1 %v4870_v61, %s4393_s18  ;;  %s4409_s18 = smov 64  }
 0x15c   : > { %3477 = vmatmul.mubr.msk.f32.gmra.mrb[14].mxu1 %vm796_vm0, %v4864_v57 }
 0x15d   : > { %3511 = vmatprep.mubr.msk.f32.mxu1 %vm796_vm0, %v4770_v54 }
 0x1b1   : > { %v4034_v47 = vpop.permute.xlu0 %4033 }
 0x1b2   : > { %v4036_v63 = vunpack.i.h.bf16 %v4034_v47  ;;  %v4035_v0 = vunpack.i.l.bf16 %v4034_v47 }
 0x1b4   : > { %v3759_v4 = vpack.c.bf16 %v4036_v63, %v4035_v0 }
 0x1b5   : > { %v4039_v6 = vpop.permute.xlu0 %4038 }
 0x1b6   : > { %3761 = vmatprep.subr.msk.bf16.mxu1 %vm4882_vm1, %v3759_v4  ;;  %v4041_v7 = vunpack.i.h.bf16 %v4039_v6  ;;  %v4040_v8 = vunpack.i.l.bf16 %v4039_v6 }
 0x1b7   : > { %3764 = vmatpush3.bf16.xpose.msk.msra.mxu1 %vm4882_vm1, %v3759_v4 }
 0x1b8   : > { %v3765_v54 = vpack.c.bf16 %v4041_v7, %v4040_v8 }
 0x1b9   : > { %v4044_v12 = vpop.permute.xlu1 %4043 }
 0x1ba   : > { %3767 = vmatprep.subr.msk.bf16.mxu1 %vm4882_vm1, %v3765_v54  ;;  %v4046_v14 = vunpack.i.h.bf16 %v4044_v12  ;;  %v4045_v15 = vunpack.i.l.bf16 %v4044_v12 }
 0x1bc   : > { %v3771_v16 = vpack.c.bf16 %v4046_v14, %v4045_v15 }
 0x1bd   : > { %v4049_v19 = vpop.permute.xlu1 %4048 }
 0x1be   : > { %v4051_v21 = vunpack.i.h.bf16 %v4049_v19  ;;  %v4050_v22 = vunpack.i.l.bf16 %v4049_v19 }
 0x1bf   : > { %3770 = vmatpush3.bf16.xpose.msk.msra.mxu1 %vm4882_vm1, %v3765_v54 }
 0x1c0   : > { %3773 = vmatprep.subr.msk.bf16.mxu1 %vm4882_vm1, %v3771_v16  ;;  %v3777_v23 = vpack.c.bf16 %v4051_v21, %v4050_v22 }
 0x1c1   : > { %v4054_v26 = vpop.permute.xlu0 %4053 }
 0x1c2   : > { %v4056_v28 = vunpack.i.h.bf16 %v4054_v26  ;;  %v4055_v44 = vunpack.i.l.bf16 %v4054_v26 }
 0x1c4   : > { %v3783_v45 = vpack.c.bf16 %v4056_v28, %v4055_v44 }
 0x1c5   : > { %v4059_v49 = vpop.permute.xlu1 %4058 }
 0x1c6   : > { %v4061_v51 = vunpack.i.h.bf16 %v4059_v49  ;;  %v4060_v52 = vunpack.i.l.bf16 %v4059_v49 }
 0x1c7   : > { %3776 = vmatpush3.bf16.xpose.msk.msra.mxu1 %vm4882_vm1, %v3771_v16 }
 0x1c8   : > { %3779 = vmatprep.subr.msk.bf16.mxu1 %vm4882_vm1, %v3777_v23  ;;  %v3789_v56 = vpack.c.bf16 %v4061_v51, %v4060_v52 }
 0x1c9   : > { %v4064_v47 = vpop.permute.xlu0 %4063 }
 0x1ca   : > { %v4066_v63 = vunpack.i.h.bf16 %v4064_v47  ;;  %v4065_v0 = vunpack.i.l.bf16 %v4064_v47 }
 0x1cc   : > { %v3795_v4 = vpack.c.bf16 %v4066_v63, %v4065_v0 }
 0x1cd   : > { %v4069_v6 = vpop.permute.xlu1 %4068 }
 0x1ce   : > { %v4071_v7 = vunpack.i.h.bf16 %v4069_v6  ;;  %v4070_v8 = vunpack.i.l.bf16 %v4069_v6 }
 0x1cf   : > { %3782 = vmatpush3.bf16.xpose.msk.msra.mxu1 %vm4882_vm1, %v3777_v23 }
 0x1d0   : > { %3785 = vmatprep.subr.msk.bf16.mxu1 %vm4882_vm1, %v3783_v45  ;;  %v3801_v54 = vpack.c.bf16 %v4071_v7, %v4070_v8 }
 0x1d7   : > { %3788 = vmatpush3.bf16.xpose.msk.msra.mxu1 %vm4882_vm1, %v3783_v45 }
 0x1d8   : > { %3791 = vmatprep.subr.msk.bf16.mxu1 %vm4882_vm1, %v3789_v56 }
 0x1df   : > { %3794 = vmatpush3.bf16.xpose.msk.msra.mxu1 %vm4882_vm1, %v3789_v56 }
 0x1e0   : > { %3797 = vmatprep.subr.msk.bf16.mxu1 %vm4882_vm1, %v3795_v4 }
 0x1e7   : > { %3800 = vmatpush3.bf16.xpose.msk.msra.mxu1 %vm4882_vm1, %v3795_v4 }
 0x1e8   : > { %3803 = vmatprep.subr.msk.bf16.mxu1 %vm4882_vm1, %v3801_v54 }
 0x1ef   : > { %3806 = vmatpush3.bf16.xpose.msk.msra.mxu1 %vm4882_vm1, %v3801_v54 }
 0x1f6   : > { %3512 = vmatmul.mubr.msk.f32.vlgmr.msra.gmra.mrb[16].mxu1 %vm796_vm0, %v4772_v55 }
 0x1f7   : > { %3514 = vmatprep.mubr.msk.f32.mxu1 %vm796_vm0, %v4784_v60 }
 0x1fa   : > { %3515 = vmatmul.mubr.msk.f32.gmra.mrb[18].mxu1 %vm796_vm0, %v4780_v59 }
 0x1fb   : > { %3517 = vmatprep.mubr.msk.f32.mxu1 %vm796_vm0, %v4798_v3 }
 0x1fe   : > { %3518 = vmatmul.mubr.msk.f32.gmra.mrb[20].mxu1 %vm796_vm0, %v4794_v2 }
 0x1ff   : > { %3520 = vmatprep.mubr.msk.f32.mxu1 %vm796_vm0, %v4812_v11 }
 0x202   : > { %3521 = vmatmul.mubr.msk.f32.gmra.mrb[22].mxu1 %vm796_vm0, %v4808_v9 }
 0x203   : > { %3523 = vmatprep.mubr.msk.f32.mxu1 %vm796_vm0, %v4826_v18 }
 0x206   : > { %3524 = vmatmul.mubr.msk.f32.gmra.mrb[24].mxu1 %vm796_vm0, %v4822_v17 }
 0x207   : > { %3526 = vmatprep.mubr.msk.f32.mxu1 %vm796_vm0, %v4840_v25 }
 0x20a   : > { %3527 = vmatmul.mubr.msk.f32.gmra.mrb[26].mxu1 %vm796_vm0, %v4836_v24 }
 0x20b   : > { %3529 = vmatprep.mubr.msk.f32.mxu1 %vm796_vm0, %v4854_v48 }
 0x20e   : > { %3530 = vmatmul.mubr.msk.f32.gmra.mrb[28].mxu1 %vm796_vm0, %v4850_v46 }
 0x20f   : > { %3532 = vmatprep.mubr.msk.f32.mxu1 %vm796_vm0, %v4868_v58 }
 0x212   : > { %3533 = vmatmul.mubr.msk.f32.gmra.mrb[30].mxu1 %vm796_vm0, %v4864_v57 }
 0x213   : > { %v3457_v55 = vpop.f32.mrb[0].mxu1 }
 0x214   : > { %1031 = vrot.lane.b32.xlu1 %v3457_v55, %s4394_s16  ;;  %v911_v59 = vpop.f32.mrb[1].mxu1  ;;  %s4410_s16 = smov 369  }
 0x215   : > { %1027 = vrot.lane.b32.xlu0 %v911_v59, %s4395_s14 }
 0x217   : > { %v3460_v60 = vpop.f32.mrb[2].mxu1 }
 0x218   : > { %1039 = vrot.lane.b32.xlu1 %v3460_v60, %s4396_s15  ;;  %v921_v2 = vpop.f32.mrb[3].mxu1 }
 0x219   : > { %1035 = vrot.lane.b32.xlu0 %v921_v2, %s4397_s29 }
 0x21b   : > { %v3463_v3 = vpop.f32.mrb[4].mxu1 }
 0x21c   : > { %1047 = vrot.lane.b32.xlu1 %v3463_v3, %s4398_s30  ;;  %v931_v9 = vpop.f32.mrb[5].mxu1 }
 0x21d   : > { %1043 = vrot.lane.b32.xlu0 %v931_v9, %s4399_s7 }
 0x21f   : > { %v3466_v11 = vpop.f32.mrb[6].mxu1 }
 0x220   : > { %1055 = vrot.lane.b32.xlu1 %v3466_v11, %s4400_s11  ;;  %v941_v17 = vpop.f32.mrb[7].mxu1  ;;  %v990_v11 = vlaneseq  ;;  %s6039_s11 = sld [smem:[#allocation27_spill]] (!%p3162_p8) }
 0x221   : > { %1051 = vrot.lane.b32.xlu0 %v941_v17, %s4401_s13 }
 0x222   : > { %v4988_v17 = vshrl.u32 %v990_v11, 7 }
 0x223   : > { %v3469_v18 = vpop.f32.mrb[8].mxu1 }
 0x224   : > { %1063 = vrot.lane.b32.xlu1 %v3469_v18, %s4402_s20  ;;  %v951_v24 = vpop.f32.mrb[9].mxu1  ;;  %v992_v18 = vadd.s32 8, %v4988_v17 }
 0x225   : > { %1059 = vrot.lane.b32.xlu0 %v951_v24, %s4403_s23  ;;  %v4991_v24 = vand.u32 127, %v990_v11  ;;  %v1001_v11 = vadd.s32 80, %v4988_v17  ;;  %s6040_s23 = sld [smem:[#allocation28_spill]] (!%p3162_p8) }
 0x227   : > { %v3472_v25 = vpop.f32.mrb[10].mxu1  ;;  %vm1010_vm2 = vcmp.le.s32.totalorder %v4991_v24, %v992_v18  ;;  %vm1009_vm3 = vcmp.le.s32.totalorder %v4991_v24, %v4988_v17  ;;  %vm1019_vm13 = vcmp.le.s32.totalorder %v4991_v24, %v1001_v11 }
 0x228   : > { %1071 = vrot.lane.b32.xlu1 %v3472_v25, %s4404_s26  ;;  %v961_v46 = vpop.f32.mrb[11].mxu1  ;;  %v994_v25 = vadd.s32 24, %v4988_v17 }
 0x229   : > { %1067 = vrot.lane.b32.xlu0 %v961_v46, %s4405_s28  ;;  %v993_v46 = vadd.s32 16, %v4988_v17 }
 0x22a   : > { %vm1012_vm4 = vcmp.le.s32.totalorder %v4991_v24, %v994_v25 }
 0x22b   : > { %v3475_v48 = vpop.f32.mrb[12].mxu1  ;;  %vm1011_vm5 = vcmp.le.s32.totalorder %v4991_v24, %v993_v46  ;;  %v1004_v46 = vadd.s32 104, %v4988_v17 }
 0x22c   : > { %1079 = vrot.lane.b32.xlu1 %v3475_v48, %s4406_s17  ;;  %v971_v57 = vpop.f32.mrb[13].mxu1  ;;  %s6041_s17 = sld [smem:[#allocation30_spill]] (!%p3162_p8) }
 0x22d   : > { %1075 = vrot.lane.b32.xlu0 %v971_v57, %s4407_s12  ;;  %vm1022_vm14 = vcmp.le.s32.totalorder %v4991_v24, %v1004_v46 }
 0x22f   : > { %v3478_v58 = vpop.f32.mrb[14].mxu1 }
 0x230   : > { %1087 = vrot.lane.b32.xlu1 %v3478_v58, %s4408_s9  ;;  %v981_v1 = vpop.f32.mrb[15].mxu1 }
 0x231   : > { %4073 = vrot.lane.b32.xlu0 %v4768_v53, %s4409_s18 }
 0x234   : > { %4078 = vrot.lane.b32.xlu1 %v4786_v62, %s4409_s18 }
 0x235   : > { %4083 = vrot.lane.b32.xlu0 %v4800_v5, %s4409_s18 }
 0x238   : > { %4088 = vrot.lane.b32.xlu1 %v4814_v13, %s4409_s18 }
 0x239   : > { %4093 = vrot.lane.b32.xlu0 %v4828_v20, %s4409_s18 }
 0x23d   : > { %1083 = vrot.lane.b32.xlu0 %v981_v1, %s4410_s16  ;;  %v996_v1 = vadd.s32 40, %v4988_v17  ;;  %s6038_s16 = sld [smem:[#allocation29_spill]] (!%p3162_p8) }
 0x23f   : > { %vm1014_vm6 = vcmp.le.s32.totalorder %v4991_v24, %v996_v1 }
 0x286   : > { %v4958_v12 = vpop.permute.xlu1 %1031 }
 0x287   : > { %v4960_v14 = vpop.permute.xlu0 %1027  ;;  %v1090_v48 = vsel %vm1010_vm2, %v4958_v12, 0.0 }
 0x288   : > { %v1089_v58 = vsel %vm1009_vm3, %v4960_v14, 0.0 }
 0x28a   : > { %v4962_v15 = vpop.permute.xlu1 %1039 }
 0x28b   : > { %v4964_v53 = vpop.permute.xlu0 %1035  ;;  %v1092_v12 = vsel %vm1012_vm4, %v4962_v15, 0.0 }
 0x28c   : > { %v1091_v14 = vsel %vm1011_vm5, %v4964_v53, 0.0 }
 0x28e   : > { %v4966_v62 = vpop.permute.xlu1 %1047 }
 0x28f   : > { %v4968_v16 = vpop.permute.xlu0 %1043  ;;  %v1094_v15 = vsel %vm1014_vm6, %v4966_v62, 0.0 }
 0x292   : > { %v4970_v5 = vpop.permute.xlu1 %1055 }
 0x293   : > { %v4972_v13 = vpop.permute.xlu0 %1051 }
 0x296   : > { %v4974_v19 = vpop.permute.xlu1 %1063 }
 0x297   : > { %v4976_v20 = vpop.permute.xlu0 %1059 }
 0x29a   : > { %v4978_v21 = vpop.permute.xlu1 %1071 }
 0x29b   : > { %v4980_v22 = vpop.permute.xlu0 %1067 }
 0x29e   : > { %v4982_v23 = vpop.permute.xlu1 %1079 }
 0x29f   : > { %v4984_v26 = vpop.permute.xlu0 %1075 }
 0x2a2   : > { %v4986_v28 = vpop.permute.xlu1 %1087 }
 0x2a3   : > { %v4074_v44 = vpop.permute.xlu0 %4073 }
 0x2a4   : > { %v4076_v45 = vunpack.i.h.bf16 %v4074_v44  ;;  %v4075_v49 = vunpack.i.l.bf16 %v4074_v44 }
 0x2a6   : > { %v3807_v51 = vpack.c.bf16 %v4076_v45, %v4075_v49  ;;  %v4079_v52 = vpop.permute.xlu1 %4078  ;;  %v995_v49 = vadd.s32 32, %v4988_v17 }
 0x2a7   : > { %v4081_v56 = vunpack.i.h.bf16 %v4079_v52  ;;  %v4080_v47 = vunpack.i.l.bf16 %v4079_v52  ;;  %v4084_v63 = vpop.permute.xlu0 %4083 }
 0x2a8   : > { %v4086_v0 = vunpack.i.h.bf16 %v4084_v63  ;;  %v4085_v4 = vunpack.i.l.bf16 %v4084_v63  ;;  %3808 = vmatprep.subr.bf16.mxu0 %v3807_v51  ;;  %3895 = vmatprep.subr.bf16.mxu1 %v3807_v51  ;;  %vm1013_vm7 = vcmp.le.s32.totalorder %v4991_v24, %v995_v49  ;;  %v1006_v49 = vadd.s32 120, %v4988_v17 }
 0x2a9   : > { %v3811_v6 = vpack.c.bf16 %v4081_v56, %v4080_v47  ;;  %3810 = vmatpush3.bf16.msra.mxu0 %v3807_v51  ;;  %3903 = vmatpush3.bf16.msra.mxu1 %v3807_v51  ;;  %v998_v56 = vadd.s32 56, %v4988_v17  ;;  %v1093_v53 = vsel %vm1013_vm7, %v4968_v16, 0.0 }
 0x2aa   : > { %v4089_v7 = vpop.permute.xlu1 %4088  ;;  %v3815_v8 = vpack.c.bf16 %v4086_v0, %v4085_v4  ;;  %v997_v0 = vadd.s32 48, %v4988_v17  ;;  %vm1024_vm1 = vcmp.le.s32.totalorder %v4991_v24, %v1006_v49 }
 0x2ab   : > { %3812 = vmatprep.subr.bf16.mxu0 %v3811_v6  ;;  %3896 = vmatprep.subr.bf16.mxu1 %v3811_v6  ;;  %v4091_v54 = vunpack.i.h.bf16 %v4089_v7  ;;  %v4090_v55 = vunpack.i.l.bf16 %v4089_v7  ;;  %v4094_v59 = vpop.permute.xlu0 %4093  ;;  %vm1016_vm8 = vcmp.le.s32.totalorder %v4991_v24, %v998_v56  ;;  %v1000_v7 = vadd.s32 72, %v4988_v17 }
 0x2ac   : > { %v4096_v2 = vunpack.i.h.bf16 %v4094_v59  ;;  %v4095_v3 = vunpack.i.l.bf16 %v4094_v59  ;;  %vm1015_vm9 = vcmp.le.s32.totalorder %v4991_v24, %v997_v0  ;;  %v1096_v62 = vsel %vm1016_vm8, %v4970_v5, 0.0 }
 0x2ad   : > { %3814 = vmatpush3.bf16.msra.mxu0 %v3811_v6  ;;  %3904 = vmatpush3.bf16.msra.mxu1 %v3811_v6  ;;  %v3819_v60 = vpack.c.bf16 %v4091_v54, %v4090_v55  ;;  %v999_v55 = vadd.s32 64, %v4988_v17  ;;  %v1095_v16 = vsel %vm1015_vm9, %v4972_v13, 0.0  ;;  %vm1018_vm10 = vcmp.le.s32.totalorder %v4991_v24, %v1000_v7 }
 0x2ae   : > { %3816 = vmatprep.subr.bf16.mxu0 %v3815_v8  ;;  %3897 = vmatprep.subr.bf16.mxu1 %v3815_v8  ;;  %v3823_v9 = vpack.c.bf16 %v4096_v2, %v4095_v3  ;;  %v1002_v2 = vadd.s32 88, %v4988_v17  ;;  %v1098_v5 = vsel %vm1018_vm10, %v4974_v19, 0.0 }
 0x2af   : > { %vm1017_vm11 = vcmp.le.s32.totalorder %v4991_v24, %v999_v55 }
 0x2b0   : > { %v1097_v13 = vsel %vm1017_vm11, %v4976_v20, 0.0  ;;  %vm1020_vm12 = vcmp.le.s32.totalorder %v4991_v24, %v1002_v2  ;;  %v1099_v20 = vsel %vm1019_vm13, %v4980_v22, 0.0 }
 0x2b1   : > { %3818 = vmatpush3.bf16.msra.mxu0 %v3815_v8  ;;  %3905 = vmatpush3.bf16.msra.mxu1 %v3815_v8  ;;  %v1100_v19 = vsel %vm1020_vm12, %v4978_v21, 0.0  ;;  %v1102_v21 = vsel %vm1022_vm14, %v4982_v23, 0.0 }
 0x2b2   : > { %3820 = vmatprep.subr.bf16.mxu0 %v3819_v60  ;;  %3898 = vmatprep.subr.bf16.mxu1 %v3819_v60 }
 0x2b5   : > { %3822 = vmatpush3.bf16.msra.mxu0 %v3819_v60  ;;  %3906 = vmatpush3.bf16.msra.mxu1 %v3819_v60 }
 0x2b6   : > { %3824 = vmatprep.subr.bf16.mxu0 %v3823_v9  ;;  %3899 = vmatprep.subr.bf16.mxu1 %v3823_v9 }
 0x2b9   : > { %3826 = vmatpush3.bf16.msra.mxu0 %v3823_v9  ;;  %3907 = vmatpush3.bf16.msra.mxu1 %v3823_v9 }
 0x2c9   : > { %v3513_v57 = vpop.f32.mrb[16].mxu1 }
 0x2ca   : > { %v5002_v44 = vadd.f32 %v3513_v57, %v1090_v48  ;;  %v1251_v45 = vpop.f32.mrb[17].mxu1 }
 0x2cb   : > { %v5006_v51 = vadd.f32 %v1251_v45, %v1089_v58  ;;  %v1003_v58 = vadd.s32 96, %v4988_v17 }
 0x2cc   : > { %1332 = vmax.xlane.f32.xlu1 %v5002_v44 }
 0x2cd   : > { %v3516_v52 = vpop.f32.mrb[18].mxu1  ;;  %1330 = vmax.xlane.f32.xlu0 %v5006_v51  ;;  %vm1021_vm15 = vcmp.le.s32.totalorder %v4991_v24, %v1003_v58 }
 0x2ce   : > { %v5014_v47 = vadd.f32 %v3516_v52, %v1092_v12  ;;  %v1261_v63 = vpop.f32.mrb[19].mxu1  ;;  %v1101_v22 = vsel %vm1021_vm15, %v4984_v26, 0.0 }
 0x2cf   : > { %v5018_v4 = vadd.f32 %v1261_v63, %v1091_v14  ;;  %v1005_v14 = vadd.s32 112, %v4988_v17 }
 0x2d1   : > { %v3519_v6 = vpop.f32.mrb[20].mxu1  ;;  %1336 = vmax.xlane.f32.xlu0 %v5014_v47  ;;  %vm1023_vm2 = vcmp.le.s32.totalorder %v4991_v24, %v1005_v14 }
 0x2d2   : > { %v5025_v8 = vadd.f32 %v3519_v6, %v1094_v15  ;;  %v1271_v54 = vpop.f32.mrb[21].mxu1  ;;  %v1084_v6 = vpop.permute.xlu0 %1083 }
 0x2d3   : > { %v5029_v59 = vadd.f32 %v1271_v54, %v1093_v53  ;;  %v1104_v53 = vsel %vm1024_vm1, %v4986_v28, 0.0  ;;  %v1103_v23 = vsel %vm1023_vm2, %v1084_v6, 0.0 }
 0x2d5   : > { %v3522_v60 = vpop.f32.mrb[22].mxu1  ;;  %1338 = vmax.xlane.f32.xlu1 %v5029_v59  ;;  %1334 = vmax.xlane.f32.xlu0 %v5018_v4 }
 0x2d6   : > { %v5037_v3 = vadd.f32 %v3522_v60, %v1096_v62  ;;  %v1281_v9 = vpop.f32.mrb[23].mxu1 }
 0x2d7   : > { %v5041_v18 = vadd.f32 %v1281_v9, %v1095_v16 }
 0x2d9   : > { %v3525_v25 = vpop.f32.mrb[24].mxu1  ;;  %1342 = vmax.xlane.f32.xlu1 %v5041_v18  ;;  %1340 = vmax.xlane.f32.xlu0 %v5025_v8 }
 0x2da   : > { %v5049_v48 = vadd.f32 %v3525_v25, %v1098_v5  ;;  %v1291_v57 = vpop.f32.mrb[25].mxu1 }
 0x2db   : > { %v5053_v1 = vadd.f32 %v1291_v57, %v1097_v13 }
 0x2dd   : > { %v3528_v45 = vpop.f32.mrb[26].mxu1  ;;  %1346 = vmax.xlane.f32.xlu1 %v5053_v1  ;;  %1344 = vmax.xlane.f32.xlu0 %v5037_v3 }
 0x2de   : > { %v5061_v12 = vadd.f32 %v3528_v45, %v1100_v19  ;;  %v1301_v52 = vpop.f32.mrb[27].mxu1 }
 0x2df   : > { %v5065_v56 = vadd.f32 %v1301_v52, %v1099_v20 }
 0x2e1   : > { %v3531_v63 = vpop.f32.mrb[28].mxu1  ;;  %1350 = vmax.xlane.f32.xlu1 %v5065_v56  ;;  %1348 = vmax.xlane.f32.xlu0 %v5049_v48 }
 0x2e2   : > { %v5072_v0 = vadd.f32 %v3531_v63, %v1102_v21  ;;  %v1311_v15 = vpop.f32.mrb[29].mxu1 }
 0x2e3   : > { %v1312_v17 = vadd.f32 %v1311_v15, %v1101_v22 }
 0x2e5   : > { %v3534_v7 = vpop.f32.mrb[30].mxu1  ;;  %1354 = vmax.xlane.f32.xlu1 %v1312_v17  ;;  %1352 = vmax.xlane.f32.xlu0 %v5061_v12 }
 0x2e6   : > { %v5077_v54 = vadd.f32 %v3534_v7, %v1104_v53  ;;  %v1321_v55 = vpop.f32.mrb[31].mxu1 }
 0x2e7   : > { %v5079_v26 = vadd.f32 %v1321_v55, %v1103_v23 }
 0x2e9   : > { %1358 = vmax.xlane.f32.xlu1 %v5079_v26  ;;  %1356 = vmax.xlane.f32.xlu0 %v5072_v0 }
 0x2ed   : > { %1360 = vmax.xlane.f32.xlu0 %v5077_v54 }
 0x303   : > { %4098 = vrot.lane.b32.xlu0 %v4842_v27, %s4409_s18 }
 0x359   : > { %v1333_v28 = vpop.xlane.xlu1 %1332 }
 0x35a   : > { %v1363_v24 = vsub.f32 %v5002_v44, %v1333_v28  ;;  %v1331_v62 = vpop.xlane.xlu0 %1330 }
 0x35b   : > { %v1362_v60 = vsub.f32 %v5006_v51, %v1331_v62 }
 0x35c   : > { %v1380_v16 = vmul.f32 1.442695, %v1363_v24 }
 0x35d   : > { %v1378_v2 = vmul.f32 1.442695, %v1362_v60 }
 0x35e   : > { %4112 = vpow2.f32 %v1380_v16  ;;  %v1337_v9 = vpop.xlane.xlu0 %1336 }
 0x35f   : > { %v1365_v11 = vsub.f32 %v5014_v47, %v1337_v9  ;;  %4114 = vpow2.f32 %v1378_v2 }
 0x361   : > { %v1384_v5 = vmul.f32 1.442695, %v1365_v11 }
 0x362   : > { %v1339_v25 = vpop.xlane.xlu1 %1338  ;;  %v1335_v13 = vpop.xlane.xlu0 %1334 }
 0x363   : > { %4116 = vpow2.f32 %v1384_v5  ;;  %v1364_v46 = vsub.f32 %v5018_v4, %v1335_v13  ;;  %v1366_v44 = vsub.f32 %v5029_v59, %v1339_v25 }
 0x365   : > { %v1382_v27 = vmul.f32 1.442695, %v1364_v46  ;;  %v1386_v49 = vmul.f32 1.442695, %v1366_v44 }
 0x366   : > { %v1343_v57 = vpop.xlane.xlu1 %1342  ;;  %v1341_v58 = vpop.xlane.xlu0 %1340 }
 0x367   : > { %v1367_v51 = vsub.f32 %v5025_v8, %v1341_v58  ;;  %4118 = vpow2.f32 %v1382_v27  ;;  %v1368_v4 = vsub.f32 %v5041_v18, %v1343_v57 }
 0x368   : > { %v5092_v19 = vpop.eup %4112 }
 0x369   : > { %v1388_v45 = vmul.f32 1.442695, %v1367_v51  ;;  %1412 = vadd.xlane.f32.xlu1 %v5092_v19  ;;  %v5096_v14 = vpop.eup %4114  ;;  %v1390_v22 = vmul.f32 1.442695, %v1368_v4 }
 0x36a   : > { %v1347_v47 = vpop.xlane.xlu1 %1346  ;;  %v1345_v20 = vpop.xlane.xlu0 %1344 }
 0x36b   : > { %v1369_v52 = vsub.f32 %v5037_v3, %v1345_v20  ;;  %4120 = vpow2.f32 %v1388_v45  ;;  %v1370_v7 = vsub.f32 %v5053_v1, %v1347_v47 }
 0x36c   : > { %4122 = vpow2.f32 %v1386_v49 }
 0x36d   : > { %v5099_v21 = vpop.eup %4116  ;;  %v1392_v59 = vmul.f32 1.442695, %v1369_v52  ;;  %1410 = vadd.xlane.f32.xlu1 %v5096_v14 }
 0x36e   : > { %v1351_v8 = vpop.xlane.xlu1 %1350  ;;  %1416 = vadd.xlane.f32.xlu0 %v5099_v21  ;;  %v1349_v63 = vpop.xlane.xlu0 %1348 }
 0x36f   : > { %4124 = vpow2.f32 %v1392_v59  ;;  %v1371_v15 = vsub.f32 %v5049_v48, %v1349_v63  ;;  %v1394_v48 = vmul.f32 1.442695, %v1370_v7 }
 0x370   : > { %4126 = vpow2.f32 %v1390_v22 }
 0x371   : > { %v5104_v3 = vpop.eup %4118  ;;  %v1396_v23 = vmul.f32 1.442695, %v1371_v15 }
 0x372   : > { %v1355_v6 = vpop.xlane.xlu1 %1354  ;;  %v1353_v53 = vpop.xlane.xlu0 %1352  ;;  %1414 = vadd.xlane.f32.xlu1 %v5104_v3 }
 0x373   : > { %v1374_v18 = vsub.f32 %v1312_v17, %v1355_v6  ;;  %v1373_v17 = vsub.f32 %v5061_v12, %v1353_v53 }
 0x375   : > { %v1402_v55 = vmul.f32 1.442695, %v1374_v18  ;;  %v5108_v28 = vpop.eup %4120  ;;  %v1400_v11 = vmul.f32 1.442695, %v1373_v17 }
 0x376   : > { %v1359_v24 = vpop.xlane.xlu1 %1358  ;;  %v1357_v62 = vpop.xlane.xlu0 %1356  ;;  %1420 = vadd.xlane.f32.xlu1 %v5108_v28 }
 0x377   : > { %4128 = vpow2.f32 %v1402_v55  ;;  %v1376_v60 = vsub.f32 %v5079_v26, %v1359_v24  ;;  %v5113_v16 = vpop.eup %4122  ;;  %v1372_v26 = vsub.f32 %v5065_v56, %v1351_v8  ;;  %v1375_v47 = vsub.f32 %v5072_v0, %v1357_v62 }
 0x378   : > { %4130 = vpow2.f32 %v1396_v23 }
 0x379   : > { %v1406_v2 = vmul.f32 1.442695, %v1376_v60  ;;  %v5115_v9 = vpop.eup %4124  ;;  %v1398_v46 = vmul.f32 1.442695, %v1372_v26  ;;  %v1404_v20 = vmul.f32 1.442695, %v1375_v47 }
 0x37a   : > { %v1361_v1 = vpop.xlane.xlu0 %1360  ;;  %1418 = vadd.xlane.f32.xlu1 %v5113_v16  ;;  %1424 = vadd.xlane.f32.xlu0 %v5115_v9  ;;  %v5120_v5 = vpop.eup %4126 }
 0x37b   : > { %4132 = vpow2.f32 %v1406_v2  ;;  %v1377_v49 = vsub.f32 %v5077_v54, %v1361_v1 }
 0x37c   : > { %4134 = vpow2.f32 %v1394_v48 }
 0x37d   : > { %4136 = vpow2.f32 %v1400_v11  ;;  %v1408_v52 = vmul.f32 1.442695, %v1377_v49 }
 0x37e   : > { %v4099_v25 = vpop.permute.xlu0 %4098  ;;  %1422 = vadd.xlane.f32.xlu1 %v5120_v5  ;;  %4138 = vpow2.f32 %v1398_v46 }
 0x37f   : > { %v4101_v12 = vunpack.i.h.bf16 %v4099_v25  ;;  %v4100_v13 = vunpack.i.l.bf16 %v4099_v25  ;;  %4140 = vpow2.f32 %v1404_v20 }
 0x380   : > { %4142 = vpow2.f32 %v1408_v52 }
 0x381   : > { %v5123_v27 = vpop.eup %4128  ;;  %v3827_v57 = vpack.c.bf16 %v4101_v12, %v4100_v13 }
 0x382   : > { %v5125_v58 = vpop.eup %4130  ;;  %1434 = vadd.xlane.f32.xlu0 %v5123_v27 }
 0x383   : > { %1428 = vadd.xlane.f32.xlu1 %v5125_v58  ;;  %3828 = vmatprep.subr.bf16.mxu0 %v3827_v57 }
 0x384   : > { %3900 = vmatprep.subr.bf16.mxu1 %v3827_v57  ;;  %3830 = vmatpush3.bf16.msra.mxu0 %v3827_v57 }
 0x385   : > { %v5129_v56 = vpop.eup %4132  ;;  %3908 = vmatpush3.bf16.msra.mxu1 %v3827_v57 }
 0x386   : > { %v5131_v44 = vpop.eup %4134  ;;  %1438 = vadd.xlane.f32.xlu0 %v5129_v56 }
 0x387   : > { %1426 = vadd.xlane.f32.xlu1 %v5131_v44  ;;  %v5135_v51 = vpop.eup %4136 }
 0x388   : > { %v5138_v45 = vpop.eup %4138 }
 0x389   : > { %v5147_v4 = vpop.eup %4140 }
 0x38a   : > { %v5150_v59 = vpop.eup %4142 }
 0x38b   : > { %1432 = vadd.xlane.f32.xlu1 %v5135_v51 }
 0x38f   : > { %1430 = vadd.xlane.f32.xlu1 %v5138_v45 }
 0x39c   : > { %4108 = vrot.lane.b32.xlu0 %v4870_v61, %s4409_s18 }
 0x3a0   : > { %4103 = vrot.lane.b32.xlu1 %v4856_v50, %s4409_s18  ;;  %s6042_s18 = sld [smem:[#allocation31_spill]] (!%p3162_p8) }
 0x3c4   : > { %1436 = vadd.xlane.f32.xlu1 %v5147_v4 }
 0x3c8   : > { %1440 = vadd.xlane.f32.xlu1 %v5150_v59 }
 0x3f6   : > { %v1413_v61 = vpop.xlane.xlu1 %1412 }
 0x3f7   : > { %4144 = vrcp.f32 %v1413_v61 }
 0x3fa   : > { %v1411_v8 = vpop.xlane.xlu1 %1410 }
 0x3fb   : > { %4146 = vrcp.f32 %v1411_v8  ;;  %v1417_v50 = vpop.xlane.xlu0 %1416 }
 0x3fc   : > { %4148 = vrcp.f32 %v1417_v50 }
 0x3ff   : > { %v1415_v0 = vpop.xlane.xlu1 %1414 }
 0x400   : > { %4150 = vrcp.f32 %v1415_v0 }
 0x401   : > { %v4145_v63 = vpop.eup %4144 }
 0x402   : > { %v1459_v54 = vmul.f32 %v4145_v63, %v1413_v61 }
 0x403   : > { %v1421_v15 = vpop.xlane.xlu1 %1420 }
 0x404   : > { %v1475_v22 = vsub.f32 2.0, %v1459_v54  ;;  %4152 = vrcp.f32 %v1421_v15 }
 0x405   : > { %v4147_v6 = vpop.eup %4146 }
 0x406   : > { %v4149_v53 = vpop.eup %4148  ;;  %v1491_v18 = vmul.f32 %v4145_v63, %v1475_v22  ;;  %v1458_v7 = vmul.f32 %v4147_v6, %v1411_v8 }
 0x407   : > { %v1461_v23 = vmul.f32 %v4149_v53, %v1417_v50  ;;  %v1419_v62 = vpop.xlane.xlu1 %1418  ;;  %v1425_v60 = vpop.xlane.xlu0 %1424 }
 0x408   : > { %v5154_v55 = vmul.f32 %v5092_v19, %v1491_v18  ;;  %v1474_v24 = vsub.f32 2.0, %v1458_v7  ;;  %4154 = vrcp.f32 %v1419_v62 }
 0x409   : > { %v1477_v48 = vsub.f32 2.0, %v1461_v23  ;;  %4156 = vrcp.f32 %v1425_v60 }
 0x40a   : > { %1523 = vst [vmem:[%s4648_s27 + $0x8] sm:$0xff] %v5154_v55  ;;  %v1490_v17 = vmul.f32 %v4147_v6, %v1474_v24  ;;  %v4151_v2 = vpop.eup %4150 }
 0x40b   : > { %v1493_v1 = vmul.f32 %v4149_v53, %v1477_v48  ;;  %v1460_v26 = vmul.f32 %v4151_v2, %v1415_v0  ;;  %v1423_v11 = vpop.xlane.xlu1 %1422 }
 0x40c   : > { %v1506_v25 = vmul.f32 %v5096_v14, %v1490_v17  ;;  %4158 = vrcp.f32 %v1423_v11 }
 0x40d   : > { %v5160_v19 = vmul.f32 %v5099_v21, %v1493_v1  ;;  %v1476_v12 = vsub.f32 2.0, %v1460_v26 }
 0x40e   : > { %1522 = vst [vmem:[%s4648_s27] sm:$0xff] %v1506_v25  ;;  %3567 = vmatprep.mubr.f32.mxu0 %v1506_v25  ;;  %v4153_v13 = vpop.eup %4152 }
 0x40f   : > { %v1435_v46 = vpop.xlane.xlu0 %1434  ;;  %1525 = vst [vmem:[%s4648_s27 + $0x18] sm:$0xff] %v5160_v19  ;;  %v1492_v57 = vmul.f32 %v4151_v2, %v1476_v12  ;;  %v1463_v47 = vmul.f32 %v4153_v13, %v1421_v15 }
 0x410   : > { %v1429_v20 = vpop.xlane.xlu1 %1428  ;;  %4160 = vrcp.f32 %v1435_v46 }
 0x411   : > { %4162 = vrcp.f32 %v1429_v20  ;;  %v1479_v49 = vsub.f32 2.0, %v1463_v47  ;;  %v5166_v14 = vmul.f32 %v5104_v3, %v1492_v57 }
 0x412   : > { %v4155_v52 = vpop.eup %4154 }
 0x413   : > { %v1439_v21 = vpop.xlane.xlu0 %1438  ;;  %v4157_v61 = vpop.eup %4156  ;;  %v1495_v8 = vmul.f32 %v4153_v13, %v1479_v49  ;;  %v1462_v50 = vmul.f32 %v4155_v52, %v1419_v62  ;;  %1524 = vst [vmem:[%s4648_s27 + $0x10] sm:$0xff] %v5166_v14 }
 0x414   : > { %v1427_v0 = vpop.xlane.xlu1 %1426  ;;  %4164 = vrcp.f32 %v1439_v21  ;;  %v1465_v63 = vmul.f32 %v4157_v61, %v1425_v60 }
 0x415   : > { %4166 = vrcp.f32 %v1427_v0  ;;  %v1478_v54 = vsub.f32 2.0, %v1462_v50  ;;  %v5171_v22 = vmul.f32 %v5108_v28, %v1495_v8 }
 0x416   : > { %v4159_v15 = vpop.eup %4158  ;;  %v1481_v6 = vsub.f32 2.0, %v1465_v63 }
 0x417   : > { %v1494_v3 = vmul.f32 %v4155_v52, %v1478_v54  ;;  %v1464_v53 = vmul.f32 %v4159_v15, %v1423_v11  ;;  %1527 = vst [vmem:[%s4648_s27 + $0x28] sm:$0xff] %v5171_v22  ;;  %v4109_v11 = vpop.permute.xlu0 %4108 }
 0x418   : > { %v1433_v18 = vpop.xlane.xlu1 %1432  ;;  %v1497_v7 = vmul.f32 %v4157_v61, %v1481_v6  ;;  %v4110_v49 = vunpack.i.l.bf16 %v4109_v11 }
 0x419   : > { %4168 = vrcp.f32 %v1433_v18  ;;  %v1480_v24 = vsub.f32 2.0, %v1464_v53  ;;  %v5176_v62 = vmul.f32 %v5113_v16, %v1494_v3  ;;  %v1747_v53 = vld [vmem:[%s4644_s21] sm:$0xff] }
 0x41a   : > { %v4161_v23 = vpop.eup %4160  ;;  %v5179_v28 = vmul.f32 %v5115_v9, %v1497_v7  ;;  %v1748_v7 = vld [vmem:[%s4644_s21 + $0x8] sm:$0xff] }
 0x41b   : > { %v4163_v60 = vpop.eup %4162  ;;  %v1470_v48 = vmul.f32 %v4161_v23, %v1435_v46  ;;  %v1496_v17 = vmul.f32 %v4159_v15, %v1480_v24  ;;  %1526 = vst [vmem:[%s4648_s27 + $0x20] sm:$0xff] %v5176_v62 }
 0x41c   : > { %v1467_v2 = vmul.f32 %v4163_v60, %v1429_v20  ;;  %v1431_v1 = vpop.xlane.xlu1 %1430  ;;  %1529 = vst [vmem:[%s4648_s27 + $0x38] sm:$0xff] %v5179_v28  ;;  %v4111_v20 = vunpack.i.h.bf16 %v4109_v11 }
 0x41d   : > { %v1486_v26 = vsub.f32 2.0, %v1470_v48  ;;  %4170 = vrcp.f32 %v1431_v1  ;;  %v5186_v16 = vmul.f32 %v5120_v5, %v1496_v17 }
 0x41e   : > { %v4165_v25 = vpop.eup %4164  ;;  %v1483_v12 = vsub.f32 2.0, %v1467_v2  ;;  %v1749_v2 = vld [vmem:[%s4644_s21 + $0x10] sm:$0xff] }
 0x41f   : > { %v4167_v13 = vpop.eup %4166  ;;  %v1502_v46 = vmul.f32 %v4161_v23, %v1486_v26  ;;  %v1472_v9 = vmul.f32 %v4165_v25, %v1439_v21  ;;  %1528 = vst [vmem:[%s4648_s27 + $0x30] sm:$0xff] %v5186_v16  ;;  %v3835_v23 = vpack.c.bf16 %v4111_v20, %v4110_v49  ;;  %v1750_v26 = vld [vmem:[%s4644_s21 + $0x18] sm:$0xff] }
 0x420   : > { %v1499_v57 = vmul.f32 %v4163_v60, %v1483_v12  ;;  %v1466_v47 = vmul.f32 %v4167_v13, %v1427_v0  ;;  %v4104_v52 = vpop.permute.xlu1 %4103 }
 0x421   : > { %v1488_v61 = vsub.f32 2.0, %v1472_v9  ;;  %v4106_v8 = vunpack.i.h.bf16 %v4104_v52  ;;  %v4105_v50 = vunpack.i.l.bf16 %v4104_v52  ;;  %v1518_v5 = vmul.f32 %v5123_v27, %v1502_v46 }
 0x422   : > { %v1482_v63 = vsub.f32 2.0, %v1466_v47  ;;  %v1515_v54 = vmul.f32 %v5125_v58, %v1499_v57 }
 0x423   : > { %v4169_v21 = vpop.eup %4168  ;;  %v1504_v15 = vmul.f32 %v4165_v25, %v1488_v61  ;;  %v3831_v6 = vpack.c.bf16 %v4106_v8, %v4105_v50  ;;  %1534 = vst [vmem:[%s4648_s27 + $0x60] sm:$0xff] %v1518_v5  ;;  %v3843_v25 = vpack.c.bf16 %v1750_v26, %v1749_v2  ;;  %v1735_v2 = vld [vmem:[%s4646_s19 + $0x20] sm:$0xff] }
 0x424   : > { %v1498_v0 = vmul.f32 %v4167_v13, %v1482_v63  ;;  %v1469_v3 = vmul.f32 %v4169_v21, %v1433_v18  ;;  %1531 = vst [vmem:[%s4648_s27 + $0x48] sm:$0xff] %v1515_v54  ;;  %v3839_v18 = vpack.c.bf16 %v1748_v7, %v1747_v53 }
 0x425   : > { %3832 = vmatprep.subr.bf16.mxu0 %v3831_v6  ;;  %3901 = vmatprep.subr.bf16.mxu1 %v3831_v6  ;;  %v1520_v27 = vmul.f32 %v5129_v56, %v1504_v15 }
 0x426   : > { %v1485_v24 = vsub.f32 2.0, %v1469_v3  ;;  %3834 = vmatpush3.bf16.msra.mxu0 %v3831_v6  ;;  %3909 = vmatpush3.bf16.msra.mxu1 %v3831_v6  ;;  %v1514_v58 = vmul.f32 %v5131_v44, %v1498_v0  ;;  %v1732_v6 = vld [vmem:[%s4646_s19 + $0x8] sm:$0xff]  ;;  %v1731_v0 = vld [vmem:[%s4646_s19] sm:$0xff] }
 0x427   : > { %v4171_v60 = vpop.eup %4170  ;;  %3836 = vmatprep.subr.bf16.mxu0 %v3835_v23  ;;  %3902 = vmatprep.subr.bf16.mxu1 %v3835_v23  ;;  %1536 = vst [vmem:[%s4648_s27 + $0x70] sm:$0xff] %v1520_v27 }
 0x428   : > { %v1501_v48 = vmul.f32 %v4169_v21, %v1485_v24  ;;  %v1468_v17 = vmul.f32 %v4171_v60, %v1431_v1  ;;  %1530 = vst [vmem:[%s4648_s27 + $0x40] sm:$0xff] %v1514_v58  ;;  %v1733_v24 = vld [vmem:[%s4646_s19 + $0x10] sm:$0xff] }
 0x42a   : > { %v1517_v11 = vmul.f32 %v5135_v51, %v1501_v48  ;;  %v1484_v56 = vsub.f32 2.0, %v1468_v17  ;;  %3838 = vmatpush3.bf16.msra.mxu0 %v3835_v23  ;;  %3910 = vmatpush3.bf16.msra.mxu1 %v3835_v23  ;;  %v1736_v17 = vld [vmem:[%s4646_s19 + $0x28] sm:$0xff] }
 0x42b   : > { %3840 = vmatprep.subr.bf16.mxu0 %v3839_v18 }
 0x42c   : > { %1533 = vst [vmem:[%s4648_s27 + $0x58] sm:$0xff] %v1517_v11  ;;  %v1500_v44 = vmul.f32 %v4171_v60, %v1484_v56 }
 0x42d   : > { %3568 = vmatmul.mubr.f32.vlgmr.msra.gmra.mrb[16].mxu0 %v5154_v55 }
 0x42e   : > { %3570 = vmatprep.mubr.f32.mxu0 %v5166_v14  ;;  %v1516_v12 = vmul.f32 %v5138_v45, %v1500_v44  ;;  %3842 = vmatpush3.bf16.msra.mxu0 %v3839_v18  ;;  %v1738_v44 = vld [vmem:[%s4646_s19 + $0x38] sm:$0xff] }
 0x42f   : > { %3844 = vmatprep.subr.bf16.mxu0 %v3843_v25 }
 0x430   : > { %1532 = vst [vmem:[%s4648_s27 + $0x50] sm:$0xff] %v1516_v12  ;;  %3582 = vmatprep.mubr.f32.mxu1 %v1516_v12  ;;  %v1737_v12 = vld [vmem:[%s4646_s19 + $0x30] sm:$0xff] }
 0x431   : > { %3571 = vmatmul.mubr.f32.gmra.mrb[18].mxu0 %v5160_v19  ;;  %3583 = vmatmul.mubr.f32.vlgmr.msra.gmra.mrb[32].mxu1 %v1517_v11 }
 0x432   : > { %3573 = vmatprep.mubr.f32.mxu0 %v5176_v62  ;;  %3585 = vmatprep.mubr.f32.mxu1 %v1518_v5 }
 0x433   : > { %3846 = vmatpush3.bf16.msra.mxu0 %v3843_v25 }
 0x435   : > { %3574 = vmatmul.mubr.f32.gmra.mrb[20].mxu0 %v5171_v22 }
 0x436   : > { %3576 = vmatprep.mubr.f32.mxu0 %v5186_v16 }
 0x439   : > { %3577 = vmatmul.mubr.f32.gmra.mrb[22].mxu0 %v5179_v28 }
 0x43a   : > { %3579 = vmatprep.mubr.f32.mxu0 %v1514_v58 }
 0x43d   : > { %3580 = vmatmul.mubr.f32.gmra.mrb[24].mxu0 %v1515_v54 }
 0x451   : > { %v1437_v51 = vpop.xlane.xlu1 %1436 }
 0x452   : > { %4172 = vrcp.f32 %v1437_v51 }
 0x455   : > { %v1441_v45 = vpop.xlane.xlu1 %1440 }
 0x456   : > { %4174 = vrcp.f32 %v1441_v45 }
 0x45c   : > { %v4173_v55 = vpop.eup %4172 }
 0x45d   : > { %v1471_v19 = vmul.f32 %v4173_v55, %v1437_v51 }
 0x45f   : > { %v1487_v14 = vsub.f32 2.0, %v1471_v19 }
 0x460   : > { %v4175_v62 = vpop.eup %4174 }
 0x461   : > { %v1503_v1 = vmul.f32 %v4173_v55, %v1487_v14  ;;  %v1473_v13 = vmul.f32 %v4175_v62, %v1441_v45  ;;  %v1740_v14 = vld [vmem:[%s4646_s19 + $0x48] sm:$0xff] }
 0x463   : > { %v1489_v46 = vsub.f32 2.0, %v1473_v13  ;;  %v1519_v22 = vmul.f32 %v5147_v4, %v1503_v1 }
 0x465   : > { %v1505_v16 = vmul.f32 %v4175_v62, %v1489_v46  ;;  %1535 = vst [vmem:[%s4648_s27 + $0x68] sm:$0xff] %v1519_v22  ;;  %3586 = vmatmul.mubr.f32.gmra.mrb[34].mxu1 %v1519_v22  ;;  %v1739_v62 = vld [vmem:[%s4646_s19 + $0x40] sm:$0xff] }
 0x466   : > { %3588 = vmatprep.mubr.f32.mxu1 %v1520_v27  ;;  %v1734_v27 = vld [vmem:[%s4646_s19 + $0x18] sm:$0xff] }
 0x467   : > { %v1521_v28 = vmul.f32 %v5150_v59, %v1505_v16  ;;  %v1742_v16 = vld [vmem:[%s4646_s19 + $0x58] sm:$0xff] }
 0x469   : > { %1537 = vst [vmem:[%s4648_s27 + $0x78] sm:$0xff] %v1521_v28  ;;  %3589 = vmatmul.mubr.f32.gmra.mrb[36].mxu1 %v1521_v28  ;;  %v1741_v28 = vld [vmem:[%s4646_s19 + $0x50] sm:$0xff] }
 0x500   : > { %v3569_v9 = vpop.f32.mrb[16].mxu0 }
 0x501   : > { %v1652_v57 = vpop.f32.mrb[17].mxu0 }
 0x502   : > { %3599 = vmatprep.mubr.msk.f32.mxu0 %vm796_vm0, %v1652_v57 }
 0x503   : > { %3600 = vmatmul.mubr.msk.f32.vlgmr.msra.gmra.mrb[26].mxu0 %vm796_vm0, %v3569_v9 }
 0x504   : > { %v3572_v47 = vpop.f32.mrb[18].mxu0  ;;  %v3584_v20 = vpop.f32.mrb[32].mxu1 }
 0x505   : > { %v1662_v49 = vpop.f32.mrb[19].mxu0  ;;  %v1702_v52 = vpop.f32.mrb[33].mxu1 }
 0x506   : > { %3602 = vmatprep.mubr.msk.f32.mxu0 %vm796_vm0, %v1662_v49  ;;  %v1744_v49 = vld [vmem:[%s4646_s19 + $0x68] sm:$0xff] }
 0x507   : > { %3603 = vmatmul.mubr.msk.f32.gmra.mrb[28].mxu0 %vm796_vm0, %v3572_v47 }
 0x508   : > { %v3575_v4 = vpop.f32.mrb[20].mxu0 }
 0x509   : > { %v1672_v61 = vpop.f32.mrb[21].mxu0 }
 0x50a   : > { %3605 = vmatprep.mubr.msk.f32.mxu0 %vm796_vm0, %v1672_v61 }
 0x50b   : > { %3606 = vmatmul.mubr.msk.f32.gmra.mrb[30].mxu0 %vm796_vm0, %v3575_v4 }
 0x50c   : > { %v3578_v59 = vpop.f32.mrb[22].mxu0 }
 0x50d   : > { %v1682_v8 = vpop.f32.mrb[23].mxu0 }
 0x50e   : > { %3608 = vmatprep.mubr.msk.f32.mxu0 %vm796_vm0, %v1682_v8 }
 0x50f   : > { %3609 = vmatmul.mubr.msk.f32.gmra.mrb[32].mxu0 %vm796_vm0, %v3578_v59 }
 0x510   : > { %v3581_v50 = vpop.f32.mrb[24].mxu0 }
 0x511   : > { %v1692_v5 = vpop.f32.mrb[25].mxu0 }
 0x512   : > { %3611 = vmatprep.mubr.msk.f32.mxu0 %vm796_vm0, %v1692_v5  ;;  %v1745_v5 = vld [vmem:[%s4646_s19 + $0x70] sm:$0xff] }
 0x513   : > { %3612 = vmatmul.mubr.msk.f32.gmra.mrb[34].mxu0 %vm796_vm0, %v3581_v50  ;;  %v1746_v50 = vld [vmem:[%s4646_s19 + $0x78] sm:$0xff] }
 0x514   : > { %3614 = vmatprep.mubr.msk.f32.mxu0 %vm796_vm0, %v1702_v52  ;;  %v1743_v52 = vld [vmem:[%s4646_s19 + $0x60] sm:$0xff] }
 0x517   : > { %3615 = vmatmul.mubr.msk.f32.gmra.mrb[36].mxu0 %vm796_vm0, %v3584_v20 }
 0x538   : > { %v3587_v63 = vpop.f32.mrb[34].mxu1 }
 0x539   : > { %v1712_v54 = vpop.f32.mrb[35].mxu1 }
 0x53a   : > { %3617 = vmatprep.mubr.msk.f32.mxu0 %vm796_vm0, %v1712_v54 }
 0x53b   : > { %3618 = vmatmul.mubr.msk.f32.gmra.mrb[38].mxu0 %vm796_vm0, %v3587_v63 }
 0x53c   : > { %v3590_v21 = vpop.f32.mrb[36].mxu1 }
 0x53d   : > { %v1722_v15 = vpop.f32.mrb[37].mxu1 }
 0x53e   : > { %3620 = vmatprep.mubr.msk.f32.mxu0 %vm796_vm0, %v1722_v15 }
 0x53f   : > { %3621 = vmatmul.mubr.msk.f32.gmra.mrb[40].mxu0 %vm796_vm0, %v3590_v21  ;;  %vm2457_vm0 = vcmask (!%p3162_p8), 523264  }
 0x5d6   : > { %v3601_v3 = vpop.f32.mrb[26].mxu0 }
 0x5d7   : > { %v1945_v53 = vadd.f32 %v3601_v3, %v1732_v6  ;;  %v1865_v7 = vpop.f32.mrb[27].mxu0 }
 0x5d8   : > { %v1944_v23 = vadd.f32 %v1865_v7, %v1731_v0  ;;  %v3163_v0 = vld [vmem:[%s5969_s5] ss:$0 sm:$0xff] (!%p3162_p8) }
 0x5d9   : > { %1961 = vst [vmem:[%s4646_s19 + $0x8] sm:$0xff] %v1945_v53 }
 0x5da   : > { %1960 = vst [vmem:[%s4646_s19] sm:$0xff] %v1944_v23  ;;  %v3604_v58 = vpop.f32.mrb[28].mxu0 }
 0x5db   : > { %v1947_v60 = vadd.f32 %v3604_v58, %v1734_v27  ;;  %v1875_v18 = vpop.f32.mrb[29].mxu0 }
 0x5dc   : > { %v1946_v48 = vadd.f32 %v1875_v18, %v1733_v24 }
 0x5dd   : > { %1963 = vst [vmem:[%s4646_s19 + $0x18] sm:$0xff] %v1947_v60 }
 0x5de   : > { %1962 = vst [vmem:[%s4646_s19 + $0x10] sm:$0xff] %v1946_v48  ;;  %v3607_v26 = vpop.f32.mrb[30].mxu0 }
 0x5df   : > { %v1949_v11 = vadd.f32 %v3607_v26, %v1736_v17  ;;  %v1885_v56 = vpop.f32.mrb[31].mxu0 }
 0x5e0   : > { %v1948_v25 = vadd.f32 %v1885_v56, %v1735_v2  ;;  %v1981_v23 = vld [vmem:[%s4646_s19 + $0x8] sm:$0xff] (!%p3162_p8) }
 0x5e1   : > { %1965 = vst [vmem:[%s4646_s19 + $0x28] sm:$0xff] %v1949_v11  ;;  %v1980_v6 = vld [vmem:[%s4646_s19] sm:$0xff] (!%p3162_p8)  ;;  %v2004_v58 = vadd.f32 (!%p3162_p8), %v3163_v0, %v1981_v23 }
 0x5e2   : > { %1964 = vst [vmem:[%s4646_s19 + $0x20] sm:$0xff] %v1948_v25  ;;  %v3610_v51 = vpop.f32.mrb[32].mxu0  ;;  %v2003_v53 = vadd.f32 (!%p3162_p8), %v3163_v0, %v1980_v6 }
 0x5e3   : > { %v1951_v45 = vadd.f32 %v3610_v51, %v1738_v44  ;;  %v1895_v55 = vpop.f32.mrb[33].mxu0  ;;  %v5284_v26 = vadd.f32 (!%p3162_p8), %v2004_v58, %v4694_v29 }
 0x5e4   : > { %v1950_v19 = vadd.f32 %v1895_v55, %v1737_v12  ;;  %v1983_v27 = vld [vmem:[%s4646_s19 + $0x18] sm:$0xff] (!%p3162_p8)  ;;  %v5276_v48 = vadd.f32 (!%p3162_p8), %v2003_v53, %v4674_v10 }
 0x5e5   : > { %1967 = vst [vmem:[%s4646_s19 + $0x38] sm:$0xff] %v1951_v45  ;;  %v1982_v3 = vld [vmem:[%s4646_s19 + $0x10] sm:$0xff] (!%p3162_p8)  ;;  %v2006_v60 = vadd.f32 (!%p3162_p8), %v3163_v0, %v1983_v27 }
 0x5e6   : > { %1966 = vst [vmem:[%s4646_s19 + $0x30] sm:$0xff] %v1950_v19  ;;  %v3613_v1 = vpop.f32.mrb[34].mxu0  ;;  %v2005_v7 = vadd.f32 (!%p3162_p8), %v3163_v0, %v1982_v3  ;;  %2035 = vadd.xlane.f32.xlu0 (!%p3162_p8), %v5276_v48 }
 0x5e7   : > { %v1953_v13 = vadd.f32 %v3613_v1, %v1740_v14  ;;  %v1905_v46 = vpop.f32.mrb[35].mxu0  ;;  %v5287_v11 = vadd.f32 (!%p3162_p8), %v2006_v60, %v4702_v31 }
 0x5e8   : > { %v1952_v22 = vadd.f32 %v1905_v46, %v1739_v62  ;;  %v1985_v18 = vld [vmem:[%s4646_s19 + $0x28] sm:$0xff] (!%p3162_p8)  ;;  %v5279_v17 = vadd.f32 (!%p3162_p8), %v2005_v7, %v4697_v30 }
 0x5e9   : > { %1969 = vst [vmem:[%s4646_s19 + $0x48] sm:$0xff] %v1953_v13  ;;  %v1984_v24 = vld [vmem:[%s4646_s19 + $0x20] sm:$0xff] (!%p3162_p8)  ;;  %v2008_v56 = vadd.f32 (!%p3162_p8), %v3163_v0, %v1985_v18 }
 0x5ea   : > { %1968 = vst [vmem:[%s4646_s19 + $0x40] sm:$0xff] %v1952_v22  ;;  %v3616_v9 = vpop.f32.mrb[36].mxu0  ;;  %v2007_v2 = vadd.f32 (!%p3162_p8), %v3163_v0, %v1984_v24  ;;  %2039 = vadd.xlane.f32.xlu1 (!%p3162_p8), %v5279_v17  ;;  %2037 = vadd.xlane.f32.xlu0 (!%p3162_p8), %v5284_v26 }
 0x5eb   : > { %v1955_v57 = vadd.f32 %v3616_v9, %v1742_v16  ;;  %v1915_v47 = vpop.f32.mrb[37].mxu0  ;;  %v5297_v12 = vadd.f32 (!%p3162_p8), %v2008_v56, %v4710_v33 }
 0x5ec   : > { %v1954_v20 = vadd.f32 %v1915_v47, %v1741_v28  ;;  %v1987_v10 = vld [vmem:[%s4646_s19 + $0x38] sm:$0xff] (!%p3162_p8)  ;;  %v5294_v30 = vadd.f32 (!%p3162_p8), %v2007_v2, %v4705_v32 }
 0x5ed   : > { %1971 = vst [vmem:[%s4646_s19 + $0x58] sm:$0xff] %v1955_v57  ;;  %v1986_v25 = vld [vmem:[%s4646_s19 + $0x30] sm:$0xff] (!%p3162_p8)  ;;  %v2010_v29 = vadd.f32 (!%p3162_p8), %v3163_v0, %v1987_v10 }
 0x5ee   : > { %1970 = vst [vmem:[%s4646_s19 + $0x50] sm:$0xff] %v1954_v20  ;;  %v2009_v44 = vadd.f32 (!%p3162_p8), %v3163_v0, %v1986_v25  ;;  %2041 = vadd.xlane.f32.xlu1 (!%p3162_p8), %v5287_v11  ;;  %2043 = vadd.xlane.f32.xlu0 (!%p3162_p8), %v5294_v30 }
 0x5ef   : > { %v5307_v55 = vadd.f32 (!%p3162_p8), %v2010_v29, %v4718_v35 }
 0x5f0   : > { %v1989_v31 = vld [vmem:[%s4646_s19 + $0x48] sm:$0xff] (!%p3162_p8)  ;;  %v5302_v45 = vadd.f32 (!%p3162_p8), %v2009_v44, %v4713_v34 }
 0x5f1   : > { %v1988_v51 = vld [vmem:[%s4646_s19 + $0x40] sm:$0xff] (!%p3162_p8)  ;;  %v2012_v19 = vadd.f32 (!%p3162_p8), %v3163_v0, %v1989_v31 }
 0x5f2   : > { %2045 = vadd.xlane.f32.xlu1 (!%p3162_p8), %v5297_v12  ;;  %v2011_v32 = vadd.f32 (!%p3162_p8), %v3163_v0, %v1988_v51  ;;  %2047 = vadd.xlane.f32.xlu0 (!%p3162_p8), %v5302_v45 }
 0x5f3   : > { %v5317_v1 = vadd.f32 (!%p3162_p8), %v2012_v19, %v4726_v37 }
 0x5f4   : > { %v1991_v33 = vld [vmem:[%s4646_s19 + $0x58] sm:$0xff] (!%p3162_p8)  ;;  %v5314_v34 = vadd.f32 (!%p3162_p8), %v2011_v32, %v4721_v36 }
 0x5f5   : > { %v1990_v14 = vld [vmem:[%s4646_s19 + $0x50] sm:$0xff] (!%p3162_p8)  ;;  %v2014_v13 = vadd.f32 (!%p3162_p8), %v3163_v0, %v1991_v33  ;;  %v2263_v33 = vld [vmem:[%s5970_s6 + $0x28] sm:$0xff] (!%p3162_p8) }
 0x5f6   : > { %v2013_v62 = vadd.f32 (!%p3162_p8), %v3163_v0, %v1990_v14  ;;  %2049 = vadd.xlane.f32.xlu1 (!%p3162_p8), %v5307_v55  ;;  %2051 = vadd.xlane.f32.xlu0 (!%p3162_p8), %v5314_v34  ;;  %v2262_v14 = vld [vmem:[%s5970_s6 + $0x20] sm:$0xff] (!%p3162_p8) }
 0x5f7   : > { %v5327_v28 = vadd.f32 (!%p3162_p8), %v2014_v13, %v4734_v39 }
 0x5f8   : > { %v5324_v16 = vadd.f32 (!%p3162_p8), %v2013_v62, %v4729_v38 }
 0x5fa   : > { %2053 = vadd.xlane.f32.xlu1 (!%p3162_p8), %v5317_v1  ;;  %2055 = vadd.xlane.f32.xlu0 (!%p3162_p8), %v5324_v16 }
 0x5fe   : > { %2057 = vadd.xlane.f32.xlu1 (!%p3162_p8), %v5327_v28 }
 0x60e   : > { %v3619_v4 = vpop.f32.mrb[38].mxu0 }
 0x60f   : > { %v1957_v61 = vadd.f32 %v3619_v4, %v1744_v49  ;;  %v1925_v59 = vpop.f32.mrb[39].mxu0 }
 0x610   : > { %v1956_v8 = vadd.f32 %v1925_v59, %v1743_v52  ;;  %1979 = sbr.rel (%p3162_p8) target bundleno = 2629 (0xa45), region = 84 }
 0x611   : > { %1973 = vst [vmem:[%s4646_s19 + $0x68] sm:$0xff] %v1957_v61 }
 0x612   : > { %1972 = vst [vmem:[%s4646_s19 + $0x60] sm:$0xff] %v1956_v8  ;;  %v3622_v63 = vpop.f32.mrb[40].mxu0 }
 0x613   : > { %v1959_v54 = vadd.f32 %v3622_v63, %v1746_v50  ;;  %v1935_v21 = vpop.f32.mrb[41].mxu0 }
 0x614   : > { %v1958_v15 = vadd.f32 %v1935_v21, %v1745_v5 }
 0x615   : > { %1975 = vst [vmem:[%s4646_s19 + $0x78] sm:$0xff] %v1959_v54 }
 0x616   : > { %1974 = vst [vmem:[%s4646_s19 + $0x70] sm:$0xff] %v1958_v15 }
 0x618   : > { %v1993_v46 = vld [vmem:[%s4646_s19 + $0x68] sm:$0xff] }
 0x619   : > { %v1992_v35 = vld [vmem:[%s4646_s19 + $0x60] sm:$0xff]  ;;  %v2016_v9 = vadd.f32 %v3163_v0, %v1993_v46 }
 0x61a   : > { %v2015_v22 = vadd.f32 %v3163_v0, %v1992_v35 }
 0x61b   : > { %v5337_v20 = vadd.f32 %v2016_v9, %v4742_v41  ;;  %v2259_v41 = vld [vmem:[%s5970_s6 + $0x8] sm:$0xff] }
 0x61c   : > { %v1995_v57 = vld [vmem:[%s4646_s19 + $0x78] sm:$0xff]  ;;  %v5334_v37 = vadd.f32 %v2015_v22, %v4737_v40  ;;  %v2258_v40 = vld [vmem:[%s5970_s6] sm:$0xff] }
 0x61d   : > { %v1994_v36 = vld [vmem:[%s4646_s19 + $0x70] sm:$0xff]  ;;  %v2018_v49 = vadd.f32 %v3163_v0, %v1995_v57  ;;  %2061 = vadd.xlane.f32.xlu1 %v5337_v20  ;;  %v3847_v52 = vpack.c.bf16 %v2259_v41, %v2258_v40 }
 0x61e   : > { %v2017_v47 = vadd.f32 %v3163_v0, %v1994_v36  ;;  %2059 = vadd.xlane.f32.xlu0 %v5334_v37 }
 0x61f   : > { %v5345_v39 = vadd.f32 %v2018_v49, %v4750_v43  ;;  %v2261_v43 = vld [vmem:[%s5970_s6 + $0x18] sm:$0xff]  ;;  %3848 = vmatprep.subr.bf16.mxu0 %v3847_v52  ;;  %v2264_v49 = vld [vmem:[%s5970_s6 + $0x30] sm:$0xff] }
 0x620   : > { %v5342_v38 = vadd.f32 %v2017_v47, %v4745_v42  ;;  %v2260_v42 = vld [vmem:[%s5970_s6 + $0x10] sm:$0xff]  ;;  %3850 = vmatpush3.bf16.msra.mxu0 %v3847_v52 }
 0x621   : > { %2065 = vadd.xlane.f32.xlu1 %v5345_v39  ;;  %v3851_v4 = vpack.c.bf16 %v2261_v43, %v2260_v42 }
 0x622   : > { %2063 = vadd.xlane.f32.xlu0 %v5342_v38 }
 0x623   : > { %3852 = vmatprep.subr.bf16.mxu0 %v3851_v4 }
 0x624   : > { %3854 = vmatpush3.bf16.msra.mxu0 %v3851_v4 }
 0x673   : > { %v2036_v61 = vpop.xlane.xlu0 %2035 }
 0x674   : > { %v2068_v8 = vmul.f32 0.0078125, %v2036_v61 }
 0x676   : > { %v5362_v5 = vsub.f32 %v5276_v48, %v2068_v8  ;;  %v2266_v8 = vld [vmem:[%s5970_s6 + $0x40] sm:$0xff] }
 0x677   : > { %v2040_v59 = vpop.xlane.xlu1 %2039  ;;  %v2038_v54 = vpop.xlane.xlu0 %2037 }
 0x678   : > { %v2070_v50 = vmul.f32 0.0078125, %v2040_v59  ;;  %v2069_v15 = vmul.f32 0.0078125, %v2038_v54  ;;  %v2100_v6 = vmul.f32 %v5362_v5, %v5362_v5 }
 0x67a   : > { %v5365_v63 = vsub.f32 %v5279_v17, %v2070_v50  ;;  %v5370_v3 = vsub.f32 %v5284_v26, %v2069_v15  ;;  %2116 = vadd.xlane.f32.xlu0 %v2100_v6 }
 0x67b   : > { %v2042_v21 = vpop.xlane.xlu1 %2041  ;;  %v2044_v23 = vpop.xlane.xlu0 %2043 }
 0x67c   : > { %v2071_v0 = vmul.f32 0.0078125, %v2042_v21  ;;  %v2102_v7 = vmul.f32 %v5365_v63, %v5365_v63  ;;  %v2072_v24 = vmul.f32 0.0078125, %v2044_v23  ;;  %v2101_v58 = vmul.f32 %v5370_v3, %v5370_v3  ;;  %v2269_v23 = vld [vmem:[%s5970_s6 + $0x58] sm:$0xff] }
 0x67e   : > { %v5373_v53 = vsub.f32 %v5287_v11, %v2071_v0  ;;  %v5380_v18 = vsub.f32 %v5294_v30, %v2072_v24  ;;  %2120 = vadd.xlane.f32.xlu0 %v2102_v7  ;;  %2118 = vadd.xlane.f32.xlu1 %v2101_v58  ;;  %v2268_v7 = vld [vmem:[%s5970_s6 + $0x50] sm:$0xff]  ;;  %v2270_v24 = vld [vmem:[%s5970_s6 + $0x60] sm:$0xff]  ;;  %v2271_v58 = vld [vmem:[%s5970_s6 + $0x68] sm:$0xff] }
 0x67f   : > { %v2046_v27 = vpop.xlane.xlu1 %2045  ;;  %v2048_v2 = vpop.xlane.xlu0 %2047 }
 0x680   : > { %v2073_v60 = vmul.f32 0.0078125, %v2046_v27  ;;  %v2103_v17 = vmul.f32 %v5373_v53, %v5373_v53  ;;  %v2074_v11 = vmul.f32 0.0078125, %v2048_v2  ;;  %v2104_v56 = vmul.f32 %v5380_v18, %v5380_v18  ;;  %v2273_v2 = vld [vmem:[%s5970_s6 + $0x78] sm:$0xff] }
 0x681   : > { %v3867_v27 = vpack.c.bf16 %v2269_v23, %v2268_v7  ;;  %v5504_v7 = vld [vmem:[%s6038_s16] ss:$0 sm:$0xff] }
 0x682   : > { %v5383_v48 = vsub.f32 %v5297_v12, %v2073_v60  ;;  %v5390_v10 = vsub.f32 %v5302_v45, %v2074_v11  ;;  %2122 = vadd.xlane.f32.xlu1 %v2103_v17  ;;  %2124 = vadd.xlane.f32.xlu0 %v2104_v56  ;;  %v3871_v60 = vpack.c.bf16 %v2271_v58, %v2270_v24  ;;  %v2272_v17 = vld [vmem:[%s5970_s6 + $0x70] sm:$0xff]  ;;  %v2442_v11 = vld [vmem:[%s5972_s8] sm:$0xff]  ;;  %v2443_v56 = vld [vmem:[%s5972_s8 + $0x8] sm:$0xff] }
 0x683   : > { %v2050_v26 = vpop.xlane.xlu1 %2049  ;;  %v2052_v12 = vpop.xlane.xlu0 %2051 }
 0x684   : > { %v2075_v25 = vmul.f32 0.0078125, %v2050_v26  ;;  %v2105_v30 = vmul.f32 %v5383_v48, %v5383_v48  ;;  %v2076_v51 = vmul.f32 0.0078125, %v2052_v12  ;;  %v2106_v31 = vmul.f32 %v5390_v10, %v5390_v10  ;;  %v2445_v12 = vld [vmem:[%s5972_s8 + $0x18] sm:$0xff] }
 0x685   : > { %v3875_v26 = vpack.c.bf16 %v2273_v2, %v2272_v17 }
 0x686   : > { %v5393_v44 = vsub.f32 %v5307_v55, %v2075_v25  ;;  %v5400_v19 = vsub.f32 %v5314_v34, %v2076_v51  ;;  %2126 = vadd.xlane.f32.xlu1 %v2105_v30  ;;  %2128 = vadd.xlane.f32.xlu0 %v2106_v31  ;;  %v3855_v34 = vpack.c.bf16 %v2263_v33, %v2262_v14  ;;  %v2444_v25 = vld [vmem:[%s5972_s8 + $0x10] sm:$0xff]  ;;  %v2446_v51 = vld [vmem:[%s5972_s8 + $0x20] sm:$0xff]  ;;  %v2447_v31 = vld [vmem:[%s5972_s8 + $0x28] sm:$0xff] }
 0x687   : > { %v2054_v29 = vpop.xlane.xlu1 %2053  ;;  %v2056_v62 = vpop.xlane.xlu0 %2055  ;;  %v3879_v30 = vpack.c.bf16 %v2443_v56, %v2442_v11 }
 0x688   : > { %v2077_v32 = vmul.f32 0.0078125, %v2054_v29  ;;  %v2107_v55 = vmul.f32 %v5393_v44, %v5393_v44  ;;  %v2078_v35 = vmul.f32 0.0078125, %v2056_v62  ;;  %v2108_v46 = vmul.f32 %v5400_v19, %v5400_v19  ;;  %3856 = vmatprep.subr.bf16.mxu0 %v3855_v34 }
 0x689   : > { %3858 = vmatpush3.bf16.msra.mxu0 %v3855_v34  ;;  %v3883_v29 = vpack.c.bf16 %v2445_v12, %v2444_v25  ;;  %3880 = vmatprep.subr.bf16.mxu1 %v3879_v30 }
 0x68a   : > { %v5403_v45 = vsub.f32 %v5317_v1, %v2077_v32  ;;  %v5416_v22 = vsub.f32 %v5324_v16, %v2078_v35  ;;  %2130 = vadd.xlane.f32.xlu1 %v2107_v55  ;;  %2132 = vadd.xlane.f32.xlu0 %v2108_v46  ;;  %v2265_v16 = vld [vmem:[%s5970_s6 + $0x38] sm:$0xff]  ;;  %v3887_v32 = vpack.c.bf16 %v2447_v31, %v2446_v51 }
 0x68b   : > { %v2058_v13 = vpop.xlane.xlu1 %2057  ;;  %v3859_v42 = vpack.c.bf16 %v2265_v16, %v2264_v49  ;;  %3882 = vmatpush3.bf16.msra.mxu1 %v3879_v30 }
 0x68c   : > { %v2079_v1 = vmul.f32 0.0078125, %v2058_v13  ;;  %v2109_v36 = vmul.f32 %v5403_v45, %v5403_v45  ;;  %v2110_v41 = vmul.f32 %v5416_v22, %v5416_v22  ;;  %3884 = vmatprep.subr.bf16.mxu1 %v3883_v29 }
 0x68d   : > { %3860 = vmatprep.subr.bf16.mxu0 %v3859_v42 }
 0x68e   : > { %v5419_v9 = vsub.f32 %v5327_v28, %v2079_v1  ;;  %2134 = vadd.xlane.f32.xlu1 %v2109_v36  ;;  %2136 = vadd.xlane.f32.xlu0 %v2110_v41 }
 0x68f   : > { %3862 = vmatpush3.bf16.msra.mxu0 %v3859_v42  ;;  %3886 = vmatpush3.bf16.msra.mxu1 %v3883_v29 }
 0x690   : > { %v2111_v4 = vmul.f32 %v5419_v9, %v5419_v9  ;;  %3888 = vmatprep.subr.bf16.mxu1 %v3887_v32 }
 0x692   : > { %2138 = vadd.xlane.f32.xlu1 %v2111_v4 }
 0x693   : > { %3890 = vmatpush3.bf16.msra.mxu1 %v3887_v32 }
 0x6aa   : > { %v2062_v47 = vpop.xlane.xlu1 %2061 }
 0x6ab   : > { %v2060_v57 = vpop.xlane.xlu0 %2059  ;;  %v2081_v28 = vmul.f32 0.0078125, %v2062_v47 }
 0x6ac   : > { %v2080_v40 = vmul.f32 0.0078125, %v2060_v57 }
 0x6ad   : > { %v5435_v43 = vsub.f32 %v5337_v20, %v2081_v28 }
 0x6ae   : > { %v5432_v52 = vsub.f32 %v5334_v37, %v2080_v40  ;;  %v2066_v59 = vpop.xlane.xlu1 %2065  ;;  %v2267_v37 = vld [vmem:[%s5970_s6 + $0x48] sm:$0xff] }
 0x6af   : > { %v2064_v61 = vpop.xlane.xlu0 %2063  ;;  %v2083_v20 = vmul.f32 0.0078125, %v2066_v59  ;;  %v3863_v21 = vpack.c.bf16 %v2267_v37, %v2266_v8  ;;  %v2113_v0 = vmul.f32 %v5435_v43, %v5435_v43  ;;  %v5498_v37 = vld [vmem:[%s5974_s10] ss:$0 sm:$0xff] }
 0x6b0   : > { %v2082_v50 = vmul.f32 0.0078125, %v2064_v61  ;;  %v2112_v54 = vmul.f32 %v5432_v52, %v5432_v52 }
 0x6b1   : > { %v5451_v6 = vsub.f32 %v5345_v39, %v2083_v20  ;;  %3864 = vmatprep.subr.bf16.mxu0 %v3863_v21  ;;  %2142 = vadd.xlane.f32.xlu1 %v2113_v0 }
 0x6b2   : > { %v5448_v15 = vsub.f32 %v5342_v38, %v2082_v50  ;;  %2140 = vadd.xlane.f32.xlu0 %v2112_v54  ;;  %3866 = vmatpush3.bf16.msra.mxu0 %v3863_v21 }
 0x6b3   : > { %v2115_v39 = vmul.f32 %v5451_v6, %v5451_v6  ;;  %3868 = vmatprep.subr.bf16.mxu0 %v3867_v27 }
 0x6b4   : > { %v2114_v38 = vmul.f32 %v5448_v15, %v5448_v15 }
 0x6b5   : > { %2146 = vadd.xlane.f32.xlu1 %v2115_v39 }
 0x6b6   : > { %2144 = vadd.xlane.f32.xlu0 %v2114_v38  ;;  %3870 = vmatpush3.bf16.msra.mxu0 %v3867_v27 }
 0x6b7   : > { %3872 = vmatprep.subr.bf16.mxu0 %v3871_v60 }
 0x6ba   : > { %3874 = vmatpush3.bf16.msra.mxu0 %v3871_v60 }
 0x6bb   : > { %3876 = vmatprep.subr.bf16.mxu0 %v3875_v26 }
 0x6be   : > { %3878 = vmatpush3.bf16.msra.mxu0 %v3875_v26 }
 0x707   : > { %v2117_v55 = vpop.xlane.xlu0 %2116 }
 0x708   : > { %v2148_v14 = vmul.f32 0.0078125, %v2117_v55 }
 0x70a   : > { %v2164_v33 = vadd.f32 1e-06, %v2148_v14 }
 0x70b   : > { %v2119_v62 = vpop.xlane.xlu1 %2118  ;;  %v2121_v13 = vpop.xlane.xlu0 %2120 }
 0x70c   : > { %4176 = vrsqrt.f32 %v2164_v33  ;;  %v2149_v34 = vmul.f32 0.0078125, %v2119_v62  ;;  %v2150_v35 = vmul.f32 0.0078125, %v2121_v13 }
 0x70e   : > { %v2165_v46 = vadd.f32 1e-06, %v2149_v34  ;;  %v2166_v1 = vadd.f32 1e-06, %v2150_v35 }
 0x70f   : > { %v2123_v36 = vpop.xlane.xlu1 %2122  ;;  %v2125_v57 = vpop.xlane.xlu0 %2124 }
 0x710   : > { %4178 = vrsqrt.f32 %v2165_v46  ;;  %v2151_v47 = vmul.f32 0.0078125, %v2123_v36  ;;  %v2152_v49 = vmul.f32 0.0078125, %v2125_v57 }
 0x711   : > { %4180 = vrsqrt.f32 %v2166_v1 }
 0x712   : > { %v2167_v16 = vadd.f32 1e-06, %v2151_v47  ;;  %v2168_v40 = vadd.f32 1e-06, %v2152_v49 }
 0x713   : > { %v2127_v41 = vpop.xlane.xlu1 %2126  ;;  %v2129_v28 = vpop.xlane.xlu0 %2128 }
 0x714   : > { %4182 = vrsqrt.f32 %v2167_v16  ;;  %v2153_v42 = vmul.f32 0.0078125, %v2127_v41  ;;  %v2154_v4 = vmul.f32 0.0078125, %v2129_v28 }
 0x715   : > { %4184 = vrsqrt.f32 %v2168_v40 }
 0x716   : > { %v4177_v61 = vpop.eup %4176  ;;  %v2169_v59 = vadd.f32 1e-06, %v2153_v42  ;;  %v2170_v8 = vadd.f32 1e-06, %v2154_v4 }
 0x717   : > { %v2131_v50 = vpop.xlane.xlu1 %2130  ;;  %v2133_v54 = vpop.xlane.xlu0 %2132  ;;  %v2196_v20 = vmul.f32 %v4177_v61, %v5362_v5 }
 0x718   : > { %4186 = vrsqrt.f32 %v2169_v59  ;;  %v2155_v21 = vmul.f32 0.0078125, %v2131_v50  ;;  %v2156_v0 = vmul.f32 0.0078125, %v2133_v54 }
 0x719   : > { %4188 = vrsqrt.f32 %v2170_v8  ;;  %v2219_v23 = vmul.f32 %v5498_v37, %v2196_v20 }
 0x71a   : > { %v4179_v38 = vpop.eup %4178  ;;  %v2171_v27 = vadd.f32 1e-06, %v2155_v21  ;;  %v2172_v39 = vadd.f32 1e-06, %v2156_v0 }
 0x71b   : > { %v4181_v24 = vpop.eup %4180  ;;  %v2135_v58 = vpop.xlane.xlu1 %2134  ;;  %v5508_v17 = vadd.f32 %v5504_v7, %v2219_v23  ;;  %v2197_v5 = vmul.f32 %v4179_v38, %v5370_v3 }
 0x71c   : > { %v2137_v60 = vpop.xlane.xlu0 %2136  ;;  %4190 = vrsqrt.f32 %v2171_v27  ;;  %v2157_v2 = vmul.f32 0.0078125, %v2135_v58  ;;  %v2198_v11 = vmul.f32 %v4181_v24, %v5365_v63 }
 0x71d   : > { %v2158_v26 = vmul.f32 0.0078125, %v2137_v60  ;;  %4192 = vrsqrt.f32 %v2172_v39  ;;  %3655 = vmatprep.mubr.f32.mxu0 %v5508_v17  ;;  %v2220_v56 = vmul.f32 %v5498_v37, %v2197_v5 }
 0x71e   : > { %v4183_v25 = vpop.eup %4182  ;;  %v2173_v30 = vadd.f32 1e-06, %v2157_v2  ;;  %v2221_v29 = vmul.f32 %v5498_v37, %v2198_v11 }
 0x71f   : > { %v2174_v12 = vadd.f32 1e-06, %v2158_v26  ;;  %v4185_v51 = vpop.eup %4184  ;;  %v2139_v31 = vpop.xlane.xlu1 %2138  ;;  %v5516_v3 = vadd.f32 %v5504_v7, %v2220_v56  ;;  %v2199_v55 = vmul.f32 %v4183_v25, %v5373_v53 }
 0x720   : > { %4194 = vrsqrt.f32 %v2173_v30  ;;  %v2159_v63 = vmul.f32 0.0078125, %v2139_v31  ;;  %v5520_v33 = vadd.f32 %v5504_v7, %v2221_v29  ;;  %v2200_v13 = vmul.f32 %v4185_v51, %v5380_v18 }
 0x721   : > { %4196 = vrsqrt.f32 %v2174_v12  ;;  %3656 = vmatmul.mubr.f32.vlgmr.msra.gmra.mrb[0].mxu0 %v5516_v3  ;;  %v2222_v62 = vmul.f32 %v5498_v37, %v2199_v55 }
 0x722   : > { %v4187_v34 = vpop.eup %4186  ;;  %v2175_v35 = vadd.f32 1e-06, %v2159_v63  ;;  %3658 = vmatprep.mubr.f32.mxu0 %v5520_v33  ;;  %v2223_v47 = vmul.f32 %v5498_v37, %v2200_v13 }
 0x723   : > { %v4189_v1 = vpop.eup %4188  ;;  %v5527_v57 = vadd.f32 %v5504_v7, %v2222_v62  ;;  %v2201_v49 = vmul.f32 %v4187_v34, %v5383_v48  ;;  %v2448_v34 = vld [vmem:[%s5972_s8 + $0x30] sm:$0xff] }
 0x724   : > { %4198 = vrsqrt.f32 %v2175_v35  ;;  %v2202_v18 = vmul.f32 %v4189_v1, %v5390_v10  ;;  %v5534_v41 = vadd.f32 %v5504_v7, %v2223_v47 }
 0x725   : > { %3659 = vmatmul.mubr.f32.gmra.mrb[2].mxu0 %v5527_v57  ;;  %v2224_v28 = vmul.f32 %v5498_v37, %v2201_v49 }
 0x726   : > { %v4191_v42 = vpop.eup %4190  ;;  %v2225_v59 = vmul.f32 %v5498_v37, %v2202_v18  ;;  %3661 = vmatprep.mubr.f32.mxu0 %v5534_v41 }
 0x727   : > { %v4193_v8 = vpop.eup %4192  ;;  %v5540_v50 = vadd.f32 %v5504_v7, %v2224_v28  ;;  %v2203_v10 = vmul.f32 %v4191_v42, %v5393_v44 }
 0x728   : > { %v5544_v20 = vadd.f32 %v5504_v7, %v2225_v59  ;;  %v2204_v21 = vmul.f32 %v4193_v8, %v5400_v19 }
 0x729   : > { %3662 = vmatmul.mubr.f32.gmra.mrb[4].mxu0 %v5540_v50  ;;  %v2226_v0 = vmul.f32 %v5498_v37, %v2203_v10 }
 0x72a   : > { %v4195_v23 = vpop.eup %4194  ;;  %3664 = vmatprep.mubr.f32.mxu0 %v5544_v20  ;;  %v2227_v27 = vmul.f32 %v5498_v37, %v2204_v21 }
 0x72b   : > { %v4197_v39 = vpop.eup %4196  ;;  %v5552_v44 = vadd.f32 %v5504_v7, %v2226_v0  ;;  %v2205_v24 = vmul.f32 %v4195_v23, %v5403_v45 }
 0x72c   : > { %v5556_v19 = vadd.f32 %v5504_v7, %v2227_v27  ;;  %v2206_v58 = vmul.f32 %v4197_v39, %v5416_v22 }
 0x72d   : > { %3665 = vmatmul.mubr.f32.gmra.mrb[6].mxu0 %v5552_v44  ;;  %v2228_v60 = vmul.f32 %v5498_v37, %v2205_v24 }
 0x72e   : > { %v4199_v5 = vpop.eup %4198  ;;  %3667 = vmatprep.mubr.f32.mxu0 %v5556_v19  ;;  %v2229_v2 = vmul.f32 %v5498_v37, %v2206_v58 }
 0x72f   : > { %v5564_v11 = vadd.f32 %v5504_v7, %v2228_v60  ;;  %v2207_v45 = vmul.f32 %v4199_v5, %v5419_v9 }
 0x730   : > { %v5568_v56 = vadd.f32 %v5504_v7, %v2229_v2 }
 0x731   : > { %3668 = vmatmul.mubr.f32.gmra.mrb[8].mxu0 %v5564_v11  ;;  %v2230_v25 = vmul.f32 %v5498_v37, %v2207_v45 }
 0x732   : > { %3670 = vmatprep.mubr.f32.mxu0 %v5568_v56 }
 0x733   : > { %v5576_v51 = vadd.f32 %v5504_v7, %v2230_v25 }
 0x735   : > { %3671 = vmatmul.mubr.f32.gmra.mrb[10].mxu0 %v5576_v51 }
 0x73e   : > { %v2143_v53 = vpop.xlane.xlu1 %2142 }
 0x73f   : > { %v2141_v32 = vpop.xlane.xlu0 %2140  ;;  %v2161_v16 = vmul.f32 0.0078125, %v2143_v53 }
 0x740   : > { %v2160_v14 = vmul.f32 0.0078125, %v2141_v32 }
 0x741   : > { %v2177_v4 = vadd.f32 1e-06, %v2161_v16 }
 0x742   : > { %v2176_v46 = vadd.f32 1e-06, %v2160_v14  ;;  %v2147_v48 = vpop.xlane.xlu1 %2146 }
 0x743   : > { %v2145_v36 = vpop.xlane.xlu0 %2144  ;;  %v2163_v54 = vmul.f32 0.0078125, %v2147_v48 }
 0x744   : > { %v2162_v40 = vmul.f32 0.0078125, %v2145_v36  ;;  %4200 = vrsqrt.f32 %v2176_v46 }
 0x745   : > { %4202 = vrsqrt.f32 %v2177_v4  ;;  %v2179_v38 = vadd.f32 1e-06, %v2163_v54 }
 0x746   : > { %v2178_v61 = vadd.f32 1e-06, %v2162_v40 }
 0x748   : > { %4204 = vrsqrt.f32 %v2178_v61 }
 0x749   : > { %4206 = vrsqrt.f32 %v2179_v38 }
 0x74e   : > { %v4201_v26 = vpop.eup %4200 }
 0x74f   : > { %v2208_v22 = vmul.f32 %v4201_v26, %v5432_v52  ;;  %v4203_v30 = vpop.eup %4202 }
 0x750   : > { %v2209_v9 = vmul.f32 %v4203_v30, %v5435_v43 }
 0x751   : > { %v2231_v12 = vmul.f32 %v5498_v37, %v2208_v22 }
 0x752   : > { %v4205_v29 = vpop.eup %4204  ;;  %v2232_v32 = vmul.f32 %v5498_v37, %v2209_v9 }
 0x753   : > { %v5580_v31 = vadd.f32 %v5504_v7, %v2231_v12  ;;  %v2210_v52 = vmul.f32 %v4205_v29, %v5448_v15  ;;  %v4207_v55 = vpop.eup %4206 }
 0x754   : > { %v5588_v14 = vadd.f32 %v5504_v7, %v2232_v32  ;;  %v2211_v62 = vmul.f32 %v4207_v55, %v5451_v6  ;;  %v2449_v6 = vld [vmem:[%s5972_s8 + $0x38] sm:$0xff] }
 0x755   : > { %3673 = vmatprep.mubr.f32.mxu0 %v5580_v31  ;;  %v2233_v63 = vmul.f32 %v5498_v37, %v2210_v52  ;;  %v3891_v35 = vpack.c.bf16 %v2449_v6, %v2448_v34 }
 0x756   : > { %3674 = vmatmul.mubr.f32.gmra.mrb[12].mxu0 %v5588_v14  ;;  %v2234_v15 = vmul.f32 %v5498_v37, %v2211_v62  ;;  %v3166_v37 = vld [vmem:[%s6039_s11] ss:$0 sm:$0xff] }
 0x757   : > { %v5592_v43 = vadd.f32 %v5504_v7, %v2233_v63  ;;  %3892 = vmatprep.subr.bf16.mxu1 %v3891_v35 }
 0x758   : > { %v5598_v13 = vadd.f32 %v5504_v7, %v2234_v15  ;;  %3894 = vmatpush3.bf16.msra.mxu1 %v3891_v35 }
 0x759   : > { %3676 = vmatprep.mubr.f32.mxu0 %v5592_v43 }
 0x75a   : > { %3677 = vmatmul.mubr.f32.gmra.mrb[14].mxu0 %v5598_v13 }
 0x7f4   : > { %v3657_v46 = vpop.f32.mrb[0].mxu0 }
 0x7f5   : > { %v2353_v7 = vadd.f32 %v3657_v46, %v3166_v37  ;;  %v2347_v1 = vpop.f32.mrb[1].mxu0 }
 0x7f6   : > { %v2348_v53 = vadd.f32 %v3166_v37, %v2347_v1 }
 0x7f7   : > { %v2427_v49 = vmax.f32 %v2353_v7, 0.0  ;;  %v3167_v7 = vld [vmem:[%s6040_s23] ss:$0 sm:$0xff] }
 0x7f8   : > { %v2426_v36 = vmax.f32 %v2348_v53, 0.0  ;;  %v3660_v47 = vpop.f32.mrb[2].mxu0 }
 0x7f9   : > { %v2363_v16 = vadd.f32 %v3660_v47, %v3166_v37  ;;  %v2357_v40 = vpop.f32.mrb[3].mxu0 }
 0x7fa   : > { %v2358_v18 = vadd.f32 %v3166_v37, %v2357_v40  ;;  %3695 = vmatprep.mubr.msk.f32.mxu1 %vm2457_vm0, %v2426_v36 }
 0x7fb   : > { %3696 = vmatmul.mubr.msk.f32.vlgmr.msra.gmra.mrb[0].mxu1 %vm2457_vm0, %v2427_v49  ;;  %v2429_v4 = vmax.f32 %v2363_v16, 0.0 }
 0x7fc   : > { %v2428_v28 = vmax.f32 %v2358_v18, 0.0  ;;  %v3663_v42 = vpop.f32.mrb[4].mxu0 }
 0x7fd   : > { %v2373_v61 = vadd.f32 %v3663_v42, %v3166_v37  ;;  %v2367_v59 = vpop.f32.mrb[5].mxu0 }
 0x7fe   : > { %v2368_v8 = vadd.f32 %v3166_v37, %v2367_v59  ;;  %3698 = vmatprep.mubr.msk.f32.mxu1 %vm2457_vm0, %v2428_v28 }
 0x7ff   : > { %3699 = vmatmul.mubr.msk.f32.gmra.mrb[2].mxu1 %vm2457_vm0, %v2429_v4  ;;  %v2431_v54 = vmax.f32 %v2373_v61, 0.0 }
 0x800   : > { %v2430_v48 = vmax.f32 %v2368_v8, 0.0  ;;  %v3666_v10 = vpop.f32.mrb[6].mxu0 }
 0x801   : > { %v2383_v21 = vadd.f32 %v3666_v10, %v3166_v37  ;;  %v2377_v0 = vpop.f32.mrb[7].mxu0 }
 0x802   : > { %v2378_v23 = vadd.f32 %v3166_v37, %v2377_v0  ;;  %3701 = vmatprep.mubr.msk.f32.mxu1 %vm2457_vm0, %v2430_v48 }
 0x803   : > { %3702 = vmatmul.mubr.msk.f32.gmra.mrb[4].mxu1 %vm2457_vm0, %v2431_v54  ;;  %v2433_v39 = vmax.f32 %v2383_v21, 0.0 }
 0x804   : > { %v2432_v38 = vmax.f32 %v2378_v23, 0.0  ;;  %v3669_v27 = vpop.f32.mrb[8].mxu0 }
 0x805   : > { %v2393_v24 = vadd.f32 %v3669_v27, %v3166_v37  ;;  %v2387_v58 = vpop.f32.mrb[9].mxu0 }
 0x806   : > { %v2388_v60 = vadd.f32 %v3166_v37, %v2387_v58  ;;  %3704 = vmatprep.mubr.msk.f32.mxu1 %vm2457_vm0, %v2432_v38 }
 0x807   : > { %3705 = vmatmul.mubr.msk.f32.gmra.mrb[6].mxu1 %vm2457_vm0, %v2433_v39  ;;  %v2435_v26 = vmax.f32 %v2393_v24, 0.0 }
 0x808   : > { %v2434_v5 = vmax.f32 %v2388_v60, 0.0  ;;  %v3672_v2 = vpop.f32.mrb[10].mxu0 }
 0x809   : > { %v2403_v45 = vadd.f32 %v3672_v2, %v3166_v37  ;;  %v2397_v22 = vpop.f32.mrb[11].mxu0 }
 0x80a   : > { %v2398_v25 = vadd.f32 %v3166_v37, %v2397_v22  ;;  %3707 = vmatprep.mubr.msk.f32.mxu1 %vm2457_vm0, %v2434_v5 }
 0x80b   : > { %3708 = vmatmul.mubr.msk.f32.gmra.mrb[8].mxu1 %vm2457_vm0, %v2435_v26  ;;  %v2437_v29 = vmax.f32 %v2403_v45, 0.0 }
 0x80c   : > { %v2436_v30 = vmax.f32 %v2398_v25, 0.0 }
 0x80e   : > { %3710 = vmatprep.mubr.msk.f32.mxu1 %vm2457_vm0, %v2436_v30 }
 0x80f   : > { %3711 = vmatmul.mubr.msk.f32.gmra.mrb[10].mxu1 %vm2457_vm0, %v2437_v29 }
 0x829   : > { %v3675_v12 = vpop.f32.mrb[12].mxu0 }
 0x82a   : > { %v2413_v9 = vadd.f32 %v3675_v12, %v3166_v37  ;;  %v2407_v52 = vpop.f32.mrb[13].mxu0 }
 0x82b   : > { %v2408_v32 = vadd.f32 %v3166_v37, %v2407_v52 }
 0x82c   : > { %v2439_v62 = vmax.f32 %v2413_v9, 0.0 }
 0x82d   : > { %v2438_v55 = vmax.f32 %v2408_v32, 0.0  ;;  %v3678_v63 = vpop.f32.mrb[14].mxu0 }
 0x82e   : > { %v2423_v15 = vadd.f32 %v3678_v63, %v3166_v37  ;;  %v2417_v34 = vpop.f32.mrb[15].mxu0 }
 0x82f   : > { %v2418_v6 = vadd.f32 %v3166_v37, %v2417_v34  ;;  %3713 = vmatprep.mubr.msk.f32.mxu1 %vm2457_vm0, %v2438_v55 }
 0x830   : > { %3714 = vmatmul.mubr.msk.f32.gmra.mrb[12].mxu1 %vm2457_vm0, %v2439_v62  ;;  %v2441_v46 = vmax.f32 %v2423_v15, 0.0 }
 0x831   : > { %v2440_v35 = vmax.f32 %v2418_v6, 0.0 }
 0x833   : > { %3716 = vmatprep.mubr.msk.f32.mxu1 %vm2457_vm0, %v2440_v35 }
 0x834   : > { %3717 = vmatmul.mubr.msk.f32.gmra.mrb[14].mxu1 %vm2457_vm0, %v2441_v46 }
 0x8ce   : > { %v3697_v1 = vpop.f32.mrb[0].mxu1 }
 0x8cf   : > { %v2578_v53 = vadd.f32 %v3697_v1, %v3167_v7  ;;  %v2572_v36 = vpop.f32.mrb[1].mxu1 }
 0x8d0   : > { %v2573_v47 = vadd.f32 %v3167_v7, %v2572_v36 }
 0x8d1   : > { %v5630_v37 = vadd.f32 %v2578_v53, %v5516_v3 }
 0x8d2   : > { %v3700_v49 = vpop.f32.mrb[2].mxu1  ;;  %v5633_v16 = vadd.f32 %v2573_v47, %v5508_v17 }
 0x8d3   : > { %v2588_v40 = vadd.f32 %v3700_v49, %v3167_v7  ;;  %2669 = vadd.xlane.f32.xlu1 %v5630_v37  ;;  %v2582_v18 = vpop.f32.mrb[3].mxu1 }
 0x8d4   : > { %v2583_v28 = vadd.f32 %v3167_v7, %v2582_v18  ;;  %2667 = vadd.xlane.f32.xlu0 %v5633_v16 }
 0x8d5   : > { %v5638_v42 = vadd.f32 %v2588_v40, %v5527_v57 }
 0x8d6   : > { %v3703_v4 = vpop.f32.mrb[4].mxu1  ;;  %v5641_v61 = vadd.f32 %v2583_v28, %v5520_v33 }
 0x8d7   : > { %v2598_v3 = vadd.f32 %v3703_v4, %v3167_v7  ;;  %2673 = vadd.xlane.f32.xlu1 %v5638_v42  ;;  %v2592_v59 = vpop.f32.mrb[5].mxu1 }
 0x8d8   : > { %v2593_v17 = vadd.f32 %v3167_v7, %v2592_v59  ;;  %2671 = vadd.xlane.f32.xlu0 %v5641_v61 }
 0x8d9   : > { %v5646_v8 = vadd.f32 %v2598_v3, %v5540_v50 }
 0x8da   : > { %v3706_v48 = vpop.f32.mrb[6].mxu1  ;;  %v5649_v10 = vadd.f32 %v2593_v17, %v5534_v41 }
 0x8db   : > { %v2608_v57 = vadd.f32 %v3706_v48, %v3167_v7  ;;  %2677 = vadd.xlane.f32.xlu1 %v5646_v8  ;;  %v2602_v54 = vpop.f32.mrb[7].mxu1 }
 0x8dc   : > { %v2603_v33 = vadd.f32 %v3167_v7, %v2602_v54  ;;  %2675 = vadd.xlane.f32.xlu0 %v5649_v10 }
 0x8dd   : > { %v5654_v21 = vadd.f32 %v2608_v57, %v5552_v44 }
 0x8de   : > { %v3709_v0 = vpop.f32.mrb[8].mxu1  ;;  %v5657_v23 = vadd.f32 %v2603_v33, %v5544_v20 }
 0x8df   : > { %v2618_v50 = vadd.f32 %v3709_v0, %v3167_v7  ;;  %2681 = vadd.xlane.f32.xlu1 %v5654_v21  ;;  %v2612_v38 = vpop.f32.mrb[9].mxu1 }
 0x8e0   : > { %v2613_v41 = vadd.f32 %v3167_v7, %v2612_v38  ;;  %2679 = vadd.xlane.f32.xlu0 %v5657_v23 }
 0x8e1   : > { %v5662_v27 = vadd.f32 %v2618_v50, %v5564_v11 }
 0x8e2   : > { %v3712_v39 = vpop.f32.mrb[10].mxu1  ;;  %v5665_v24 = vadd.f32 %v2613_v41, %v5556_v19 }
 0x8e3   : > { %v2628_v44 = vadd.f32 %v3712_v39, %v3167_v7  ;;  %2685 = vadd.xlane.f32.xlu1 %v5662_v27  ;;  %v2622_v58 = vpop.f32.mrb[11].mxu1 }
 0x8e4   : > { %v2623_v20 = vadd.f32 %v3167_v7, %v2622_v58  ;;  %2683 = vadd.xlane.f32.xlu0 %v5665_v24 }
 0x8e5   : > { %v5670_v60 = vadd.f32 %v2628_v44, %v5576_v51 }
 0x8e6   : > { %v5673_v2 = vadd.f32 %v2623_v20, %v5568_v56 }
 0x8e7   : > { %2689 = vadd.xlane.f32.xlu1 %v5670_v60 }
 0x8e8   : > { %2687 = vadd.xlane.f32.xlu0 %v5673_v2 }
 0x903   : > { %v3715_v5 = vpop.f32.mrb[12].mxu1 }
 0x904   : > { %v2638_v11 = vadd.f32 %v3715_v5, %v3167_v7  ;;  %v2632_v26 = vpop.f32.mrb[13].mxu1 }
 0x905   : > { %v2633_v19 = vadd.f32 %v3167_v7, %v2632_v26 }
 0x906   : > { %v5678_v45 = vadd.f32 %v2638_v11, %v5588_v14 }
 0x907   : > { %v3718_v22 = vpop.f32.mrb[14].mxu1  ;;  %v5681_v25 = vadd.f32 %v2633_v19, %v5580_v31 }
 0x908   : > { %v2648_v51 = vadd.f32 %v3718_v22, %v3167_v7  ;;  %2693 = vadd.xlane.f32.xlu1 %v5678_v45  ;;  %v2642_v30 = vpop.f32.mrb[15].mxu1 }
 0x909   : > { %v2643_v56 = vadd.f32 %v3167_v7, %v2642_v30  ;;  %2691 = vadd.xlane.f32.xlu0 %v5681_v25 }
 0x90a   : > { %v5686_v12 = vadd.f32 %v2648_v51, %v5598_v13 }
 0x90b   : > { %v5689_v29 = vadd.f32 %v2643_v56, %v5592_v43 }
 0x90c   : > { %2697 = vadd.xlane.f32.xlu1 %v5686_v12 }
 0x90d   : > { %2695 = vadd.xlane.f32.xlu0 %v5689_v29 }
 0x960   : > { %v2670_v14 = vpop.xlane.xlu1 %2669 }
 0x961   : > { %v2700_v31 = vmul.f32 0.0078125, %v2670_v14  ;;  %v2668_v9 = vpop.xlane.xlu0 %2667 }
 0x962   : > { %v2699_v52 = vmul.f32 0.0078125, %v2668_v9 }
 0x963   : > { %v5694_v32 = vsub.f32 %v5630_v37, %v2700_v31 }
 0x964   : > { %v5697_v55 = vsub.f32 %v5633_v16, %v2699_v52  ;;  %v2674_v63 = vpop.xlane.xlu1 %2673 }
 0x965   : > { %v2702_v13 = vmul.f32 0.0078125, %v2674_v63  ;;  %v2672_v62 = vpop.xlane.xlu0 %2671  ;;  %v2732_v43 = vmul.f32 %v5694_v32, %v5694_v32 }
 0x966   : > { %v2701_v15 = vmul.f32 0.0078125, %v2672_v62  ;;  %v2731_v34 = vmul.f32 %v5697_v55, %v5697_v55 }
 0x967   : > { %v5704_v6 = vsub.f32 %v5638_v42, %v2702_v13  ;;  %2749 = vadd.xlane.f32.xlu1 %v2732_v43 }
 0x968   : > { %v5707_v35 = vsub.f32 %v5641_v61, %v2701_v15  ;;  %v2678_v46 = vpop.xlane.xlu1 %2677  ;;  %2747 = vadd.xlane.f32.xlu0 %v2731_v34 }
 0x969   : > { %v2704_v7 = vmul.f32 0.0078125, %v2678_v46  ;;  %v2676_v1 = vpop.xlane.xlu0 %2675  ;;  %v2734_v53 = vmul.f32 %v5704_v6, %v5704_v6 }
 0x96a   : > { %v2703_v36 = vmul.f32 0.0078125, %v2676_v1  ;;  %v2733_v47 = vmul.f32 %v5707_v35, %v5707_v35 }
 0x96b   : > { %v5714_v37 = vsub.f32 %v5646_v8, %v2704_v7  ;;  %2753 = vadd.xlane.f32.xlu1 %v2734_v53 }
 0x96c   : > { %v5717_v49 = vsub.f32 %v5649_v10, %v2703_v36  ;;  %v2682_v16 = vpop.xlane.xlu1 %2681  ;;  %2751 = vadd.xlane.f32.xlu0 %v2733_v47 }
 0x96d   : > { %v2706_v40 = vmul.f32 0.0078125, %v2682_v16  ;;  %v2680_v18 = vpop.xlane.xlu0 %2679  ;;  %v2736_v28 = vmul.f32 %v5714_v37, %v5714_v37 }
 0x96e   : > { %v2705_v42 = vmul.f32 0.0078125, %v2680_v18  ;;  %v2735_v4 = vmul.f32 %v5717_v49, %v5717_v49 }
 0x96f   : > { %v5724_v61 = vsub.f32 %v5654_v21, %v2706_v40  ;;  %2757 = vadd.xlane.f32.xlu1 %v2736_v28 }
 0x970   : > { %v5727_v3 = vsub.f32 %v5657_v23, %v2705_v42  ;;  %v2686_v59 = vpop.xlane.xlu1 %2685  ;;  %2755 = vadd.xlane.f32.xlu0 %v2735_v4 }
 0x971   : > { %v2708_v17 = vmul.f32 0.0078125, %v2686_v59  ;;  %v2684_v8 = vpop.xlane.xlu0 %2683  ;;  %v2738_v48 = vmul.f32 %v5724_v61, %v5724_v61 }
 0x972   : > { %v2707_v10 = vmul.f32 0.0078125, %v2684_v8  ;;  %v2737_v57 = vmul.f32 %v5727_v3, %v5727_v3 }
 0x973   : > { %v5734_v54 = vsub.f32 %v5662_v27, %v2708_v17  ;;  %2761 = vadd.xlane.f32.xlu1 %v2738_v48  ;;  %v5776_v17 = vld [vmem:[%s6041_s17] ss:$0 sm:$0xff] }
 0x974   : > { %v5737_v33 = vsub.f32 %v5665_v24, %v2707_v10  ;;  %v2690_v21 = vpop.xlane.xlu1 %2689  ;;  %2759 = vadd.xlane.f32.xlu0 %v2737_v57 }
 0x975   : > { %v2710_v0 = vmul.f32 0.0078125, %v2690_v21  ;;  %v2688_v23 = vpop.xlane.xlu0 %2687  ;;  %v2740_v50 = vmul.f32 %v5734_v54, %v5734_v54 }
 0x976   : > { %v2709_v38 = vmul.f32 0.0078125, %v2688_v23  ;;  %v2739_v41 = vmul.f32 %v5737_v33, %v5737_v33 }
 0x977   : > { %v5744_v39 = vsub.f32 %v5670_v60, %v2710_v0  ;;  %2765 = vadd.xlane.f32.xlu1 %v2740_v50  ;;  %v5782_v0 = vld [vmem:[%s6042_s18] ss:$0 sm:$0xff] }
 0x978   : > { %v5747_v27 = vsub.f32 %v5673_v2, %v2709_v38  ;;  %2763 = vadd.xlane.f32.xlu0 %v2739_v41 }
 0x979   : > { %v2742_v20 = vmul.f32 %v5744_v39, %v5744_v39 }
 0x97a   : > { %v2741_v11 = vmul.f32 %v5747_v27, %v5747_v27 }
 0x97b   : > { %2769 = vadd.xlane.f32.xlu1 %v2742_v20 }
 0x97c   : > { %2767 = vadd.xlane.f32.xlu0 %v2741_v11 }
 0x995   : > { %v2694_v24 = vpop.xlane.xlu1 %2693 }
 0x996   : > { %v2712_v44 = vmul.f32 0.0078125, %v2694_v24  ;;  %v2692_v58 = vpop.xlane.xlu0 %2691 }
 0x997   : > { %v2711_v5 = vmul.f32 0.0078125, %v2692_v58 }
 0x998   : > { %v5754_v26 = vsub.f32 %v5678_v45, %v2712_v44 }
 0x999   : > { %v5757_v60 = vsub.f32 %v5681_v25, %v2711_v5  ;;  %v2698_v2 = vpop.xlane.xlu1 %2697 }
 0x99a   : > { %v2714_v19 = vmul.f32 0.0078125, %v2698_v2  ;;  %v2696_v22 = vpop.xlane.xlu0 %2695  ;;  %v2744_v51 = vmul.f32 %v5754_v26, %v5754_v26 }
 0x99b   : > { %v2713_v30 = vmul.f32 0.0078125, %v2696_v22  ;;  %v2743_v56 = vmul.f32 %v5757_v60, %v5757_v60 }
 0x99c   : > { %v5764_v14 = vsub.f32 %v5686_v12, %v2714_v19  ;;  %2773 = vadd.xlane.f32.xlu1 %v2744_v51 }
 0x99d   : > { %v5767_v45 = vsub.f32 %v5689_v29, %v2713_v30  ;;  %2771 = vadd.xlane.f32.xlu0 %v2743_v56 }
 0x99e   : > { %v2746_v25 = vmul.f32 %v5764_v14, %v5764_v14 }
 0x99f   : > { %v2745_v31 = vmul.f32 %v5767_v45, %v5767_v45 }
 0x9a0   : > { %2777 = vadd.xlane.f32.xlu1 %v2746_v25 }
 0x9a1   : > { %2775 = vadd.xlane.f32.xlu0 %v2745_v31 }
 0x9f4   : > { %v2750_v9 = vpop.xlane.xlu1 %2749 }
 0x9f5   : > { %v2780_v52 = vmul.f32 0.0078125, %v2750_v9  ;;  %v2748_v63 = vpop.xlane.xlu0 %2747 }
 0x9f6   : > { %v2779_v13 = vmul.f32 0.0078125, %v2748_v63 }
 0x9f7   : > { %v2796_v62 = vadd.f32 1e-06, %v2780_v52 }
 0x9f8   : > { %v2795_v12 = vadd.f32 1e-06, %v2779_v13  ;;  %v2754_v43 = vpop.xlane.xlu1 %2753 }
 0x9f9   : > { %4208 = vrsqrt.f32 %v2796_v62  ;;  %v2782_v15 = vmul.f32 0.0078125, %v2754_v43  ;;  %v2752_v29 = vpop.xlane.xlu0 %2751 }
 0x9fa   : > { %4210 = vrsqrt.f32 %v2795_v12  ;;  %v2781_v34 = vmul.f32 0.0078125, %v2752_v29 }
 0x9fb   : > { %v2798_v46 = vadd.f32 1e-06, %v2782_v15 }
 0x9fc   : > { %v2797_v7 = vadd.f32 1e-06, %v2781_v34  ;;  %v2758_v1 = vpop.xlane.xlu1 %2757 }
 0x9fd   : > { %4212 = vrsqrt.f32 %v2798_v46  ;;  %v2784_v53 = vmul.f32 0.0078125, %v2758_v1  ;;  %v2756_v36 = vpop.xlane.xlu0 %2755 }
 0x9fe   : > { %4214 = vrsqrt.f32 %v2797_v7  ;;  %v2783_v47 = vmul.f32 0.0078125, %v2756_v36 }
 0x9ff   : > { %v2800_v16 = vadd.f32 1e-06, %v2784_v53 }
 0xa00   : > { %v2799_v40 = vadd.f32 1e-06, %v2783_v47  ;;  %v2762_v18 = vpop.xlane.xlu1 %2761 }
 0xa01   : > { %4216 = vrsqrt.f32 %v2800_v16  ;;  %v2786_v28 = vmul.f32 0.0078125, %v2762_v18  ;;  %v2760_v42 = vpop.xlane.xlu0 %2759 }
 0xa02   : > { %4218 = vrsqrt.f32 %v2799_v40  ;;  %v2785_v4 = vmul.f32 0.0078125, %v2760_v42 }
 0xa03   : > { %v4209_v59 = vpop.eup %4208  ;;  %v2802_v8 = vadd.f32 1e-06, %v2786_v28 }
 0xa04   : > { %v4211_v48 = vpop.eup %4210  ;;  %v2828_v10 = vmul.f32 %v4209_v59, %v5694_v32  ;;  %v2801_v57 = vadd.f32 1e-06, %v2785_v4  ;;  %v2766_v21 = vpop.xlane.xlu1 %2765 }
 0xa05   : > { %v2827_v23 = vmul.f32 %v4211_v48, %v5697_v55  ;;  %4220 = vrsqrt.f32 %v2802_v8  ;;  %v2788_v50 = vmul.f32 0.0078125, %v2766_v21  ;;  %v2764_v38 = vpop.xlane.xlu0 %2763 }
 0xa06   : > { %v2851_v41 = vmul.f32 %v5776_v17, %v2828_v10  ;;  %4222 = vrsqrt.f32 %v2801_v57  ;;  %v2787_v24 = vmul.f32 0.0078125, %v2764_v38 }
 0xa07   : > { %v4213_v44 = vpop.eup %4212  ;;  %v2850_v32 = vmul.f32 %v5776_v17, %v2827_v23  ;;  %v2804_v58 = vadd.f32 1e-06, %v2788_v50 }
 0xa08   : > { %v4215_v20 = vpop.eup %4214  ;;  %v2874_v5 = vadd.f32 %v5782_v0, %v2851_v41  ;;  %v2830_v11 = vmul.f32 %v4213_v44, %v5704_v6  ;;  %v2803_v2 = vadd.f32 1e-06, %v2787_v24  ;;  %v2770_v55 = vpop.xlane.xlu1 %2769 }
 0xa09   : > { %v2873_v19 = vadd.f32 %v5782_v0, %v2850_v32  ;;  %v2829_v22 = vmul.f32 %v4215_v20, %v5707_v35  ;;  %4224 = vrsqrt.f32 %v2804_v58  ;;  %v2790_v51 = vmul.f32 0.0078125, %v2770_v55  ;;  %v2768_v30 = vpop.xlane.xlu0 %2767 }
 0xa0a   : > { %2890 = vst [vmem:[%s4646_s19 + $0x8] sm:$0xff] %v2874_v5  ;;  %v2853_v56 = vmul.f32 %v5776_v17, %v2830_v11  ;;  %4226 = vrsqrt.f32 %v2803_v2  ;;  %v2789_v25 = vmul.f32 0.0078125, %v2768_v30 }
 0xa0b   : > { %v4217_v31 = vpop.eup %4216  ;;  %2889 = vst [vmem:[%s4646_s19] sm:$0xff] %v2873_v19  ;;  %v2852_v9 = vmul.f32 %v5776_v17, %v2829_v22  ;;  %v2806_v6 = vadd.f32 1e-06, %v2790_v51 }
 0xa0c   : > { %v4219_v52 = vpop.eup %4218  ;;  %v2876_v63 = vadd.f32 %v5782_v0, %v2853_v56  ;;  %v2832_v35 = vmul.f32 %v4217_v31, %v5714_v37  ;;  %v2805_v13 = vadd.f32 1e-06, %v2789_v25 }
 0xa0d   : > { %v2875_v12 = vadd.f32 %v5782_v0, %v2852_v9  ;;  %v2831_v43 = vmul.f32 %v4219_v52, %v5717_v49  ;;  %4228 = vrsqrt.f32 %v2806_v6 }
 0xa0e   : > { %2892 = vst [vmem:[%s4646_s19 + $0x18] sm:$0xff] %v2876_v63  ;;  %v2855_v34 = vmul.f32 %v5776_v17, %v2832_v35  ;;  %4230 = vrsqrt.f32 %v2805_v13 }
 0xa0f   : > { %v4221_v7 = vpop.eup %4220  ;;  %2891 = vst [vmem:[%s4646_s19 + $0x10] sm:$0xff] %v2875_v12  ;;  %v2854_v1 = vmul.f32 %v5776_v17, %v2831_v43 }
 0xa10   : > { %v4223_v53 = vpop.eup %4222  ;;  %v2878_v36 = vadd.f32 %v5782_v0, %v2855_v34  ;;  %v2834_v49 = vmul.f32 %v4221_v7, %v5724_v61 }
 0xa11   : > { %v2877_v40 = vadd.f32 %v5782_v0, %v2854_v1  ;;  %v2833_v18 = vmul.f32 %v4223_v53, %v5727_v3 }
 0xa12   : > { %2894 = vst [vmem:[%s4646_s19 + $0x28] sm:$0xff] %v2878_v36  ;;  %v2857_v4 = vmul.f32 %v5776_v17, %v2834_v49 }
 0xa13   : > { %v4225_v8 = vpop.eup %4224  ;;  %2893 = vst [vmem:[%s4646_s19 + $0x20] sm:$0xff] %v2877_v40  ;;  %v2856_v61 = vmul.f32 %v5776_v17, %v2833_v18 }
 0xa14   : > { %v4227_v10 = vpop.eup %4226  ;;  %v2880_v57 = vadd.f32 %v5782_v0, %v2857_v4  ;;  %v2836_v3 = vmul.f32 %v4225_v8, %v5734_v54 }
 0xa15   : > { %v2879_v23 = vadd.f32 %v5782_v0, %v2856_v61  ;;  %v2835_v50 = vmul.f32 %v4227_v10, %v5737_v33 }
 0xa16   : > { %2896 = vst [vmem:[%s4646_s19 + $0x38] sm:$0xff] %v2880_v57  ;;  %v2859_v38 = vmul.f32 %v5776_v17, %v2836_v3 }
 0xa17   : > { %v4229_v41 = vpop.eup %4228  ;;  %2895 = vst [vmem:[%s4646_s19 + $0x30] sm:$0xff] %v2879_v23  ;;  %v2858_v24 = vmul.f32 %v5776_v17, %v2835_v50 }
 0xa18   : > { %v4231_v44 = vpop.eup %4230  ;;  %v2882_v54 = vadd.f32 %v5782_v0, %v2859_v38  ;;  %v2838_v32 = vmul.f32 %v4229_v41, %v5744_v39 }
 0xa19   : > { %v2881_v58 = vadd.f32 %v5782_v0, %v2858_v24  ;;  %v2837_v33 = vmul.f32 %v4231_v44, %v5747_v27 }
 0xa1a   : > { %2898 = vst [vmem:[%s4646_s19 + $0x48] sm:$0xff] %v2882_v54  ;;  %v2861_v20 = vmul.f32 %v5776_v17, %v2838_v32 }
 0xa1b   : > { %2897 = vst [vmem:[%s4646_s19 + $0x40] sm:$0xff] %v2881_v58  ;;  %v2860_v11 = vmul.f32 %v5776_v17, %v2837_v33 }
 0xa1c   : > { %v2884_v55 = vadd.f32 %v5782_v0, %v2861_v20 }
 0xa1d   : > { %v2883_v39 = vadd.f32 %v5782_v0, %v2860_v11 }
 0xa1e   : > { %2900 = vst [vmem:[%s4646_s19 + $0x58] sm:$0xff] %v2884_v55 }
 0xa1f   : > { %2899 = vst [vmem:[%s4646_s19 + $0x50] sm:$0xff] %v2883_v39 }
 0xa29   : > { %v2774_v62 = vpop.xlane.xlu1 %2773 }
 0xa2a   : > { %v2792_v15 = vmul.f32 0.0078125, %v2774_v62  ;;  %v2772_v29 = vpop.xlane.xlu0 %2771 }
 0xa2b   : > { %v2791_v46 = vmul.f32 0.0078125, %v2772_v29 }
 0xa2c   : > { %v2808_v37 = vadd.f32 1e-06, %v2792_v15 }
 0xa2d   : > { %v2807_v47 = vadd.f32 1e-06, %v2791_v46  ;;  %v2778_v16 = vpop.xlane.xlu1 %2777 }
 0xa2e   : > { %4232 = vrsqrt.f32 %v2808_v37  ;;  %v2794_v28 = vmul.f32 0.0078125, %v2778_v16  ;;  %v2776_v42 = vpop.xlane.xlu0 %2775 }
 0xa2f   : > { %4234 = vrsqrt.f32 %v2807_v47  ;;  %v2793_v59 = vmul.f32 0.0078125, %v2776_v42 }
 0xa30   : > { %v2810_v48 = vadd.f32 1e-06, %v2794_v28 }
 0xa31   : > { %v2809_v21 = vadd.f32 1e-06, %v2793_v59 }
 0xa32   : > { %4236 = vrsqrt.f32 %v2810_v48 }
 0xa33   : > { %4238 = vrsqrt.f32 %v2809_v21 }
 0xa38   : > { %v4233_v5 = vpop.eup %4232 }
 0xa39   : > { %v4235_v2 = vpop.eup %4234  ;;  %v2840_v19 = vmul.f32 %v4233_v5, %v5754_v26 }
 0xa3a   : > { %v2839_v22 = vmul.f32 %v4235_v2, %v5757_v60 }
 0xa3b   : > { %v2863_v27 = vmul.f32 %v5776_v17, %v2840_v19 }
 0xa3c   : > { %v4237_v51 = vpop.eup %4236  ;;  %v2862_v30 = vmul.f32 %v5776_v17, %v2839_v22 }
 0xa3d   : > { %v4239_v56 = vpop.eup %4238  ;;  %v2886_v25 = vadd.f32 %v5782_v0, %v2863_v27  ;;  %v2842_v31 = vmul.f32 %v4237_v51, %v5764_v14 }
 0xa3e   : > { %v2885_v26 = vadd.f32 %v5782_v0, %v2862_v30  ;;  %v2841_v9 = vmul.f32 %v4239_v56, %v5767_v45 }
 0xa3f   : > { %2902 = vst [vmem:[%s4646_s19 + $0x68] sm:$0xff] %v2886_v25  ;;  %v2865_v60 = vmul.f32 %v5776_v17, %v2842_v31 }
 0xa40   : > { %2901 = vst [vmem:[%s4646_s19 + $0x60] sm:$0xff] %v2885_v26  ;;  %v2864_v6 = vmul.f32 %v5776_v17, %v2841_v9 }
 0xa41   : > { %v2888_v52 = vadd.f32 %v5782_v0, %v2865_v60 }
 0xa42   : > { %v2887_v63 = vadd.f32 %v5782_v0, %v2864_v6 }
 0xa43   : > { %2904 = vst [vmem:[%s4646_s19 + $0x78] sm:$0xff] %v2888_v52 }
 0xa44   : > { %2903 = vst [vmem:[%s4646_s19 + $0x70] sm:$0xff] %v2887_v63 }
 0xa45 PF: > { %s3198_s21 = sshll.u32 %s4378_s25, 11  ;;  %s6044_s29 = sld [smem:[#allocation32_spill]] }
 0xa46   : > { %s2924_s7 = sshll.u32 %s4646_s19, 4  ;;  %s6045_s11 = sand.u32 1, %s4366_s22   ;;  %s5854_s7 = int_to_ptr.vmem [resolvable:$true] %s2924_s7 }
 0xa47   : > { %s5858_s13 = scalar_lea.sflag [#allocation3], %s6045_s11  ;;  %s4240_s20 = scalar_lea.vmem %s5854_s7, 2048 }
 0xa48   : > { %p4241_p9 = scmp.ne.s32.totalorder %s5854_s7, %s4240_s20  ;;  %s4411_s23 = smov [#allocation2]  }
 0xa49   : > { %s4244_s26 = sshll.u32 %s4411_s23, 4  ;;  %s4245_s26 = int_to_ptr.vmem [resolvable:$false] %s4244_s26 }
 0xa4a   : > { %p4242_p10 = pnand %p4241_p9, %p4566_p3  ;;  %s4246_s28 = scalar_lea.vmem %s4245_s26, 4096 }
 0xa4b   : > { %s5851_s30 = scalar_lea.hbm %s6044_s29, %s3198_s21  ;;  %p4247_p0 = scmp.lt.s32.totalorder %s5854_s7, %s4245_s26 }
 0xa4c   : > { %p4243_p11 = pneg %p4242_p10  ;;  %p4248_p1 = scmp.lt.s32.totalorder %s4246_s28, %s4240_s20 }
 0xa4e   : > { %p4249_p4 = por %p4248_p1, %p4247_p0 }
 0xa50   : > { %p4250_p2 = pnand %p4249_p4, %p4243_p11 }
 0xa52   : > { %4253 = shalt.err (!%p4250_p2)
}
 0xa53   : > { %s4254_s19 = scalar_lea.hbm %s5851_s30, 2048  ;;  %s4258_s9 = scalar_lea.hbm %s6044_s29, 4096 }
 0xa54   : > { %p4255_p5 = scmp.ne.s32.totalorder %s5851_s30, %s4254_s19  ;;  %p4259_p9 = scmp.lt.u32.totalorder %s5851_s30, %s6044_s29 }
 0xa55   : > { %p4260_p10 = scmp.lt.u32.totalorder %s4258_s9, %s4254_s19  ;;  %p4262_p0 = scmp.lt.u32.totalorder %s4254_s19, %s5851_s30 }
 0xa56   : > { %p4256_p6 = pnand %p4255_p5, %p4566_p3 }
 0xa57   : > { %p4261_p11 = por %p4260_p10, %p4259_p9 }
 0xa58   : > { %p4257_p8 = pneg %p4256_p6 }
 0xa59   : > { %p4263_p1 = por %p4262_p0, %p4261_p11 }
 0xa5b   : > { %p4264_p4 = pnand %p4263_p1, %p4257_p8 }
 0xa5d   : > { %4267 = shalt.err (!%p4264_p4)
}
 0xa5e   : > { %s4412_s14 = smov 128   ;;  %s6046_s15 = sld [smem:[#allocation9_spill]] }
 0xa5f   : > { %s4413_s20 = smov 8   ;;  %s3190_s23 = sshll.u32 %s4374_s24, 4 }
 0xa60   : > { %3911 = dma.vmem_to_hbm [thread:$0]  (%p4566_p3), %s5854_s7, 2048, %s5851_s30, %s5858_s13, %s4412_s14, %s4412_s14, %s4413_s20  }
 0xa61   : > { %s3191_s26 = sshll.u32 %s4378_s25, 6  ;;  %s2942_s19 = sshll.u32 %s4648_s27, 4  ;;  %s5888_s19 = int_to_ptr.vmem [resolvable:$true] %s2942_s19 }
 0xa62   : > { %s2939_s28 = sadd.s32 %s3191_s26, %s3190_s23  ;;  %s6048_s18 = sld [smem:[#allocation33_spill]] }
 0xa63   : > { %s3192_s17 = sshll.u32 %s2939_s28, 7  ;;  %s4268_s2 = scalar_lea.vmem %s5888_s19, 2048 }
 0xa64   : > { %s6050_s16 = sand.u32 1, %s6046_s15   ;;  %p4269_p3 = scmp.ne.s32.totalorder %s5888_s19, %s4268_s2 }
 0xa65   : > { %s5897_s1 = scalar_lea.sflag [#allocation5], %s6050_s16  ;;  %s4414_s24 = smov [#allocation4]  }
 0xa66   : > { %p4270_p2 = pnand %p4269_p3, %p4595_p12  ;;  %s4272_s25 = sshll.u32 %s4414_s24, 4  ;;  %s4273_s25 = int_to_ptr.vmem [resolvable:$false] %s4272_s25 }
 0xa67   : > { %s4274_s27 = scalar_lea.vmem %s4273_s25, 4096  ;;  %p4275_p6 = scmp.lt.s32.totalorder %s5888_s19, %s4273_s25 }
 0xa68   : > { %s6049_s0 = smov %s6048_s18  ;;  %s5893_s21 = scalar_lea.hbm %s6048_s18, %s3192_s17 }
 0xa69   : > { %p4271_p5 = pneg %p4270_p2  ;;  %p4276_p8 = scmp.lt.s32.totalorder %s4274_s27, %s4268_s2 }
 0xa6b   : > { %p4277_p9 = por %p4276_p8, %p4275_p6 }
 0xa6d   : > { %p4278_p10 = pnand %p4277_p9, %p4271_p5 }
 0xa6f   : > { %4281 = shalt.err (!%p4278_p10)
}
 0xa70   : > { %s4282_s30 = scalar_lea.hbm %s5893_s21, 2048  ;;  %s4286_s15 = scalar_lea.hbm %s6049_s0, 16384 }
 0xa71   : > { %p4283_p11 = scmp.ne.s32.totalorder %s5893_s21, %s4282_s30  ;;  %p4287_p4 = scmp.lt.u32.totalorder %s5893_s21, %s6049_s0 }
 0xa72   : > { %p4288_p3 = scmp.lt.u32.totalorder %s4286_s15, %s4282_s30  ;;  %p4290_p5 = scmp.lt.u32.totalorder %s4282_s30, %s5893_s21 }
 0xa73   : > { %p4284_p0 = pnand %p4283_p11, %p4595_p12 }
 0xa74   : > { %p4289_p2 = por %p4288_p3, %p4287_p4 }
 0xa75   : > { %p4285_p1 = pneg %p4284_p0 }
 0xa76   : > { %p4291_p6 = por %p4290_p5, %p4289_p2 }
 0xa78   : > { %p4292_p8 = pnand %p4291_p6, %p4285_p1 }
 0xa7a   : > { %4295 = shalt.err (!%p4292_p8)
}
 0xa7b   : > { %3912 = dma.vmem_to_hbm [thread:$0]  (%p4595_p12), %s5888_s19, 2048, %s5893_s21, %s5897_s1, %s4412_s14, %s4412_s14, %s4413_s20  }
 0xa7c PF: > { %s6051_s2 = sld [smem:[#allocation15_spill]]  ;;  %s6052_s28 = sld [smem:[#allocation11_spill]] }
 0xa82   : > { %p3922_p9 = scmp.ge.s32.totalorder %s6051_s2, 2  ;;  %s2957_s12 = sand.u32 1, %s6052_s28  }
 0xa83   : > { %s2958_s9 = scalar_lea.sflag [#allocation3], %s2957_s12 }
 0xa84   : > { %p3916_p10 = pnand %p3922_p9, %p4583_p7 }
 0xa86   : > { %4341 = dma.done.wait (!%p3916_p10), %s2958_s9, 2048  }
 0xa87   : > { %4343 = vsyncadd (!%p3916_p10), %s2958_s9, 4294965248  ;;  %s6054_s18 = sld [smem:[#allocation8_spill]]  ;;  %p3919_p11 = pnand %p3922_p9, %p4607_p13 }
 0xa8d   : > { %s2966_s16 = sand.u32 1, %s6054_s18  }
 0xa8e   : > { %s2967_s24 = scalar_lea.sflag [#allocation5], %s2966_s16 }
 0xa8f   : > { %4345 = dma.done.wait (!%p3919_p11), %s2967_s24, 2048  }
 0xa90   : > { %4347 = vsyncadd (!%p3919_p11), %s2967_s24, 4294965248  ;;  %s32_s28 = sadd.s32 1, %s6051_s2   ;;  %s6056_s18 = sld [smem:[#allocation9_spill]] }
 0xa91   : > { %p29_p12 = scmp.ge.s32.totalorder %s32_s28, 10   ;;  %s6057_s19 = sld [smem:[#allocation10_spill]] }
 0xa92   : > { %s6058_s20 = sld [smem:[#allocation22_spill]]  ;;  %s6059_s1 = sld [smem:[#allocation12_spill]] }
 0xa93   : > { %s6060_s23 = sld [smem:[#allocation21_spill]]  ;;  %s6061_s24 = sld [smem:[#allocation13_spill]] }
 0xa94   : > { %s6062_s25 = sld [smem:[#allocation14_spill]]  ;;  %s6063_s26 = sld [smem:[#allocation16_spill]] }
 0xa95   : > { %s6064_s27 = sld [smem:[#allocation18_spill]]  ;;  %s6065_s21 = smov %s4366_s22 }
 0xa96   :  { %31 = sbr.rel (!%p29_p12) target bundleno = 20 (0x14), region = 145 }
 0xa98   : > { %s6066_s22 = smov %s6059_s1 }
 0xa9d   :  { %2972 = vsyncpa [#allocation3], 1 }
 0xa9e   :  { %2974 = vsyncpa [#allocation3 + $0x1], 1 }
 0xa9f   :  { %2975 = vsyncpa [#allocation5], 1 }
 0xaa0   :  { %2977 = vsyncpa [#allocation5 + $0x1], 1 }

</bundles_post_ra>
